<compile_context>
chip_gen: v7x
topology: tpu7x:2x2x1
jax: 0.10.0
libtpu: 0.0.40
codegen_flags: <defaults>
</compile_context>

<pallas_src>
import functools

import jax
import jax.numpy as jnp
from jax.experimental import pallas as pl
from jax.experimental.pallas import tpu as pltpu

EPS = 1e-5  # nn.BatchNorm2d default eps


# --------------------------------- fused kernel --------------------------------

def _bottleneck_kernel(x_ref, mask_ref, w1_ref, w2_ref, w3_ref,
                       g1_ref, b1_ref, g2_ref, b2_ref, g3_ref, b3_ref,
                       out_ref, a1_ref, patch_ref, *, n_valid, wp):
    Rtot, Cpad = x_ref.shape
    P = w1_ref.shape[1]
    L = out_ref.shape[0]
    inv_m = 1.0 / float(n_valid)
    bf16 = jnp.bfloat16

    def bn_scale_shift(s, ss, g_ref, b_ref):
        # train-mode BatchNorm (batch stats, biased variance), affine folded into
        # a single per-channel scale/shift.  Clamp variance (review concern).
        mean = s * inv_m
        var = jnp.maximum(ss * inv_m - mean * mean, 0.0)
        scale = g_ref[...] * jax.lax.rsqrt(var + EPS)
        shift = b_ref[...] - mean * scale
        return scale, shift

    mask = mask_ref[...]                                           # (Rtot, 1) f32

    # ---- conv1 (1x1) + bn1 + relu : one (Rtot, Cpad) @ (Cpad, P) matmul ----
    y1 = jnp.dot(x_ref[...].astype(bf16), w1_ref[...],
                 preferred_element_type=jnp.float32)               # (Rtot, P) f32
    # Padded spatial rows of x are exactly zero -> y1 is zero there, so the BN sums
    # need no mask multiplies (perf-review item #4).
    s1 = jnp.sum(y1, axis=0, keepdims=True)
    ss1 = jnp.sum(y1 * y1, axis=0, keepdims=True)
    scale1, shift1 = bn_scale_shift(s1, ss1, g1_ref, b1_ref)
    # The post-BN mask IS still required: shift1 != 0 at padded positions.
    a1_ref[...] = jnp.maximum(y1 * scale1 + shift1, 0.0) * mask    # (Rtot, P) f32

    # ---- conv2 (3x3, pad=1, stride=1) + bn2 + relu : one K=9P matmul ----
    # Pack the nine statically-shifted tap windows into a (L, 9P) patch buffer,
    # then contract against w2 reshaped to (9P, P).
    for dy in range(3):
        for dx in range(3):
            k = dy * 3 + dx
            patch_ref[:, pl.ds(k * P, P)] = a1_ref[pl.ds(dy * wp + dx, L), :]
    y2 = jnp.dot(patch_ref[...].astype(bf16), w2_ref[...],
                 preferred_element_type=jnp.float32)               # (L, P) f32
    mask2 = mask_ref[pl.ds(wp + 1, L), :]                          # (L, 1) f32
    s2 = jnp.sum(y2 * mask2, axis=0, keepdims=True)
    ss2 = jnp.sum(y2 * y2 * mask2, axis=0, keepdims=True)
    scale2, shift2 = bn_scale_shift(s2, ss2, g2_ref, b2_ref)
    a2 = jnp.maximum(y2 * scale2 + shift2, 0.0)                    # (L, P) f32

    # ---- conv3 (1x1) + bn3 + residual add + relu : one (L, P) @ (P, Cpad) matmul ----
    y3 = jnp.dot(a2.astype(bf16), w3_ref[...],
                 preferred_element_type=jnp.float32)               # (L, Cpad) f32
    s3 = jnp.sum(y3 * mask2, axis=0, keepdims=True)
    ss3 = jnp.sum(y3 * y3 * mask2, axis=0, keepdims=True)
    scale3, shift3 = bn_scale_shift(s3, ss3, g3_ref, b3_ref)
    residual = x_ref[pl.ds(wp + 1, L), :]                          # (L, Cpad) f32
    out_ref[...] = jnp.maximum(y3 * scale3 + shift3 + residual, 0.0)


# --------------------------------- call wrapper ---------------------------------

def _full_spec(shape):
    # Whole array as one block (full dims satisfy the tiling rules).
    return pl.BlockSpec(shape, lambda *_: (0,) * len(shape))


def bottleneck_forward(x_nchw, params):
    """Pallas implementation of Bottleneck.forward (stride=1, downsample=None)."""
    N, Cin, H, W = x_nchw.shape
    P = params["w1"].shape[1]
    Cout = params["w3"].shape[1]
    # stride=1 / downsample=None path: residual add needs inplanes == planes * expansion.
    assert Cout == Cin, "downsample=None requires inplanes == planes * expansion"

    Hp, Wp = H + 2, W + 2
    Rtot = N * Hp * Wp                  # flattened padded grid rows
    L = Rtot - 2 * Wp - 2               # interior flat range (covers all valid positions)
    Cpad = max(128, ((Cin + 127) // 128) * 128)   # lane-dense channel padding

    x_nhwc = jnp.transpose(x_nchw, (0, 2, 3, 1)).astype(jnp.float32)
    xp = jnp.pad(x_nhwc, ((0, 0), (1, 1), (1, 1), (0, Cpad - Cin))).reshape(Rtot, Cpad)
    mask = jnp.pad(jnp.ones((N, H, W, 1), jnp.float32),
                   ((0, 0), (1, 1), (1, 1), (0, 0))).reshape(Rtot, 1)

    w1 = jnp.pad(params["w1"], ((0, Cpad - Cin), (0, 0))).astype(jnp.bfloat16)    # (Cpad, P)
    w2 = params["w2"].reshape(9 * P, P).astype(jnp.bfloat16)                      # (9P, P)
    w3 = jnp.pad(params["w3"], ((0, 0), (0, Cpad - Cout))).astype(jnp.bfloat16)   # (P, Cpad)
    g1 = params["g1"].reshape(1, P).astype(jnp.float32)
    b1 = params["b1"].reshape(1, P).astype(jnp.float32)
    g2 = params["g2"].reshape(1, P).astype(jnp.float32)
    b2 = params["b2"].reshape(1, P).astype(jnp.float32)
    g3 = jnp.pad(params["g3"], (0, Cpad - Cout)).reshape(1, Cpad).astype(jnp.float32)
    b3 = jnp.pad(params["b3"], (0, Cpad - Cout)).reshape(1, Cpad).astype(jnp.float32)

    operands = (xp, mask, w1, w2, w3, g1, b1, g2, b2, g3, b3)
    kernel = functools.partial(_bottleneck_kernel, n_valid=N * H * W, wp=Wp)

    out_flat = pl.pallas_call(
        kernel,
        out_shape=jax.ShapeDtypeStruct((L, Cpad), jnp.float32),
        grid=(1,),
        in_specs=[_full_spec(op.shape) for op in operands],
        out_specs=_full_spec((L, Cpad)),
        scratch_shapes=[pltpu.VMEM((Rtot, P), jnp.float32),        # padded a1
                        pltpu.VMEM((L, 9 * P), jnp.float32)],      # merged 3x3 patches
        compiler_params=pltpu.CompilerParams(dimension_semantics=("arbitrary",)),
    )(*operands)

    # Map the interior flat slab back to (N, H, W, Cout) with plain XLA pad/reshape/slice
    # (no per-image python-loop gather).
    full = jnp.pad(out_flat, ((Wp + 1, Wp + 1), (0, 0)))           # (Rtot, Cpad)
    out_nhwc = full.reshape(N, Hp, Wp, Cpad)[:, 1:H + 1, 1:W + 1, :Cout]
    return jnp.transpose(out_nhwc, (0, 3, 1, 2))                   # NHWC -> NCHW


# ------------------------------ pure-JAX reference -------------------------------

def bottleneck_reference(x_nchw, params):
    """Pure-JAX reference with the same dtype strategy (bf16 MXU operands, f32 math)."""
    N, Cin, H, W = x_nchw.shape
    P = params["w1"].shape[1]
    x = jnp.transpose(x_nchw, (0, 2, 3, 1)).astype(jnp.float32)
    x2d = x.reshape(N * H * W, Cin)

    def bn(y, g, b):
        mean = y.mean(axis=0, keepdims=True)
        var = ((y - mean) ** 2).mean(axis=0, keepdims=True)        # biased (torch train mode)
        return (y - mean) / jnp.sqrt(var + EPS) * g.reshape(1, -1) + b.reshape(1, -1)

    def mm(a, w):
        return jnp.dot(a.astype(jnp.bfloat16), w.astype(jnp.bfloat16),
                       preferred_element_type=jnp.float32)

    y1 = jnp.maximum(bn(mm(x2d, params["w1"]), params["g1"], params["b1"]), 0.0)

    yp = jnp.pad(y1.reshape(N, H, W, P), ((0, 0), (1, 1), (1, 1), (0, 0)))
    cols = [yp[:, dy:dy + H, dx:dx + W, :] for dy in range(3) for dx in range(3)]
    patches = jnp.concatenate(cols, axis=-1).reshape(N * H * W, 9 * P)
    y2 = jnp.maximum(bn(mm(patches, params["w2"].reshape(9 * P, P)),
                        params["g2"], params["b2"]), 0.0)

    z = bn(mm(y2, params["w3"]), params["g3"], params["b3"]) + x2d
    z = jnp.maximum(z, 0.0)
    return jnp.transpose(z.reshape(N, H, W, params["w3"].shape[1]), (0, 3, 1, 2))


# ----------------------------------- main -----------------------------------------

if __name__ == "__main__":
    # Bottleneck(inplanes=32, planes=8, stride=1, downsample=None) -> expansion 4
    planes = 8
    inplanes = planes * 4       # required for residual add when downsample is None
    N, H, W = 2, 8, 8

    key = jax.random.PRNGKey(0)
    ks = jax.random.split(key, 10)

    params = {
        # conv weights (synthetic init; matmul layout: (cin, cout) / (kh, kw, cin, cout))
        "w1": 0.1 * jax.random.normal(ks[0], (inplanes, planes), jnp.float32),
        "w2": 0.1 * jax.random.normal(ks[1], (3, 3, planes, planes), jnp.float32),
        "w3": 0.1 * jax.random.normal(ks[2], (planes, planes * 4), jnp.float32),
        # batchnorm affine params
        "g1": 1.0 + 0.1 * jax.random.normal(ks[3], (planes,), jnp.float32),
        "b1": 0.1 * jax.random.normal(ks[4], (planes,), jnp.float32),
        "g2": 1.0 + 0.1 * jax.random.normal(ks[5], (planes,), jnp.float32),
        "b2": 0.1 * jax.random.normal(ks[6], (planes,), jnp.float32),
        "g3": 1.0 + 0.1 * jax.random.normal(ks[7], (planes * 4,), jnp.float32),
        "b3": 0.1 * jax.random.normal(ks[8], (planes * 4,), jnp.float32),
    }

    x = jax.random.normal(ks[9], (N, inplanes, H, W), jnp.float32)  # NCHW, like PyTorch

    out = jax.jit(bottleneck_forward)(x, params)
    out = jax.block_until_ready(out)

    ref = bottleneck_reference(x, params)
    assert out.shape == (N, inplanes, H, W)
    max_diff = float(jnp.max(jnp.abs(out - ref)))
    assert jnp.allclose(out, ref, atol=2e-3, rtol=2e-3), (
        "mismatch vs pure-JAX reference; max|diff|=%g" % max_diff)

    print("KERNEL_OK")
</pallas_src>

<mosaic_0001>
module attributes {stable_mosaic.version = 11 : i64} {
  func.func @_bottleneck_kernel(%arg0: i32, %arg1: memref<200x128xf32, #tpu.memory_space<vmem>>, %arg2: memref<200x1xf32, #tpu.memory_space<vmem>>, %arg3: memref<128x8xbf16, #tpu.memory_space<vmem>>, %arg4: memref<72x8xbf16, #tpu.memory_space<vmem>>, %arg5: memref<8x128xbf16, #tpu.memory_space<vmem>>, %arg6: memref<1x8xf32, #tpu.memory_space<vmem>>, %arg7: memref<1x8xf32, #tpu.memory_space<vmem>>, %arg8: memref<1x8xf32, #tpu.memory_space<vmem>>, %arg9: memref<1x8xf32, #tpu.memory_space<vmem>>, %arg10: memref<1x128xf32, #tpu.memory_space<vmem>>, %arg11: memref<1x128xf32, #tpu.memory_space<vmem>>, %arg12: memref<178x128xf32, #tpu.memory_space<vmem>>, %arg13: memref<200x8xf32, #tpu.memory_space<vmem>>, %arg14: memref<178x72xf32, #tpu.memory_space<vmem>>) attributes {dimension_semantics = [#tpu.dimension_semantics<arbitrary>], iteration_bounds = array<i64: 1>, scalar_prefetch = 0 : i64, scratch_operands = 2 : i64, tpu.core_type = #tpu.core_type<tc>, window_params = [{pipeline_mode = #tpu.pipeline_mode<synchronous>, transform_indices = @transform_0, window_bounds = array<i64: 200, 128>}, {pipeline_mode = #tpu.pipeline_mode<synchronous>, transform_indices = @transform_1, window_bounds = array<i64: 200, 1>}, {pipeline_mode = #tpu.pipeline_mode<synchronous>, transform_indices = @transform_2, window_bounds = array<i64: 128, 8>}, {pipeline_mode = #tpu.pipeline_mode<synchronous>, transform_indices = @transform_3, window_bounds = array<i64: 72, 8>}, {pipeline_mode = #tpu.pipeline_mode<synchronous>, transform_indices = @transform_4, window_bounds = array<i64: 8, 128>}, {pipeline_mode = #tpu.pipeline_mode<synchronous>, transform_indices = @transform_5, window_bounds = array<i64: 1, 8>}, {pipeline_mode = #tpu.pipeline_mode<synchronous>, transform_indices = @transform_6, window_bounds = array<i64: 1, 8>}, {pipeline_mode = #tpu.pipeline_mode<synchronous>, transform_indices = @transform_7, window_bounds = array<i64: 1, 8>}, {pipeline_mode = #tpu.pipeline_mode<synchronous>, transform_indices = @transform_8, window_bounds = array<i64: 1, 8>}, {pipeline_mode = #tpu.pipeline_mode<synchronous>, transform_indices = @transform_9, window_bounds = array<i64: 1, 128>}, {pipeline_mode = #tpu.pipeline_mode<synchronous>, transform_indices = @transform_10, window_bounds = array<i64: 1, 128>}, {pipeline_mode = #tpu.pipeline_mode<synchronous>, transform_indices = @transform_11, window_bounds = array<i64: 178, 128>}]} {
    %c0 = arith.constant 0 : index
    %c0_0 = arith.constant 0 : index
    %0 = vector.load %arg2[%c0, %c0_0] : memref<200x1xf32, #tpu.memory_space<vmem>>, vector<200x1xf32>
    %c0_1 = arith.constant 0 : index
    %c0_2 = arith.constant 0 : index
    %1 = vector.load %arg1[%c0_1, %c0_2] : memref<200x128xf32, #tpu.memory_space<vmem>>, vector<200x128xf32>
    %2 = arith.truncf %1 : vector<200x128xf32> to vector<200x128xbf16>
    %c0_3 = arith.constant 0 : index
    %c0_4 = arith.constant 0 : index
    %3 = vector.load %arg3[%c0_3, %c0_4] : memref<128x8xbf16, #tpu.memory_space<vmem>>, vector<128x8xbf16>
    %cst = arith.constant dense<0.000000e+00> : vector<200x8xf32>
    %4 = tpu.matmul %2, %3, %cst {dimension_numbers = #tpu.dot_dimension_numbers<[1], [0], [0], [1], [0, 0, 1, 1], [], []>} : vector<200x128xbf16>, vector<128x8xbf16>, vector<200x8xf32> -> vector<200x8xf32>
    %cst_5 = arith.constant dense<0.000000e+00> : vector<8xf32>
    %5 = vector.multi_reduction <add>, %4, %cst_5 [0] : vector<200x8xf32> to vector<8xf32>
    %6 = vector.shape_cast %5 : vector<8xf32> to vector<1x8xf32>
    %7 = arith.mulf %4, %4 : vector<200x8xf32>
    %cst_6 = arith.constant dense<0.000000e+00> : vector<8xf32>
    %8 = vector.multi_reduction <add>, %7, %cst_6 [0] : vector<200x8xf32> to vector<8xf32>
    %9 = vector.shape_cast %8 : vector<8xf32> to vector<1x8xf32>
    %cst_7 = arith.constant 7.812500e-03 : f32
    %10 = vector.broadcast %cst_7 : f32 to vector<1x8xf32>
    %11 = arith.mulf %6, %10 : vector<1x8xf32>
    %cst_8 = arith.constant 7.812500e-03 : f32
    %12 = vector.broadcast %cst_8 : f32 to vector<1x8xf32>
    %13 = arith.mulf %9, %12 : vector<1x8xf32>
    %14 = arith.mulf %11, %11 : vector<1x8xf32>
    %15 = arith.subf %13, %14 : vector<1x8xf32>
    %cst_9 = arith.constant 0.000000e+00 : f32
    %16 = vector.broadcast %cst_9 : f32 to vector<1x8xf32>
    %17 = arith.maximumf %15, %16 : vector<1x8xf32>
    %c0_10 = arith.constant 0 : index
    %c0_11 = arith.constant 0 : index
    %18 = vector.load %arg6[%c0_10, %c0_11] : memref<1x8xf32, #tpu.memory_space<vmem>>, vector<1x8xf32>
    %cst_12 = arith.constant 9.99999974E-6 : f32
    %19 = vector.broadcast %cst_12 : f32 to vector<1x8xf32>
    %20 = arith.addf %17, %19 : vector<1x8xf32>
    %21 = math.rsqrt %20 : vector<1x8xf32>
    %22 = arith.mulf %18, %21 : vector<1x8xf32>
    %c0_13 = arith.constant 0 : index
    %c0_14 = arith.constant 0 : index
    %23 = vector.load %arg7[%c0_13, %c0_14] : memref<1x8xf32, #tpu.memory_space<vmem>>, vector<1x8xf32>
    %24 = arith.mulf %11, %22 : vector<1x8xf32>
    %25 = arith.subf %23, %24 : vector<1x8xf32>
    %26 = vector.broadcast %22 : vector<1x8xf32> to vector<200x8xf32>
    %27 = arith.mulf %4, %26 : vector<200x8xf32>
    %28 = vector.broadcast %25 : vector<1x8xf32> to vector<200x8xf32>
    %29 = arith.addf %27, %28 : vector<200x8xf32>
    %cst_15 = arith.constant 0.000000e+00 : f32
    %30 = vector.broadcast %cst_15 : f32 to vector<200x8xf32>
    %31 = arith.maximumf %29, %30 : vector<200x8xf32>
    %32 = vector.broadcast %0 : vector<200x1xf32> to vector<200x8xf32>
    %33 = arith.mulf %31, %32 : vector<200x8xf32>
    %c0_16 = arith.constant 0 : index
    %c0_17 = arith.constant 0 : index
    %34 = vector.load %arg13[%c0_16, %c0_17] : memref<200x8xf32, #tpu.memory_space<vmem>>, vector<200x8xf32>
    tpu.vector_store %arg13[%c0_16, %c0_17], %33 {strides = array<i32>} : memref<200x8xf32, #tpu.memory_space<vmem>>, vector<200x8xf32>,
    %c0_18 = arith.constant 0 : index
    %c0_19 = arith.constant 0 : index
    %35 = vector.load %arg13[%c0_18, %c0_19] : memref<200x8xf32, #tpu.memory_space<vmem>>, vector<178x8xf32>
    %c0_20 = arith.constant 0 : index
    %c0_21 = arith.constant 0 : index
    %36 = vector.load %arg14[%c0_20, %c0_21] : memref<178x72xf32, #tpu.memory_space<vmem>>, vector<178x8xf32>
    tpu.vector_store %arg14[%c0_20, %c0_21], %35 {strides = array<i32>} : memref<178x72xf32, #tpu.memory_space<vmem>>, vector<178x8xf32>,
    %c1 = arith.constant 1 : index
    %c0_22 = arith.constant 0 : index
    %37 = vector.load %arg13[%c1, %c0_22] : memref<200x8xf32, #tpu.memory_space<vmem>>, vector<178x8xf32>
    %c0_23 = arith.constant 0 : index
    %c8 = arith.constant 8 : index
    %38 = vector.load %arg14[%c0_23, %c8] : memref<178x72xf32, #tpu.memory_space<vmem>>, vector<178x8xf32>
    tpu.vector_store %arg14[%c0_23, %c8], %37 {strides = array<i32>} : memref<178x72xf32, #tpu.memory_space<vmem>>, vector<178x8xf32>,
    %c2 = arith.constant 2 : index
    %c0_24 = arith.constant 0 : index
    %39 = vector.load %arg13[%c2, %c0_24] : memref<200x8xf32, #tpu.memory_space<vmem>>, vector<178x8xf32>
    %c0_25 = arith.constant 0 : index
    %c16 = arith.constant 16 : index
    %40 = vector.load %arg14[%c0_25, %c16] : memref<178x72xf32, #tpu.memory_space<vmem>>, vector<178x8xf32>
    tpu.vector_store %arg14[%c0_25, %c16], %39 {strides = array<i32>} : memref<178x72xf32, #tpu.memory_space<vmem>>, vector<178x8xf32>,
    %c10 = arith.constant 10 : index
    %c0_26 = arith.constant 0 : index
    %41 = vector.load %arg13[%c10, %c0_26] : memref<200x8xf32, #tpu.memory_space<vmem>>, vector<178x8xf32>
    %c0_27 = arith.constant 0 : index
    %c24 = arith.constant 24 : index
    %42 = vector.load %arg14[%c0_27, %c24] : memref<178x72xf32, #tpu.memory_space<vmem>>, vector<178x8xf32>
    tpu.vector_store %arg14[%c0_27, %c24], %41 {strides = array<i32>} : memref<178x72xf32, #tpu.memory_space<vmem>>, vector<178x8xf32>,
    %c11 = arith.constant 11 : index
    %c0_28 = arith.constant 0 : index
    %43 = vector.load %arg13[%c11, %c0_28] : memref<200x8xf32, #tpu.memory_space<vmem>>, vector<178x8xf32>
    %c0_29 = arith.constant 0 : index
    %c32 = arith.constant 32 : index
    %44 = vector.load %arg14[%c0_29, %c32] : memref<178x72xf32, #tpu.memory_space<vmem>>, vector<178x8xf32>
    tpu.vector_store %arg14[%c0_29, %c32], %43 {strides = array<i32>} : memref<178x72xf32, #tpu.memory_space<vmem>>, vector<178x8xf32>,
    %c12 = arith.constant 12 : index
    %c0_30 = arith.constant 0 : index
    %45 = vector.load %arg13[%c12, %c0_30] : memref<200x8xf32, #tpu.memory_space<vmem>>, vector<178x8xf32>
    %c0_31 = arith.constant 0 : index
    %c40 = arith.constant 40 : index
    %46 = vector.load %arg14[%c0_31, %c40] : memref<178x72xf32, #tpu.memory_space<vmem>>, vector<178x8xf32>
    tpu.vector_store %arg14[%c0_31, %c40], %45 {strides = array<i32>} : memref<178x72xf32, #tpu.memory_space<vmem>>, vector<178x8xf32>,
    %c20 = arith.constant 20 : index
    %c0_32 = arith.constant 0 : index
    %47 = vector.load %arg13[%c20, %c0_32] : memref<200x8xf32, #tpu.memory_space<vmem>>, vector<178x8xf32>
    %c0_33 = arith.constant 0 : index
    %c48 = arith.constant 48 : index
    %48 = vector.load %arg14[%c0_33, %c48] : memref<178x72xf32, #tpu.memory_space<vmem>>, vector<178x8xf32>
    tpu.vector_store %arg14[%c0_33, %c48], %47 {strides = array<i32>} : memref<178x72xf32, #tpu.memory_space<vmem>>, vector<178x8xf32>,
    %c21 = arith.constant 21 : index
    %c0_34 = arith.constant 0 : index
    %49 = vector.load %arg13[%c21, %c0_34] : memref<200x8xf32, #tpu.memory_space<vmem>>, vector<178x8xf32>
    %c0_35 = arith.constant 0 : index
    %c56 = arith.constant 56 : index
    %50 = vector.load %arg14[%c0_35, %c56] : memref<178x72xf32, #tpu.memory_space<vmem>>, vector<178x8xf32>
    tpu.vector_store %arg14[%c0_35, %c56], %49 {strides = array<i32>} : memref<178x72xf32, #tpu.memory_space<vmem>>, vector<178x8xf32>,
    %c22 = arith.constant 22 : index
    %c0_36 = arith.constant 0 : index
    %51 = vector.load %arg13[%c22, %c0_36] : memref<200x8xf32, #tpu.memory_space<vmem>>, vector<178x8xf32>
    %c0_37 = arith.constant 0 : index
    %c64 = arith.constant 64 : index
    %52 = vector.load %arg14[%c0_37, %c64] : memref<178x72xf32, #tpu.memory_space<vmem>>, vector<178x8xf32>
    tpu.vector_store %arg14[%c0_37, %c64], %51 {strides = array<i32>} : memref<178x72xf32, #tpu.memory_space<vmem>>, vector<178x8xf32>,
    %c0_38 = arith.constant 0 : index
    %c0_39 = arith.constant 0 : index
    %53 = vector.load %arg14[%c0_38, %c0_39] : memref<178x72xf32, #tpu.memory_space<vmem>>, vector<178x72xf32>
    %54 = arith.truncf %53 : vector<178x72xf32> to vector<178x72xbf16>
    %c0_40 = arith.constant 0 : index
    %c0_41 = arith.constant 0 : index
    %55 = vector.load %arg4[%c0_40, %c0_41] : memref<72x8xbf16, #tpu.memory_space<vmem>>, vector<72x8xbf16>
    %cst_42 = arith.constant dense<0.000000e+00> : vector<178x8xf32>
    %56 = tpu.matmul %54, %55, %cst_42 {dimension_numbers = #tpu.dot_dimension_numbers<[1], [0], [0], [1], [0, 0, 1, 1], [], []>} : vector<178x72xbf16>, vector<72x8xbf16>, vector<178x8xf32> -> vector<178x8xf32>
    %c11_43 = arith.constant 11 : index
    %c0_44 = arith.constant 0 : index
    %57 = vector.load %arg2[%c11_43, %c0_44] : memref<200x1xf32, #tpu.memory_space<vmem>>, vector<178x1xf32>
    %58 = vector.broadcast %57 : vector<178x1xf32> to vector<178x8xf32>
    %59 = arith.mulf %56, %58 : vector<178x8xf32>
    %cst_45 = arith.constant dense<0.000000e+00> : vector<8xf32>
    %60 = vector.multi_reduction <add>, %59, %cst_45 [0] : vector<178x8xf32> to vector<8xf32>
    %61 = vector.shape_cast %60 : vector<8xf32> to vector<1x8xf32>
    %62 = arith.mulf %56, %56 : vector<178x8xf32>
    %63 = vector.broadcast %57 : vector<178x1xf32> to vector<178x8xf32>
    %64 = arith.mulf %62, %63 : vector<178x8xf32>
    %cst_46 = arith.constant dense<0.000000e+00> : vector<8xf32>
    %65 = vector.multi_reduction <add>, %64, %cst_46 [0] : vector<178x8xf32> to vector<8xf32>
    %66 = vector.shape_cast %65 : vector<8xf32> to vector<1x8xf32>
    %cst_47 = arith.constant 7.812500e-03 : f32
    %67 = vector.broadcast %cst_47 : f32 to vector<1x8xf32>
    %68 = arith.mulf %61, %67 : vector<1x8xf32>
    %cst_48 = arith.constant 7.812500e-03 : f32
    %69 = vector.broadcast %cst_48 : f32 to vector<1x8xf32>
    %70 = arith.mulf %66, %69 : vector<1x8xf32>
    %71 = arith.mulf %68, %68 : vector<1x8xf32>
    %72 = arith.subf %70, %71 : vector<1x8xf32>
    %cst_49 = arith.constant 0.000000e+00 : f32
    %73 = vector.broadcast %cst_49 : f32 to vector<1x8xf32>
    %74 = arith.maximumf %72, %73 : vector<1x8xf32>
    %c0_50 = arith.constant 0 : index
    %c0_51 = arith.constant 0 : index
    %75 = vector.load %arg8[%c0_50, %c0_51] : memref<1x8xf32, #tpu.memory_space<vmem>>, vector<1x8xf32>
    %cst_52 = arith.constant 9.99999974E-6 : f32
    %76 = vector.broadcast %cst_52 : f32 to vector<1x8xf32>
    %77 = arith.addf %74, %76 : vector<1x8xf32>
    %78 = math.rsqrt %77 : vector<1x8xf32>
    %79 = arith.mulf %75, %78 : vector<1x8xf32>
    %c0_53 = arith.constant 0 : index
    %c0_54 = arith.constant 0 : index
    %80 = vector.load %arg9[%c0_53, %c0_54] : memref<1x8xf32, #tpu.memory_space<vmem>>, vector<1x8xf32>
    %81 = arith.mulf %68, %79 : vector<1x8xf32>
    %82 = arith.subf %80, %81 : vector<1x8xf32>
    %83 = vector.broadcast %79 : vector<1x8xf32> to vector<178x8xf32>
    %84 = arith.mulf %56, %83 : vector<178x8xf32>
    %85 = vector.broadcast %82 : vector<1x8xf32> to vector<178x8xf32>
    %86 = arith.addf %84, %85 : vector<178x8xf32>
    %cst_55 = arith.constant 0.000000e+00 : f32
    %87 = vector.broadcast %cst_55 : f32 to vector<178x8xf32>
    %88 = arith.maximumf %86, %87 : vector<178x8xf32>
    %89 = arith.truncf %88 : vector<178x8xf32> to vector<178x8xbf16>
    %c0_56 = arith.constant 0 : index
    %c0_57 = arith.constant 0 : index
    %90 = vector.load %arg5[%c0_56, %c0_57] : memref<8x128xbf16, #tpu.memory_space<vmem>>, vector<8x128xbf16>
    %cst_58 = arith.constant dense<0.000000e+00> : vector<178x128xf32>
    %91 = tpu.matmul %89, %90, %cst_58 {dimension_numbers = #tpu.dot_dimension_numbers<[1], [0], [0], [1], [0, 0, 1, 1], [], []>} : vector<178x8xbf16>, vector<8x128xbf16>, vector<178x128xf32> -> vector<178x128xf32>
    %92 = vector.broadcast %57 : vector<178x1xf32> to vector<178x128xf32>
    %93 = arith.mulf %91, %92 : vector<178x128xf32>
    %cst_59 = arith.constant dense<0.000000e+00> : vector<128xf32>
    %94 = vector.multi_reduction <add>, %93, %cst_59 [0] : vector<178x128xf32> to vector<128xf32>
    %95 = vector.shape_cast %94 : vector<128xf32> to vector<1x128xf32>
    %96 = arith.mulf %91, %91 : vector<178x128xf32>
    %97 = vector.broadcast %57 : vector<178x1xf32> to vector<178x128xf32>
    %98 = arith.mulf %96, %97 : vector<178x128xf32>
    %cst_60 = arith.constant dense<0.000000e+00> : vector<128xf32>
    %99 = vector.multi_reduction <add>, %98, %cst_60 [0] : vector<178x128xf32> to vector<128xf32>
    %100 = vector.shape_cast %99 : vector<128xf32> to vector<1x128xf32>
    %cst_61 = arith.constant 7.812500e-03 : f32
    %101 = vector.broadcast %cst_61 : f32 to vector<1x128xf32>
    %102 = arith.mulf %95, %101 : vector<1x128xf32>
    %cst_62 = arith.constant 7.812500e-03 : f32
    %103 = vector.broadcast %cst_62 : f32 to vector<1x128xf32>
    %104 = arith.mulf %100, %103 : vector<1x128xf32>
    %105 = arith.mulf %102, %102 : vector<1x128xf32>
    %106 = arith.subf %104, %105 : vector<1x128xf32>
    %cst_63 = arith.constant 0.000000e+00 : f32
    %107 = vector.broadcast %cst_63 : f32 to vector<1x128xf32>
    %108 = arith.maximumf %106, %107 : vector<1x128xf32>
    %c0_64 = arith.constant 0 : index
    %c0_65 = arith.constant 0 : index
    %109 = vector.load %arg10[%c0_64, %c0_65] : memref<1x128xf32, #tpu.memory_space<vmem>>, vector<1x128xf32>
    %cst_66 = arith.constant 9.99999974E-6 : f32
    %110 = vector.broadcast %cst_66 : f32 to vector<1x128xf32>
    %111 = arith.addf %108, %110 : vector<1x128xf32>
    %112 = math.rsqrt %111 : vector<1x128xf32>
    %113 = arith.mulf %109, %112 : vector<1x128xf32>
    %c0_67 = arith.constant 0 : index
    %c0_68 = arith.constant 0 : index
    %114 = vector.load %arg11[%c0_67, %c0_68] : memref<1x128xf32, #tpu.memory_space<vmem>>, vector<1x128xf32>
    %115 = arith.mulf %102, %113 : vector<1x128xf32>
    %116 = arith.subf %114, %115 : vector<1x128xf32>
    %c11_69 = arith.constant 11 : index
    %c0_70 = arith.constant 0 : index
    %117 = vector.load %arg1[%c11_69, %c0_70] : memref<200x128xf32, #tpu.memory_space<vmem>>, vector<178x128xf32>
    %118 = vector.broadcast %113 : vector<1x128xf32> to vector<178x128xf32>
    %119 = arith.mulf %91, %118 : vector<178x128xf32>
    %120 = vector.broadcast %116 : vector<1x128xf32> to vector<178x128xf32>
    %121 = arith.addf %119, %120 : vector<178x128xf32>
    %122 = arith.addf %121, %117 : vector<178x128xf32>
    %cst_71 = arith.constant 0.000000e+00 : f32
    %123 = vector.broadcast %cst_71 : f32 to vector<178x128xf32>
    %124 = arith.maximumf %122, %123 : vector<178x128xf32>
    %c0_72 = arith.constant 0 : index
    %c0_73 = arith.constant 0 : index
    %125 = vector.load %arg12[%c0_72, %c0_73] : memref<178x128xf32, #tpu.memory_space<vmem>>, vector<178x128xf32>
    tpu.vector_store %arg12[%c0_72, %c0_73], %124 {strides = array<i32>} : memref<178x128xf32, #tpu.memory_space<vmem>>, vector<178x128xf32>,
    return
  }
  func.func @transform_0(%arg0: i32) -> (i32, i32) {
    %c0_i32 = arith.constant 0 : i32
    %c0_i32_0 = arith.constant 0 : i32
    %c0_i32_1 = arith.constant 0 : i32
    return %c0_i32, %c0_i32_0 : i32, i32
  }
  func.func @transform_1(%arg0: i32) -> (i32, i32) {
    %c0_i32 = arith.constant 0 : i32
    %c0_i32_0 = arith.constant 0 : i32
    %c0_i32_1 = arith.constant 0 : i32
    return %c0_i32, %c0_i32_0 : i32, i32
  }
  func.func @transform_2(%arg0: i32) -> (i32, i32) {
    %c0_i32 = arith.constant 0 : i32
    %c0_i32_0 = arith.constant 0 : i32
    %c0_i32_1 = arith.constant 0 : i32
    return %c0_i32, %c0_i32_0 : i32, i32
  }
  func.func @transform_3(%arg0: i32) -> (i32, i32) {
    %c0_i32 = arith.constant 0 : i32
    %c0_i32_0 = arith.constant 0 : i32
    %c0_i32_1 = arith.constant 0 : i32
    return %c0_i32, %c0_i32_0 : i32, i32
  }
  func.func @transform_4(%arg0: i32) -> (i32, i32) {
    %c0_i32 = arith.constant 0 : i32
    %c0_i32_0 = arith.constant 0 : i32
    %c0_i32_1 = arith.constant 0 : i32
    return %c0_i32, %c0_i32_0 : i32, i32
  }
  func.func @transform_5(%arg0: i32) -> (i32, i32) {
    %c0_i32 = arith.constant 0 : i32
    %c0_i32_0 = arith.constant 0 : i32
    %c0_i32_1 = arith.constant 0 : i32
    return %c0_i32, %c0_i32_0 : i32, i32
  }
  func.func @transform_6(%arg0: i32) -> (i32, i32) {
    %c0_i32 = arith.constant 0 : i32
    %c0_i32_0 = arith.constant 0 : i32
    %c0_i32_1 = arith.constant 0 : i32
    return %c0_i32, %c0_i32_0 : i32, i32
  }
  func.func @transform_7(%arg0: i32) -> (i32, i32) {
    %c0_i32 = arith.constant 0 : i32
    %c0_i32_0 = arith.constant 0 : i32
    %c0_i32_1 = arith.constant 0 : i32
    return %c0_i32, %c0_i32_0 : i32, i32
  }
  func.func @transform_8(%arg0: i32) -> (i32, i32) {
    %c0_i32 = arith.constant 0 : i32
    %c0_i32_0 = arith.constant 0 : i32
    %c0_i32_1 = arith.constant 0 : i32
    return %c0_i32, %c0_i32_0 : i32, i32
  }
  func.func @transform_9(%arg0: i32) -> (i32, i32) {
    %c0_i32 = arith.constant 0 : i32
    %c0_i32_0 = arith.constant 0 : i32
    %c0_i32_1 = arith.constant 0 : i32
    return %c0_i32, %c0_i32_0 : i32, i32
  }
  func.func @transform_10(%arg0: i32) -> (i32, i32) {
    %c0_i32 = arith.constant 0 : i32
    %c0_i32_0 = arith.constant 0 : i32
    %c0_i32_1 = arith.constant 0 : i32
    return %c0_i32, %c0_i32_0 : i32, i32
  }
  func.func @transform_11(%arg0: i32) -> (i32, i32) {
    %c0_i32 = arith.constant 0 : i32
    %c0_i32_0 = arith.constant 0 : i32
    %c0_i32_1 = arith.constant 0 : i32
    return %c0_i32, %c0_i32_0 : i32, i32
  }
}

</mosaic_0001>

<bundles_post_ra>
// kernel: bottleneck_forward.1
= control target key start
LH: loop header
LB: loop body
LE: loop exit
PB: predicated region body
PF: predicated region fallthrough
CT: control target
= control target key end

     0   :  { %v3245_v0 = vmov 0.0   ;;  %vm3246_vm0 = vmmov 0   ;;  %v3247_v3 = vmov 0   ;;  %vm302_vm1 = vcmask 64512   ;;  %s3250_s18 = smov 24   ;;  %s3251_s19 = smov 32   ;;  %s5066_s2 = inlined_call_operand.vmem [shape: bf16[128,8], index: 2, kind: input, shape index: {}]   ;;  %s5067_s1 = inlined_call_operand.vmem [shape: f32[200,1], index: 1, kind: input, shape index: {}]   ;;  %s5068_s0 = inlined_call_operand.vmem [shape: f32[200,128], index: 0, kind: input, shape index: {}]   ;;  %s5069_s5 = inlined_call_operand.vmem [shape: f32[1,8], index: 5, kind: input, shape index: {}]   ;;  %s5070_s6 = inlined_call_operand.vmem [shape: f32[1,8], index: 6, kind: input, shape index: {}]   ;;  %s5071_s3 = inlined_call_operand.vmem [shape: bf16[72,8], index: 3, kind: input, shape index: {}]   ;;  %s5072_s4 = inlined_call_operand.vmem [shape: bf16[8,128], index: 4, kind: input, shape index: {}]   ;;  %s5073_s7 = inlined_call_operand.vmem [shape: f32[1,8], index: 7, kind: input, shape index: {}]   ;;  %s5074_s8 = inlined_call_operand.vmem [shape: f32[1,8], index: 8, kind: input, shape index: {}]   ;;  %s5075_s9 = inlined_call_operand.vmem [shape: f32[1,128], index: 9, kind: input, shape index: {}]   ;;  %s5076_s10 = inlined_call_operand.vmem [shape: f32[1,128], index: 10, kind: input, shape index: {}]   ;;  %s5077_s11 = inlined_call_operand.vmem [shape: f32[178,128], index: 11, kind: output, shape index: {}]  }
   0x1   :  { %3083 = vmatprep.subr.bf16.mxu0 %v3245_v0  ;;  %v3226_v1 = vld [vmem:[%s5066_s2] sm:$0xff]   ;;  %3099 = vmatprep.mubr.msk.bf16.mxu0 %vm3246_vm0, %v3245_v0  ;;  %v3227_v2 = vld [vmem:[%s5066_s2 + $0x8] sm:$0xff]   ;;  %v3228_v4 = vld [vmem:[%s5066_s2 + $0x10] sm:$0xff]   ;;  %s3252_s20 = smov 40   ;;  %vm757_vm2 = vcmask 58368   ;;  %s3253_s21 = smov 48  }
   0x2   :  { %3084 = vmatpush3.bf16.msra.mxu0 %v3226_v1  ;;  %3224 = vset.pattern.permute.xlu0 %v3247_v3  ;;  %v3229_v5 = vld [vmem:[%s5066_s2 + $0x18] sm:$0xff]   ;;  %v3230_v6 = vld [vmem:[%s5066_s2 + $0x20] sm:$0xff]   ;;  %v41_v8 = vld [vmem:[%s5067_s1 + $0x10] sm:$0xff]  ;;  %s3254_s24 = smov 56   ;;  %s3255_s29 = smov 64   ;;  %vm1987_vm3 = vcmask 1043456  }
   0x3   :  { %3085 = vmatprep.subr.bf16.mxu0 %v3245_v0  ;;  %3225 = vset.pattern.permute.xlu1 %v3247_v3  ;;  %v39_v7 = vld [vmem:[%s5067_s1] sm:$0xff]  ;;  %v3231_v9 = vld [vmem:[%s5066_s2 + $0x28] sm:$0xff]   ;;  %v42_v11 = vld [vmem:[%s5067_s1 + $0x18] sm:$0xff]  ;;  %vm874_vm4 = vcmask 130112   ;;  %vm1014_vm5 = vcmask 195712   ;;  %vm1154_vm6 = vcmask 261312  }
   0x4   :  { %539 = vperm.xlu0 %3224, %v39_v7   ;;  %v40_v10 = vld [vmem:[%s5067_s1 + $0x8] sm:$0xff]  ;;  %549 = vperm.xlu1 %3225, %v41_v8   ;;  %v3232_v12 = vld [vmem:[%s5066_s2 + $0x30] sm:$0xff]   ;;  %v43_v13 = vld [vmem:[%s5067_s1 + $0x20] sm:$0xff]  ;;  %vm1294_vm7 = vcmask 326912   ;;  %vm1434_vm8 = vcmask 392512   ;;  %vm1574_vm9 = vcmask 458112  }
   0x5   :  { %v44_v14 = vld [vmem:[%s5067_s1 + $0x28] sm:$0xff]  ;;  %v3233_v15 = vld [vmem:[%s5066_s2 + $0x38] sm:$0xff]   ;;  %v64_v16 = vld [vmem:[%s5068_s0] sm:$0xff]  ;;  %vm1714_vm10 = vcmask 523712   ;;  %vm1854_vm11 = vcmask 589312   ;;  %vm1950_vm12 = vcmask 588800  }
   0x6   :  { %3086 = vmatpush3.bf16.msra.mxu0 %v3227_v2  ;;  %v65_v17 = vld [vmem:[%s5068_s0 + $0x8] sm:$0xff]  ;;  %v45_v18 = vld [vmem:[%s5067_s1 + $0x30] sm:$0xff]  ;;  %v46_v19 = vld [vmem:[%s5067_s1 + $0x38] sm:$0xff]  ;;  %vm897_vm13 = vcmask 123968   ;;  %vm1037_vm14 = vcmask 189568   ;;  %vm1177_vm15 = vcmask 255168  }
   0x7   :  { %3087 = vmatprep.subr.bf16.mxu0 %v3245_v0  ;;  %v89_v20 = vpack.c.bf16 %v65_v17, %v64_v16  ;;  %v47_v21 = vld [vmem:[%s5067_s1 + $0x40] sm:$0xff]  ;;  %v48_v22 = vld [vmem:[%s5067_s1 + $0x48] sm:$0xff]  ;;  %v66_v23 = vld [vmem:[%s5068_s0 + $0x10] sm:$0xff] }
   0x8   :  { %544 = vperm.xlu0 %3224, %v40_v10   ;;  %554 = vperm.xlu1 %3225, %v42_v11   ;;  %v67_v24 = vld [vmem:[%s5068_s0 + $0x18] sm:$0xff]  ;;  %v49_v25 = vld [vmem:[%s5067_s1 + $0x50] sm:$0xff]  ;;  %v51_v28 = vld [vmem:[%s5067_s1 + $0x60] sm:$0xff] }
   0x9   :  { %v50_v26 = vld [vmem:[%s5067_s1 + $0x58] sm:$0xff]  ;;  %v90_v27 = vpack.c.bf16 %v67_v24, %v66_v23  ;;  %v52_v29 = vld [vmem:[%s5067_s1 + $0x68] sm:$0xff]  ;;  %v68_v30 = vld [vmem:[%s5068_s0 + $0x20] sm:$0xff] }
   0xa   :  { %3088 = vmatpush3.bf16.msra.mxu0 %v3228_v4  ;;  %v69_v31 = vld [vmem:[%s5068_s0 + $0x28] sm:$0xff]  ;;  %v53_v32 = vld [vmem:[%s5067_s1 + $0x70] sm:$0xff]  ;;  %v55_v34 = vld [vmem:[%s5067_s1 + $0x80] sm:$0xff] }
   0xb   :  { %3089 = vmatprep.subr.bf16.mxu0 %v3245_v0  ;;  %v91_v33 = vpack.c.bf16 %v69_v31, %v68_v30  ;;  %v70_v35 = vld [vmem:[%s5068_s0 + $0x30] sm:$0xff]  ;;  %v71_v36 = vld [vmem:[%s5068_s0 + $0x38] sm:$0xff]  ;;  %v72_v38 = vld [vmem:[%s5068_s0 + $0x40] sm:$0xff] }
   0xc   :  { %559 = vperm.xlu0 %3224, %v43_v13   ;;  %564 = vperm.xlu1 %3225, %v44_v14   ;;  %v92_v37 = vpack.c.bf16 %v71_v36, %v70_v35  ;;  %v73_v39 = vld [vmem:[%s5068_s0 + $0x48] sm:$0xff]  ;;  %v74_v41 = vld [vmem:[%s5068_s0 + $0x50] sm:$0xff]  ;;  %v75_v42 = vld [vmem:[%s5068_s0 + $0x58] sm:$0xff] }
   0xd   :  { %v93_v40 = vpack.c.bf16 %v73_v39, %v72_v38  ;;  %v94_v43 = vpack.c.bf16 %v75_v42, %v74_v41  ;;  %v76_v44 = vld [vmem:[%s5068_s0 + $0x60] sm:$0xff]  ;;  %v77_v45 = vld [vmem:[%s5068_s0 + $0x68] sm:$0xff]  ;;  %v78_v47 = vld [vmem:[%s5068_s0 + $0x70] sm:$0xff] }
   0xe   :  { %3090 = vmatpush3.bf16.msra.mxu0 %v3229_v5  ;;  %v95_v46 = vpack.c.bf16 %v77_v45, %v76_v44  ;;  %v79_v48 = vld [vmem:[%s5068_s0 + $0x78] sm:$0xff]  ;;  %v80_v50 = vld [vmem:[%s5068_s0 + $0x80] sm:$0xff]  ;;  %v81_v51 = vld [vmem:[%s5068_s0 + $0x88] sm:$0xff] }
   0xf   :  { %3091 = vmatprep.subr.bf16.mxu0 %v3245_v0  ;;  %v96_v49 = vpack.c.bf16 %v79_v48, %v78_v47  ;;  %v97_v52 = vpack.c.bf16 %v81_v51, %v80_v50  ;;  %v82_v53 = vld [vmem:[%s5068_s0 + $0x90] sm:$0xff]  ;;  %v83_v54 = vld [vmem:[%s5068_s0 + $0x98] sm:$0xff]  ;;  %v84_v56 = vld [vmem:[%s5068_s0 + $0xa0] sm:$0xff] }
  0x10   :  { %569 = vperm.xlu0 %3224, %v45_v18   ;;  %574 = vperm.xlu1 %3225, %v46_v19   ;;  %v98_v55 = vpack.c.bf16 %v83_v54, %v82_v53  ;;  %v85_v57 = vld [vmem:[%s5068_s0 + $0xa8] sm:$0xff]  ;;  %v86_v59 = vld [vmem:[%s5068_s0 + $0xb0] sm:$0xff]  ;;  %v87_v60 = vld [vmem:[%s5068_s0 + $0xb8] sm:$0xff] }
  0x11   :  { %v99_v58 = vpack.c.bf16 %v85_v57, %v84_v56  ;;  %v54_v61 = vld [vmem:[%s5067_s1 + $0x78] sm:$0xff]  ;;  %v57_v62 = vld [vmem:[%s5067_s1 + $0x90] sm:$0xff]  ;;  %v100_v63 = vpack.c.bf16 %v87_v60, %v86_v59  ;;  %v56_v1 = vld [vmem:[%s5067_s1 + $0x88] sm:$0xff] }
  0x12   :  { %3092 = vmatpush3.bf16.msra.mxu0 %v3230_v6  ;;  %v59_v2 = vld [vmem:[%s5067_s1 + $0xa0] sm:$0xff]  ;;  %v58_v4 = vld [vmem:[%s5067_s1 + $0x98] sm:$0xff]  ;;  %v61_v5 = vld [vmem:[%s5067_s1 + $0xb0] sm:$0xff] }
  0x13   :  { %3093 = vmatprep.subr.bf16.mxu0 %v3245_v0  ;;  %v88_v3 = vld [vmem:[%s5068_s0 + $0xc0] sm:$0xff]  ;;  %v62_v8 = vld [vmem:[%s5067_s1 + $0xb8] sm:$0xff] }
  0x14   :  { %579 = vperm.xlu0 %3224, %v47_v21   ;;  %584 = vperm.xlu1 %3225, %v48_v22   ;;  %v101_v6 = vpack.c.bf16 %v88_v3, %v88_v3  ;;  %v63_v7 = vld [vmem:[%s5067_s1 + $0xc0] sm:$0xff] }
  0x16   :  { %3094 = vmatpush3.bf16.msra.mxu0 %v3231_v9 }
  0x17   :  { %3095 = vmatprep.subr.bf16.mxu0 %v3245_v0 }
  0x18   :  { %589 = vperm.xlu0 %3224, %v49_v25   ;;  %594 = vperm.xlu1 %3225, %v50_v26  }
  0x1a   :  { %3096 = vmatpush3.bf16.msra.mxu0 %v3232_v12 }
  0x1b   :  { %3097 = vmatprep.subr.bf16.mxu0 %v3245_v0 }
  0x1c   :  { %599 = vperm.xlu0 %3224, %v51_v28   ;;  %604 = vperm.xlu1 %3225, %v52_v29  }
  0x1e   :  { %3098 = vmatpush3.bf16.msra.mxu0 %v3233_v15 }
  0x20   :  { %609 = vperm.xlu0 %3224, %v53_v32   ;;  %614 = vperm.xlu1 %3225, %v54_v61  }
  0x21   :  { %3100 = vmatmul.mubr.bf16.vlgmr.msra.gmra.mrb[0].mxu0 %v89_v20 }
  0x22   :  { %3103 = vmatprep.mubr.msk.bf16.mxu0 %vm3246_vm0, %v3245_v0 }
  0x24   :  { %619 = vperm.xlu0 %3224, %v55_v34   ;;  %624 = vperm.xlu1 %3225, %v56_v1  }
  0x28   :  { %629 = vperm.xlu0 %3224, %v57_v62   ;;  %634 = vperm.xlu1 %3225, %v58_v4  }
  0x29   :  { %3104 = vmatmul.mubr.bf16.gmra.mrb[4].mxu0 %v90_v27 }
  0x2a   :  { %3107 = vmatprep.mubr.msk.bf16.mxu0 %vm3246_vm0, %v3245_v0 }
  0x2c   :  { %639 = vperm.xlu0 %3224, %v59_v2  }
  0x30   :  { %649 = vperm.xlu0 %3224, %v61_v5  }
  0x31   :  { %3108 = vmatmul.mubr.bf16.gmra.mrb[8].mxu0 %v91_v33 }
  0x32   :  { %3111 = vmatprep.mubr.msk.bf16.mxu0 %vm3246_vm0, %v3245_v0 }
  0x34   :  { %659 = vperm.xlu0 %3224, %v63_v7  }
  0x39   :  { %3112 = vmatmul.mubr.bf16.gmra.mrb[12].mxu0 %v92_v37 }
  0x3a   :  { %3115 = vmatprep.mubr.msk.bf16.mxu0 %vm3246_vm0, %v3245_v0 }
  0x41   :  { %3116 = vmatmul.mubr.bf16.gmra.mrb[16].mxu0 %v93_v40 }
  0x42   :  { %3119 = vmatprep.mubr.msk.bf16.mxu0 %vm3246_vm0, %v3245_v0 }
  0x49   :  { %3120 = vmatmul.mubr.bf16.gmra.mrb[20].mxu0 %v94_v43 }
  0x4a   :  { %3123 = vmatprep.mubr.msk.bf16.mxu0 %vm3246_vm0, %v3245_v0 }
  0x51   :  { %3124 = vmatmul.mubr.bf16.gmra.mrb[24].mxu0 %v95_v46 }
  0x52   :  { %3127 = vmatprep.mubr.msk.bf16.mxu0 %vm3246_vm0, %v3245_v0 }
  0x59   :  { %3128 = vmatmul.mubr.bf16.gmra.mrb[28].mxu0 %v96_v49 }
  0x5a   :  { %3131 = vmatprep.mubr.msk.bf16.mxu0 %vm3246_vm0, %v3245_v0 }
  0x61   :  { %3132 = vmatmul.mubr.bf16.gmra.mrb[32].mxu0 %v97_v52 }
  0x62   :  { %3135 = vmatprep.mubr.msk.bf16.mxu0 %vm3246_vm0, %v3245_v0 }
  0x69   :  { %3136 = vmatmul.mubr.bf16.gmra.mrb[36].mxu0 %v98_v55 }
  0x6a   :  { %3139 = vmatprep.mubr.msk.bf16.mxu0 %vm3246_vm0, %v3245_v0 }
  0x71   :  { %3140 = vmatmul.mubr.bf16.gmra.mrb[40].mxu0 %v99_v58 }
  0x72   :  { %3143 = vmatprep.mubr.msk.bf16.mxu0 %vm3246_vm0, %v3245_v0 }
  0x79   :  { %3144 = vmatmul.mubr.bf16.gmra.mrb[44].mxu0 %v100_v63 }
  0x7a   :  { %3147 = vmatprep.mubr.msk.bf16.mxu0 %vm3246_vm0, %v3245_v0  ;;  %v60_v0 = vld [vmem:[%s5067_s1 + $0xa8] sm:$0xff]  ;;  %vm1317_vm0 = vcmask 320768  }
  0x7b   :  { %644 = vperm.xlu1 %3225, %v60_v0  }
  0x7f   :  { %654 = vperm.xlu1 %3225, %v62_v8  }
  0x81   :  { %3148 = vmatmul.mubr.bf16.gmra.mrb[48].mxu0 %v101_v6 }
  0xf4   :  { %v3524_v9 = vpop.f32.mrb[0].mxu0 }
  0xf5   :  { %v358_v10 = vmul.f32 %v3524_v9, %v3524_v9  ;;  %v3101_v11 = vpop.f32.mrb[1].mxu0  ;;  %v303_v13 = vsel %vm302_vm1, %v3524_v9, 0.0 }
  0xf6   :  { %v3528_v12 = vpop.f32.mrb[2].mxu0 }
  0xf7   :  { %v304_v14 = vsel %vm302_vm1, %v3528_v12, 0.0  ;;  %v359_v15 = vmul.f32 %v3528_v12, %v3528_v12  ;;  %v3102_v16 = vpop.f32.mrb[3].mxu0  ;;  %v383_v18 = vsel %vm302_vm1, %v358_v10, 0.0 }
  0xf8   :  { %v305_v17 = vadd.f32 %v304_v14, %v303_v13 }
  0xf9   :  { %v384_v19 = vsel %vm302_vm1, %v359_v15, 0.0 }
  0xfa   :  { %v385_v20 = vadd.f32 %v384_v19, %v383_v18 }
  0xfc   :  { %v3538_v21 = vpop.f32.mrb[4].mxu0 }
  0xfd   :  { %v306_v22 = vsel %vm302_vm1, %v3538_v21, 0.0  ;;  %v360_v23 = vmul.f32 %v3538_v21, %v3538_v21  ;;  %v3105_v24 = vpop.f32.mrb[5].mxu0 }
  0xfe   :  { %v307_v25 = vadd.f32 %v306_v22, %v305_v17  ;;  %v3544_v26 = vpop.f32.mrb[6].mxu0 }
  0xff   :  { %v386_v27 = vsel %vm302_vm1, %v360_v23, 0.0  ;;  %v308_v28 = vsel %vm302_vm1, %v3544_v26, 0.0  ;;  %v361_v29 = vmul.f32 %v3544_v26, %v3544_v26  ;;  %v3106_v30 = vpop.f32.mrb[7].mxu0 }
 0x100   :  { %v387_v31 = vadd.f32 %v386_v27, %v385_v20  ;;  %v309_v32 = vadd.f32 %v308_v28, %v307_v25 }
 0x101   :  { %v388_v33 = vsel %vm302_vm1, %v361_v29, 0.0 }
 0x102   :  { %v389_v34 = vadd.f32 %v388_v33, %v387_v31 }
 0x104   :  { %v3552_v35 = vpop.f32.mrb[8].mxu0 }
 0x105   :  { %v310_v36 = vsel %vm302_vm1, %v3552_v35, 0.0  ;;  %v362_v37 = vmul.f32 %v3552_v35, %v3552_v35  ;;  %v3109_v38 = vpop.f32.mrb[9].mxu0 }
 0x106   :  { %v311_v39 = vadd.f32 %v310_v36, %v309_v32  ;;  %v3558_v40 = vpop.f32.mrb[10].mxu0 }
 0x107   :  { %v390_v41 = vsel %vm302_vm1, %v362_v37, 0.0  ;;  %v312_v42 = vsel %vm302_vm1, %v3558_v40, 0.0  ;;  %v363_v43 = vmul.f32 %v3558_v40, %v3558_v40  ;;  %v3110_v44 = vpop.f32.mrb[11].mxu0 }
 0x108   :  { %v391_v45 = vadd.f32 %v390_v41, %v389_v34  ;;  %v313_v46 = vadd.f32 %v312_v42, %v311_v39 }
 0x109   :  { %v392_v47 = vsel %vm302_vm1, %v363_v43, 0.0 }
 0x10a   :  { %v393_v48 = vadd.f32 %v392_v47, %v391_v45 }
 0x10c   :  { %v3566_v49 = vpop.f32.mrb[12].mxu0 }
 0x10d   :  { %v314_v50 = vsel %vm302_vm1, %v3566_v49, 0.0  ;;  %v364_v51 = vmul.f32 %v3566_v49, %v3566_v49  ;;  %v3113_v52 = vpop.f32.mrb[13].mxu0 }
 0x10e   :  { %v315_v53 = vadd.f32 %v314_v50, %v313_v46  ;;  %v3572_v54 = vpop.f32.mrb[14].mxu0 }
 0x10f   :  { %v394_v55 = vsel %vm302_vm1, %v364_v51, 0.0  ;;  %v316_v56 = vsel %vm302_vm1, %v3572_v54, 0.0  ;;  %v365_v57 = vmul.f32 %v3572_v54, %v3572_v54  ;;  %v3114_v58 = vpop.f32.mrb[15].mxu0 }
 0x110   :  { %v395_v59 = vadd.f32 %v394_v55, %v393_v48  ;;  %v317_v60 = vadd.f32 %v316_v56, %v315_v53 }
 0x111   :  { %v396_v61 = vsel %vm302_vm1, %v365_v57, 0.0 }
 0x112   :  { %v397_v62 = vadd.f32 %v396_v61, %v395_v59 }
 0x114   :  { %v3580_v63 = vpop.f32.mrb[16].mxu0 }
 0x115   :  { %v318_v1 = vsel %vm302_vm1, %v3580_v63, 0.0  ;;  %v366_v2 = vmul.f32 %v3580_v63, %v3580_v63  ;;  %v3117_v3 = vpop.f32.mrb[17].mxu0 }
 0x116   :  { %v319_v4 = vadd.f32 %v318_v1, %v317_v60  ;;  %v3586_v5 = vpop.f32.mrb[18].mxu0 }
 0x117   :  { %v398_v6 = vsel %vm302_vm1, %v366_v2, 0.0  ;;  %v320_v0 = vsel %vm302_vm1, %v3586_v5, 0.0  ;;  %v367_v7 = vmul.f32 %v3586_v5, %v3586_v5  ;;  %v3118_v8 = vpop.f32.mrb[19].mxu0 }
 0x118   :  { %v399_v10 = vadd.f32 %v398_v6, %v397_v62  ;;  %v321_v11 = vadd.f32 %v320_v0, %v319_v4 }
 0x119   :  { %v400_v13 = vsel %vm302_vm1, %v367_v7, 0.0 }
 0x11a   :  { %v401_v14 = vadd.f32 %v400_v13, %v399_v10 }
 0x11c   :  { %v3594_v15 = vpop.f32.mrb[20].mxu0 }
 0x11d   :  { %v322_v16 = vsel %vm302_vm1, %v3594_v15, 0.0  ;;  %v368_v17 = vmul.f32 %v3594_v15, %v3594_v15  ;;  %v3121_v18 = vpop.f32.mrb[21].mxu0 }
 0x11e   :  { %v323_v19 = vadd.f32 %v322_v16, %v321_v11  ;;  %v3600_v20 = vpop.f32.mrb[22].mxu0 }
 0x11f   :  { %v402_v22 = vsel %vm302_vm1, %v368_v17, 0.0  ;;  %v324_v23 = vsel %vm302_vm1, %v3600_v20, 0.0  ;;  %v369_v24 = vmul.f32 %v3600_v20, %v3600_v20  ;;  %v3122_v25 = vpop.f32.mrb[23].mxu0 }
 0x120   :  { %v403_v27 = vadd.f32 %v402_v22, %v401_v14  ;;  %v325_v28 = vadd.f32 %v324_v23, %v323_v19 }
 0x121   :  { %v404_v29 = vsel %vm302_vm1, %v369_v24, 0.0 }
 0x122   :  { %v405_v30 = vadd.f32 %v404_v29, %v403_v27 }
 0x124   :  { %v3608_v31 = vpop.f32.mrb[24].mxu0 }
 0x125   :  { %v326_v32 = vsel %vm302_vm1, %v3608_v31, 0.0  ;;  %v370_v33 = vmul.f32 %v3608_v31, %v3608_v31  ;;  %v3125_v34 = vpop.f32.mrb[25].mxu0 }
 0x126   :  { %v327_v36 = vadd.f32 %v326_v32, %v325_v28  ;;  %v3614_v37 = vpop.f32.mrb[26].mxu0 }
 0x127   :  { %v406_v38 = vsel %vm302_vm1, %v370_v33, 0.0  ;;  %v328_v39 = vsel %vm302_vm1, %v3614_v37, 0.0  ;;  %v371_v41 = vmul.f32 %v3614_v37, %v3614_v37  ;;  %v3126_v42 = vpop.f32.mrb[27].mxu0 }
 0x128   :  { %v407_v43 = vadd.f32 %v406_v38, %v405_v30  ;;  %v329_v44 = vadd.f32 %v328_v39, %v327_v36 }
 0x129   :  { %v408_v45 = vsel %vm302_vm1, %v371_v41, 0.0 }
 0x12a   :  { %v409_v46 = vadd.f32 %v408_v45, %v407_v43 }
 0x12c   :  { %v3622_v47 = vpop.f32.mrb[28].mxu0 }
 0x12d   :  { %v330_v48 = vsel %vm302_vm1, %v3622_v47, 0.0  ;;  %v372_v50 = vmul.f32 %v3622_v47, %v3622_v47  ;;  %v3129_v51 = vpop.f32.mrb[29].mxu0 }
 0x12e   :  { %v331_v52 = vadd.f32 %v330_v48, %v329_v44  ;;  %v3628_v53 = vpop.f32.mrb[30].mxu0 }
 0x12f   :  { %v410_v55 = vsel %vm302_vm1, %v372_v50, 0.0  ;;  %v332_v56 = vsel %vm302_vm1, %v3628_v53, 0.0  ;;  %v373_v57 = vmul.f32 %v3628_v53, %v3628_v53  ;;  %v3130_v58 = vpop.f32.mrb[31].mxu0 }
 0x130   :  { %v411_v59 = vadd.f32 %v410_v55, %v409_v46  ;;  %v333_v60 = vadd.f32 %v332_v56, %v331_v52 }
 0x131   :  { %v412_v61 = vsel %vm302_vm1, %v373_v57, 0.0  ;;  %v3678_v57 = vpop.permute.xlu0 %539 }
 0x132   :  { %v413_v62 = vadd.f32 %v412_v61, %v411_v59 }
 0x134   :  { %v3636_v1 = vpop.f32.mrb[32].mxu0 }
 0x135   :  { %v334_v2 = vsel %vm302_vm1, %v3636_v1, 0.0  ;;  %v374_v3 = vmul.f32 %v3636_v1, %v3636_v1  ;;  %v3133_v4 = vpop.f32.mrb[33].mxu0 }
 0x136   :  { %v335_v6 = vadd.f32 %v334_v2, %v333_v60  ;;  %v3642_v0 = vpop.f32.mrb[34].mxu0 }
 0x137   :  { %v414_v7 = vsel %vm302_vm1, %v374_v3, 0.0  ;;  %v336_v8 = vsel %vm302_vm1, %v3642_v0, 0.0  ;;  %v375_v10 = vmul.f32 %v3642_v0, %v3642_v0  ;;  %v3134_v11 = vpop.f32.mrb[35].mxu0 }
 0x138   :  { %v415_v13 = vadd.f32 %v414_v7, %v413_v62  ;;  %v337_v14 = vadd.f32 %v336_v8, %v335_v6  ;;  %v3693_v11 = vpop.permute.xlu0 %544 }
 0x139   :  { %v416_v16 = vsel %vm302_vm1, %v375_v10, 0.0 }
 0x13a   :  { %v417_v17 = vadd.f32 %v416_v16, %v415_v13 }
 0x13c   :  { %v3650_v18 = vpop.f32.mrb[36].mxu0 }
 0x13d   :  { %v338_v19 = vsel %vm302_vm1, %v3650_v18, 0.0  ;;  %v376_v22 = vmul.f32 %v3650_v18, %v3650_v18  ;;  %v3137_v23 = vpop.f32.mrb[37].mxu0 }
 0x13e   :  { %v339_v24 = vadd.f32 %v338_v19, %v337_v14  ;;  %v3656_v25 = vpop.f32.mrb[38].mxu0  ;;  %v3696_v14 = vpop.permute.xlu1 %549 }
 0x13f   :  { %v418_v27 = vsel %vm302_vm1, %v376_v22, 0.0  ;;  %v340_v28 = vsel %vm302_vm1, %v3656_v25, 0.0  ;;  %v377_v29 = vmul.f32 %v3656_v25, %v3656_v25  ;;  %v3138_v30 = vpop.f32.mrb[39].mxu0 }
 0x140   :  { %v419_v32 = vadd.f32 %v418_v27, %v417_v17  ;;  %v341_v33 = vadd.f32 %v340_v28, %v339_v24  ;;  %v3699_v28 = vpop.permute.xlu0 %559 }
 0x141   :  { %v420_v34 = vsel %vm302_vm1, %v377_v29, 0.0 }
 0x142   :  { %v421_v36 = vadd.f32 %v420_v34, %v419_v32  ;;  %v3702_v32 = vpop.permute.xlu1 %554 }
 0x144   :  { %v3664_v38 = vpop.f32.mrb[40].mxu0 }
 0x145   :  { %v342_v39 = vsel %vm302_vm1, %v3664_v38, 0.0  ;;  %v378_v41 = vmul.f32 %v3664_v38, %v3664_v38  ;;  %v3141_v42 = vpop.f32.mrb[41].mxu0 }
 0x146   :  { %v343_v43 = vadd.f32 %v342_v39, %v341_v33  ;;  %v3670_v44 = vpop.f32.mrb[42].mxu0 }
 0x147   :  { %v422_v45 = vsel %vm302_vm1, %v378_v41, 0.0  ;;  %v344_v46 = vsel %vm302_vm1, %v3670_v44, 0.0  ;;  %v379_v48 = vmul.f32 %v3670_v44, %v3670_v44  ;;  %v3142_v50 = vpop.f32.mrb[43].mxu0 }
 0x148   :  { %v423_v51 = vadd.f32 %v422_v45, %v421_v36  ;;  %v345_v52 = vadd.f32 %v344_v46, %v343_v43  ;;  %v3704_v43 = vpop.permute.xlu0 %569  ;;  %v3706_v45 = vpop.permute.xlu1 %564 }
 0x149   :  { %v424_v55 = vsel %vm302_vm1, %v379_v48, 0.0 }
 0x14a   :  { %v425_v56 = vadd.f32 %v424_v55, %v423_v51 }
 0x14c   :  { %v3680_v58 = vpop.f32.mrb[44].mxu0 }
 0x14d   :  { %v346_v59 = vsel %vm302_vm1, %v3680_v58, 0.0  ;;  %v380_v60 = vmul.f32 %v3680_v58, %v3680_v58  ;;  %v3145_v61 = vpop.f32.mrb[45].mxu0 }
 0x14e   :  { %v347_v62 = vadd.f32 %v346_v59, %v345_v52  ;;  %v3686_v2 = vpop.f32.mrb[46].mxu0  ;;  %v3710_v59 = vpop.permute.xlu1 %574 }
 0x14f   :  { %v426_v3 = vsel %vm302_vm1, %v380_v60, 0.0  ;;  %v348_v4 = vsel %vm302_vm1, %v3686_v2, 0.0  ;;  %v381_v6 = vmul.f32 %v3686_v2, %v3686_v2  ;;  %v3146_v7 = vpop.f32.mrb[47].mxu0 }
 0x150   :  { %v427_v8 = vadd.f32 %v426_v3, %v425_v56  ;;  %v349_v10 = vadd.f32 %v348_v4, %v347_v62  ;;  %v3708_v56 = vpop.permute.xlu0 %579 }
 0x151   :  { %v428_v13 = vsel %vm302_vm1, %v381_v6, 0.0 }
 0x152   :  { %v429_v16 = vadd.f32 %v428_v13, %v427_v8  ;;  %v3714_v7 = vpop.permute.xlu1 %584  ;;  %v451_v13 = vlaneseq }
 0x154   :  { %v296_v17 = vpop.f32.mrb[48].mxu0  ;;  %v3712_v6 = vpop.permute.xlu0 %589 }
 0x155   :  { %v350_v19 = vsel %vm302_vm1, %v296_v17, 0.0  ;;  %v382_v22 = vmul.f32 %v296_v17, %v296_v17  ;;  %v3149_v23 = vpop.f32.mrb[49].mxu0 }
 0x156   :  { %v351_v24 = vadd.f32 %v350_v19, %v349_v10  ;;  %v299_v27 = vpop.f32.mrb[50].mxu0  ;;  %v3718_v19 = vpop.permute.xlu1 %594 }
 0x157   :  { %v430_v29 = vsel %vm302_vm1, %v382_v22, 0.0  ;;  %v3150_v30 = vpop.f32.mrb[51].mxu0  ;;  %v452_v22 = vshrl.u32 %v451_v13, 7  ;;  %v443_v27 = vld [vmem:[%s5069_s5] sm:$0x1]  ;;  %s3248_s5 = smov 8  }
 0x158   :  { %v352_v33 = vrot.slane %v351_v24, 4  ;;  %v431_v34 = vadd.f32 %v430_v29, %v429_v16  ;;  %v3716_v16 = vpop.permute.xlu0 %599 }
 0x159   :  { %v3727_v29 = vsub.s32 0, %v452_v22 }
 0x15a   :  { %v353_v36 = vadd.f32 %v352_v33, %v351_v24  ;;  %v432_v39 = vrot.slane %v431_v34, 4  ;;  %v3722_v24 = vpop.permute.xlu1 %604 }
 0x15c   :  { %v354_v41 = vrot.slane %v353_v36, 2  ;;  %v433_v42 = vadd.f32 %v432_v39, %v431_v34  ;;  %v3720_v23 = vpop.permute.xlu0 %609  ;;  %v447_v34 = vld [vmem:[%s5070_s6] sm:$0x1]  ;;  %s3249_s6 = smov 16  }
 0x15e   :  { %v355_v46 = vadd.f32 %v354_v41, %v353_v36  ;;  %v434_v48 = vrot.slane %v433_v42, 2 }
 0x160   :  { %v356_v50 = vrot.slane %v355_v46, 1  ;;  %v435_v51 = vadd.f32 %v434_v48, %v433_v42  ;;  %v3735_v41 = vpop.permute.xlu0 %619  ;;  %v3737_v42 = vpop.permute.xlu1 %614 }
 0x162   :  { %v357_v52 = vadd.f32 %v356_v50, %v355_v46  ;;  %v436_v55 = vrot.slane %v435_v51, 1 }
 0x164   :  { %v437_v60 = vadd.f32 %v436_v55, %v435_v51  ;;  %v438_v61 = vmul.f32 0.0078125, %v357_v52 }
 0x166   :  { %v439_v62 = vmul.f32 0.0078125, %v437_v60  ;;  %v440_v3 = vmul.f32 %v438_v61, %v438_v61 }
 0x168   :  { %v441_v4 = vsub.f32 %v439_v62, %v440_v3 }
 0x16a   :  { %v442_v8 = vmax.f32 %v441_v4, 0.0  ;;  %v3775_v4 = vpop.permute.xlu0 %629 }
 0x16c   :  { %v444_v10 = vadd.f32 1e-05, %v442_v8 }
 0x16e   :  { %3239 = vrsqrt.f32 %v444_v10 }
 0x178   :  { %v3240_v30 = vpop.eup %3239 }
 0x179   :  { %v446_v33 = vmul.f32 %v3240_v30, %v443_v27 }
 0x17b   :  { %v448_v36 = vmul.f32 %v446_v33, %v438_v61  ;;  %v3733_v39 = vrot.slane %v446_v33, %v3727_v29 }
 0x17d   :  { %v449_v46 = vsub.f32 %v447_v34, %v448_v36  ;;  %v3740_v48 = vmul.f32 %v3733_v39, %v296_v17  ;;  %v458_v50 = vmul.f32 %v3733_v39, %v3538_v21  ;;  %v460_v51 = vmul.f32 %v3733_v39, %v3552_v35 }
 0x17e   :  { %v459_v52 = vmul.f32 %v3733_v39, %v3544_v26  ;;  %v462_v55 = vmul.f32 %v3733_v39, %v3566_v49  ;;  %v461_v60 = vmul.f32 %v3733_v39, %v3558_v40  ;;  %v464_v61 = vmul.f32 %v3733_v39, %v3580_v63 }
 0x17f   :  { %v3755_v17 = vrot.slane %v449_v46, %v3727_v29  ;;  %v463_v21 = vmul.f32 %v3733_v39, %v3572_v54  ;;  %v466_v35 = vmul.f32 %v3733_v39, %v3594_v15  ;;  %v465_v26 = vmul.f32 %v3733_v39, %v3586_v5 }
 0x180   :  { %v468_v49 = vmul.f32 %v3733_v39, %v3608_v31  ;;  %v467_v40 = vmul.f32 %v3733_v39, %v3600_v20  ;;  %v470_v63 = vmul.f32 %v3733_v39, %v3622_v47  ;;  %v469_v62 = vmul.f32 %v3733_v39, %v3614_v37  ;;  %v3777_v31 = vpop.permute.xlu1 %624 }
 0x181   :  { %v489_v54 = vadd.f32 %v3755_v17, %v458_v50  ;;  %v491_v3 = vadd.f32 %v3755_v17, %v460_v51  ;;  %v490_v15 = vadd.f32 %v3755_v17, %v459_v52  ;;  %v493_v5 = vadd.f32 %v3755_v17, %v462_v55 }
 0x182   :  { %v492_v20 = vadd.f32 %v3755_v17, %v461_v60  ;;  %v495_v8 = vadd.f32 %v3755_v17, %v464_v61  ;;  %v494_v47 = vadd.f32 %v3755_v17, %v463_v21  ;;  %v497_v37 = vadd.f32 %v3755_v17, %v466_v35 }
 0x183   :  { %v514_v10 = vmax.f32 %v489_v54, 0.0  ;;  %v516_v13 = vmax.f32 %v491_v3, 0.0  ;;  %v515_v22 = vmax.f32 %v490_v15, 0.0  ;;  %v518_v27 = vmax.f32 %v493_v5, 0.0 }
 0x184   :  { %v517_v30 = vmax.f32 %v492_v20, 0.0  ;;  %v520_v33 = vmax.f32 %v495_v8, 0.0  ;;  %v519_v34 = vmax.f32 %v494_v47, 0.0  ;;  %v522_v36 = vmax.f32 %v497_v37, 0.0 }
 0x185   :  { %v664_v46 = vmul.f32 %v3696_v14, %v514_v10  ;;  %v666_v50 = vmul.f32 %v3699_v28, %v516_v13  ;;  %v665_v51 = vmul.f32 %v3702_v32, %v515_v22  ;;  %v668_v52 = vmul.f32 %v3704_v43, %v518_v27 }
 0x186   :  { %v667_v55 = vmul.f32 %v3706_v45, %v517_v30  ;;  %v670_v60 = vmul.f32 %v3708_v56, %v520_v33  ;;  %v669_v61 = vmul.f32 %v3710_v59, %v519_v34  ;;  %v672_v21 = vmul.f32 %v3712_v6, %v522_v36  ;;  %v640_v45 = vpop.permute.xlu0 %639  ;;  %v635_v56 = vpop.permute.xlu1 %634 }
 0x187   :  { %689 = vst.msk [vmem:[#allocation2 + $0x10] sm:$0xff] %vm302_vm1, %v664_v46  ;;  %691 = vst.msk [vmem:[#allocation2 + $0x20] sm:$0xff] %vm302_vm1, %v666_v50  ;;  %v496_v14 = vadd.f32 %v3755_v17, %v465_v26  ;;  %v499_v28 = vadd.f32 %v3755_v17, %v468_v49  ;;  %v498_v32 = vadd.f32 %v3755_v17, %v467_v40 }
 0x188   :  { %690 = vst.msk [vmem:[#allocation2 + $0x18] sm:$0xff] %vm302_vm1, %v665_v51  ;;  %693 = vst.msk [vmem:[#allocation2 + $0x30] sm:$0xff] %vm302_vm1, %v668_v52  ;;  %v501_v43 = vadd.f32 %v3755_v17, %v470_v63  ;;  %v500_v59 = vadd.f32 %v3755_v17, %v469_v62  ;;  %v472_v6 = vmul.f32 %v3733_v39, %v3636_v1 }
 0x189   :  { %692 = vst.msk [vmem:[#allocation2 + $0x28] sm:$0xff] %vm302_vm1, %v667_v55  ;;  %695 = vst.msk [vmem:[#allocation2 + $0x40] sm:$0xff] %vm302_vm1, %v670_v60  ;;  %v471_v35 = vmul.f32 %v3733_v39, %v3628_v53  ;;  %v474_v26 = vmul.f32 %v3733_v39, %v3650_v18  ;;  %v521_v49 = vmax.f32 %v496_v14, 0.0  ;;  %v524_v40 = vmax.f32 %v499_v28, 0.0 }
 0x18a   :  { %694 = vst.msk [vmem:[#allocation2 + $0x38] sm:$0xff] %vm302_vm1, %v669_v61  ;;  %697 = vst.msk [vmem:[#allocation2 + $0x50] sm:$0xff] %vm302_vm1, %v672_v21  ;;  %v523_v63 = vmax.f32 %v498_v32, 0.0  ;;  %v526_v54 = vmax.f32 %v501_v43, 0.0  ;;  %v525_v3 = vmax.f32 %v500_v59, 0.0  ;;  %v503_v15 = vadd.f32 %v3755_v17, %v472_v6  ;;  %v645_v13 = vpop.permute.xlu1 %644 }
 0x18b   :  { %v502_v5 = vadd.f32 %v3755_v17, %v471_v35  ;;  %v505_v62 = vadd.f32 %v3755_v17, %v474_v26  ;;  %v671_v20 = vmul.f32 %v3714_v7, %v521_v49  ;;  %v674_v1 = vmul.f32 %v3716_v16, %v524_v40 }
 0x18c   :  { %v673_v53 = vmul.f32 %v3718_v19, %v523_v63  ;;  %v676_v8 = vmul.f32 %v3720_v23, %v526_v54  ;;  %v675_v18 = vmul.f32 %v3722_v24, %v525_v3  ;;  %v528_v47 = vmax.f32 %v503_v15, 0.0  ;;  %v650_v23 = vpop.permute.xlu0 %649 }
 0x18d   :  { %v527_v37 = vmax.f32 %v502_v5, 0.0  ;;  %v530_v10 = vmax.f32 %v505_v62, 0.0  ;;  %696 = vst.msk [vmem:[#allocation2 + $0x48] sm:$0xff] %vm302_vm1, %v671_v20  ;;  %699 = vst.msk [vmem:[#allocation2 + $0x60] sm:$0xff] %vm302_vm1, %v674_v1  ;;  %v473_v7 = vmul.f32 %v3733_v39, %v3642_v0  ;;  %v476_v16 = vmul.f32 %v3733_v39, %v3664_v38 }
 0x18e   :  { %698 = vst.msk [vmem:[#allocation2 + $0x58] sm:$0xff] %vm302_vm1, %v673_v53  ;;  %701 = vst.msk [vmem:[#allocation2 + $0x70] sm:$0xff] %vm302_vm1, %v676_v8  ;;  %v475_v19 = vmul.f32 %v3733_v39, %v3656_v25  ;;  %v478_v24 = vmul.f32 %v3733_v39, %v3680_v58  ;;  %v678_v22 = vmul.f32 %v3735_v41, %v528_v47  ;;  %v716_v54 = vld [vmem:[#allocation2 + $0x20] sm:$0xff] }
 0x18f   :  { %700 = vst.msk [vmem:[#allocation2 + $0x68] sm:$0xff] %vm302_vm1, %v675_v18  ;;  %v677_v27 = vmul.f32 %v3737_v42, %v527_v37  ;;  %v680_v30 = vmul.f32 %v3775_v4, %v530_v10  ;;  %v477_v0 = vmul.f32 %v3733_v39, %v3670_v44  ;;  %v504_v38 = vadd.f32 %v3755_v17, %v473_v7  ;;  %v715_v49 = vld [vmem:[#allocation2 + $0x18] sm:$0xff]  ;;  %v718_v62 = vld [vmem:[#allocation2 + $0x30] sm:$0xff] }
 0x190   :  { %v507_v25 = vadd.f32 %v3755_v17, %v476_v16  ;;  %v506_v33 = vadd.f32 %v3755_v17, %v475_v19  ;;  %v509_v58 = vadd.f32 %v3755_v17, %v478_v24  ;;  %703 = vst.msk [vmem:[#allocation2 + $0x80] sm:$0xff] %vm302_vm1, %v678_v22  ;;  %v511_v42 = vadd.f32 %v3755_v17, %v3740_v48  ;;  %v660_v28 = vpop.permute.xlu0 %659  ;;  %v717_v63 = vld [vmem:[#allocation2 + $0x28] sm:$0xff]  ;;  %v761_v5 = vld [vmem:[#allocation2 + $0x11] sm:$0xff]  ;;  %v902_v20 = vld [vmem:[#allocation2 + $0x1a] sm:$0xff] }
 0x191   :  { %702 = vst.msk [vmem:[#allocation2 + $0x78] sm:$0xff] %vm302_vm1, %v677_v27  ;;  %705 = vst.msk [vmem:[#allocation2 + $0x90] sm:$0xff] %vm302_vm1, %v680_v30  ;;  %v508_v41 = vadd.f32 %v3755_v17, %v477_v0  ;;  %v479_v44 = vmul.f32 %v3733_v39, %v3686_v2  ;;  %v457_v4 = vmul.f32 %v3733_v39, %v3528_v12  ;;  %v529_v34 = vmax.f32 %v504_v38, 0.0  ;;  %v655_v2 = vpop.permute.xlu1 %654  ;;  %v719_v15 = vld [vmem:[#allocation2 + $0x38] sm:$0xff]  ;;  %v720_v18 = vld [vmem:[#allocation2 + $0x40] sm:$0xff] }
 0x192   :  { %v532_v36 = vmax.f32 %v507_v25, 0.0  ;;  %v531_v46 = vmax.f32 %v506_v33, 0.0  ;;  %v534_v50 = vmax.f32 %v509_v58, 0.0  ;;  %v536_v52 = vmax.f32 %v511_v42, 0.0  ;;  %738 = vst.msk [vmem:[#allocation3 + $0x18] sm:$0xff] %vm302_vm1, %v715_v49  ;;  %740 = vst.msk [vmem:[#allocation3 + $0x28] sm:$0xff] %vm302_vm1, %v717_v63 }
 0x193   :  { %v533_v51 = vmax.f32 %v508_v41, 0.0  ;;  %v510_v55 = vadd.f32 %v3755_v17, %v479_v44  ;;  %v488_v60 = vadd.f32 %v3755_v17, %v457_v4  ;;  %v679_v61 = vmul.f32 %v3777_v31, %v529_v34  ;;  %739 = vst.msk [vmem:[#allocation3 + $0x20] sm:$0xff] %vm302_vm1, %v716_v54  ;;  %742 = vst.msk [vmem:[#allocation3 + $0x38] sm:$0xff] %vm302_vm1, %v719_v15  ;;  %v901_v53 = vld [vmem:[#allocation2 + $0x12] sm:$0xff]  ;;  %v3888_v10 = vld [vmem:[#allocation2 + $0x22] sm:$0xff] }
 0x194   :  { %v682_v21 = vmul.f32 %v640_v45, %v532_v36  ;;  %v681_v48 = vmul.f32 %v635_v56, %v531_v46  ;;  %v684_v14 = vmul.f32 %v650_v23, %v534_v50  ;;  %v686_v43 = vmul.f32 %v660_v28, %v536_v52  ;;  %741 = vst.msk [vmem:[#allocation3 + $0x30] sm:$0xff] %vm302_vm1, %v718_v62  ;;  %v721_v8 = vld [vmem:[#allocation2 + $0x48] sm:$0xff]  ;;  %v722_v37 = vld [vmem:[#allocation2 + $0x50] sm:$0xff]  ;;  %v724_v19 = vld [vmem:[#allocation2 + $0x60] sm:$0xff] }
 0x195   :  { %v683_v32 = vmul.f32 %v645_v13, %v533_v51  ;;  %v535_v12 = vmax.f32 %v510_v55, 0.0  ;;  %v513_v59 = vmax.f32 %v488_v60, 0.0  ;;  %704 = vst.msk [vmem:[#allocation2 + $0x88] sm:$0xff] %vm302_vm1, %v679_v61  ;;  %v456_v31 = vmul.f32 %v3733_v39, %v3524_v9  ;;  %v714_v9 = vld [vmem:[#allocation2 + $0x10] sm:$0xff]  ;;  %744 = vst.msk [vmem:[#allocation3 + $0x48] sm:$0xff] %vm302_vm1, %v721_v8  ;;  %v723_v47 = vld [vmem:[#allocation2 + $0x58] sm:$0xff] }
 0x196   :  { %707 = vst.msk [vmem:[#allocation2 + $0xa0] sm:$0xff] %vm302_vm1, %v682_v21  ;;  %706 = vst.msk [vmem:[#allocation2 + $0x98] sm:$0xff] %vm302_vm1, %v681_v48  ;;  %v1180_v7 = vld [vmem:[#allocation2 + $0x13] sm:$0xff]  ;;  %v725_v16 = vld [vmem:[#allocation2 + $0x68] sm:$0xff] }
 0x197   :  { %709 = vst.msk [vmem:[#allocation2 + $0xb0] sm:$0xff] %vm302_vm1, %v684_v14  ;;  %708 = vst.msk [vmem:[#allocation2 + $0xa8] sm:$0xff] %vm302_vm1, %v683_v32  ;;  %v685_v45 = vmul.f32 %v655_v2, %v535_v12  ;;  %v663_v56 = vmul.f32 %v3693_v11, %v513_v59  ;;  %v487_v6 = vadd.f32 %v3755_v17, %v456_v31  ;;  %v762_v17 = vld [vmem:[#allocation2 + $0x19] sm:$0xff]  ;;  %v726_v24 = vld [vmem:[#allocation2 + $0x70] sm:$0xff] }
 0x198   :  { %711 = vst.msk [vmem:[#allocation2 + $0xc0] sm:$0xff] %vm302_vm1, %v686_v43  ;;  %737 = vst.msk [vmem:[#allocation3 + $0x10] sm:$0xff] %vm302_vm1, %v714_v9  ;;  %v727_v23 = vld [vmem:[#allocation2 + $0x78] sm:$0xff]  ;;  %v1182_v13 = vld [vmem:[#allocation2 + $0x23] sm:$0xff] }
 0x199   :  { %710 = vst.msk [vmem:[#allocation2 + $0xb8] sm:$0xff] %vm302_vm1, %v685_v45  ;;  %688 = vst.msk [vmem:[#allocation2 + $0x8] sm:$0xff] %vm302_vm1, %v663_v56  ;;  %v512_v35 = vmax.f32 %v487_v6, 0.0  ;;  %v1320_v27 = vld [vmem:[#allocation2 + $0x14] sm:$0xff]  ;;  %v1322_v38 = vld [vmem:[#allocation2 + $0x24] sm:$0xff] }
 0x19a   :  { %743 = vst.msk [vmem:[#allocation3 + $0x40] sm:$0xff] %vm302_vm1, %v720_v18  ;;  %746 = vst.msk [vmem:[#allocation3 + $0x58] sm:$0xff] %vm302_vm1, %v723_v47  ;;  %v1181_v30 = vld [vmem:[#allocation2 + $0x1b] sm:$0xff]  ;;  %v730_v41 = vld [vmem:[#allocation2 + $0x90] sm:$0xff] }
 0x19b   :  { %v662_v26 = vmul.f32 %v3678_v57, %v512_v35  ;;  %745 = vst.msk [vmem:[#allocation3 + $0x50] sm:$0xff] %vm302_vm1, %v722_v37  ;;  %748 = vst.msk [vmem:[#allocation3 + $0x68] sm:$0xff] %vm302_vm1, %v725_v16  ;;  %v728_v33 = vld [vmem:[#allocation2 + $0x80] sm:$0xff]  ;;  %v3914_v36 = vld [vmem:[#allocation2 + $0x2c] sm:$0xff] }
 0x19c   :  { %747 = vst.msk [vmem:[#allocation3 + $0x60] sm:$0xff] %vm302_vm1, %v724_v19  ;;  %750 = vst.msk [vmem:[#allocation3 + $0x78] sm:$0xff] %vm302_vm1, %v727_v23  ;;  %v729_v25 = vld [vmem:[#allocation2 + $0x88] sm:$0xff]  ;;  %v1321_v34 = vld [vmem:[#allocation2 + $0x1c] sm:$0xff] }
 0x19d   :  { %687 = vst.msk [vmem:[#allocation2] sm:$0xff] %vm302_vm1, %v662_v26  ;;  %749 = vst.msk [vmem:[#allocation3 + $0x70] sm:$0xff] %vm302_vm1, %v726_v24  ;;  %v731_v58 = vld [vmem:[#allocation2 + $0x98] sm:$0xff]  ;;  %v732_v44 = vld [vmem:[#allocation2 + $0xa0] sm:$0xff] }
 0x19e   :  { %752 = vst.msk [vmem:[#allocation3 + $0x88] sm:$0xff] %vm302_vm1, %v729_v25  ;;  %751 = vst.msk [vmem:[#allocation3 + $0x80] sm:$0xff] %vm302_vm1, %v728_v33  ;;  %v733_v42 = vld [vmem:[#allocation2 + $0xa8] sm:$0xff]  ;;  %v734_v4 = vld [vmem:[#allocation2 + $0xb0] sm:$0x3] }
 0x19f   :  { %754 = vst.msk [vmem:[#allocation3 + $0x98] sm:$0xff] %vm302_vm1, %v731_v58  ;;  %753 = vst.msk [vmem:[#allocation3 + $0x90] sm:$0xff] %vm302_vm1, %v730_v41  ;;  %v1600_v46 = vld [vmem:[#allocation2 + $0x1d] sm:$0xff]  ;;  %v3235_v51 = vld [vmem:[%s5071_s3 + $0x8] sm:$0xff]  }
 0x1a0   :  { %v760_v39 = vld [vmem:[#allocation2 + $0x9] sm:$0xff]  ;;  %756 = vst.msk [vmem:[#allocation3 + $0xa8] sm:$0xff] %vm302_vm1, %v733_v42  ;;  %755 = vst.msk [vmem:[#allocation3 + $0xa0] sm:$0xff] %vm302_vm1, %v732_v44  ;;  %v3234_v50 = vld [vmem:[%s5071_s3] sm:$0xff]  }
 0x1a1   :  { %807 = vrot.lane.b32.xlu0 %v760_v39, %s3248_s5  ;;  %v713_v11 = vld [vmem:[#allocation2 + $0x8] sm:$0xff]  ;;  %758 = vst.msk [vmem:[#allocation3 + $0xb0] sm:$0x3] %vm757_vm2, %v734_v4  ;;  %3151 = vmatprep.subr.bf16.mxu1 %v3234_v50  ;;  %v1599_v55 = vld [vmem:[#allocation2 + $0x15] sm:$0xff]  ;;  %v1740_v61 = vld [vmem:[#allocation2 + $0x1e] sm:$0xff] }
 0x1a2   :  { %736 = vst.msk [vmem:[#allocation3 + $0x8] sm:$0xff] %vm302_vm1, %v713_v11  ;;  %v900_v3 = vld [vmem:[#allocation2 + $0xa] sm:$0xff]  ;;  %3152 = vmatpush3.bf16.msra.mxu1 %v3234_v50  ;;  %v3237_v48 = vld [vmem:[%s5071_s3 + $0x18] sm:$0xff]   ;;  %v3238_v2 = vld [vmem:[%s5071_s3 + $0x20] ss:$0 sps:$4 sm:$0xff]  }
 0x1a3   :  { %v1179_v22 = vld [vmem:[#allocation2 + $0xb] sm:$0xff]  ;;  %3153 = vmatprep.subr.bf16.mxu1 %v3235_v51  ;;  %v1739_v28 = vld [vmem:[#allocation2 + $0x16] sm:$0xff]  ;;  %v1989_v43 = vsel %vm1987_vm3, %v3238_v2, 0  ;;  %v763_v12 = vld [vmem:[#allocation2 + $0x21] sm:$0xff] }
 0x1a4   :  { %v759_v40 = vld [vmem:[#allocation2 + $0x1] sm:$0xff]  ;;  %v1319_v0 = vld [vmem:[#allocation2 + $0xc] sm:$0xff]  ;;  %v766_v59 = vld [vmem:[#allocation2 + $0x39] sm:$0xff] }
 0x1a5   :  { %811 = vrot.lane.b32.xlu0 %v762_v17, %s3248_s5  ;;  %v712_v57 = vld [vmem:[#allocation2] sm:$0xff]  ;;  %805 = vrot.lane.b32.xlu1 %v759_v40, %s3248_s5  ;;  %v1602_v52 = vld [vmem:[#allocation2 + $0x2d] sm:$0xff]  ;;  %v1743_v37 = vld [vmem:[#allocation2 + $0x36] sm:$0xff] }
 0x1a6   :  { %735 = vst.msk [vmem:[#allocation3] sm:$0xff] %vm302_vm1, %v712_v57  ;;  %v899_v1 = vld [vmem:[#allocation2 + $0x2] sm:$0xff]  ;;  %3154 = vmatpush3.bf16.msra.mxu1 %v3235_v51  ;;  %v3236_v60 = vld [vmem:[%s5071_s3 + $0x10] sm:$0xff]   ;;  %v906_v6 = vld [vmem:[#allocation2 + $0x3a] sm:$0xff] }
 0x1a7   :  { %3155 = vmatprep.subr.bf16.mxu1 %v3236_v60  ;;  %v1601_v21 = vld [vmem:[#allocation2 + $0x25] sm:$0xff]  ;;  %v1742_v32 = vld [vmem:[#allocation2 + $0x2e] sm:$0xff]  ;;  %v1185_v17 = vld [vmem:[#allocation2 + $0x3b] sm:$0xff] }
 0x1a8   :  { %v764_v14 = vld [vmem:[#allocation2 + $0x29] sm:$0xff]  ;;  %v765_v56 = vld [vmem:[#allocation2 + $0x31] sm:$0xff]  ;;  %v1325_v57 = vld [vmem:[#allocation2 + $0x3c] sm:$0xff] }
 0x1a9   :  { %947 = vrot.lane.b32.xlu0 %v900_v3, %s3249_s6  ;;  %809 = vrot.lane.b32.xlu1 %v761_v5, %s3248_s5  ;;  %v1741_v31 = vld [vmem:[#allocation2 + $0x26] sm:$0xff]  ;;  %v905_v35 = vld [vmem:[#allocation2 + $0x32] sm:$0xff]  ;;  %v1604_v54 = vld [vmem:[#allocation2 + $0x3d] sm:$0xff] }
 0x1aa   :  { %3156 = vmatpush3.bf16.msra.mxu1 %v3236_v60  ;;  %v904_v45 = vld [vmem:[#allocation2 + $0x2a] sm:$0xff]  ;;  %v3955_v26 = vld [vmem:[#allocation2 + $0x42] sm:$0xff]  ;;  %v1184_v49 = vld [vmem:[#allocation2 + $0x33] sm:$0xff] }
 0x1ab   :  { %3157 = vmatprep.subr.bf16.mxu1 %v3237_v48  ;;  %v1186_v9 = vld [vmem:[#allocation2 + $0x43] sm:$0xff]  ;;  %v1183_v39 = vld [vmem:[#allocation2 + $0x2b] sm:$0xff]  ;;  %v1324_v11 = vld [vmem:[#allocation2 + $0x34] sm:$0xff] }
 0x1ac   :  { %v1326_v40 = vld [vmem:[#allocation2 + $0x44] sm:$0xff]  ;;  %v3971_v63 = vld [vmem:[#allocation2 + $0x4c] sm:$0xff]  ;;  %v1603_v5 = vld [vmem:[#allocation2 + $0x35] sm:$0xff] }
 0x1ad   :  { %951 = vrot.lane.b32.xlu0 %v902_v20, %s3249_s6  ;;  %945 = vrot.lane.b32.xlu1 %v899_v1, %s3249_s6  ;;  %v1606_v15 = vld [vmem:[#allocation2 + $0x4d] sm:$0xff]  ;;  %v1744_v1 = vld [vmem:[#allocation2 + $0x3e] sm:$0xff] }
 0x1ae   :  { %3158 = vmatpush3.bf16.msra.mxu1 %v3237_v48  ;;  %v768_v47 = vld [vmem:[#allocation2 + $0x49] sm:$0xff]  ;;  %v767_v19 = vld [vmem:[#allocation2 + $0x41] sm:$0xff]  ;;  %v909_v44 = vld [vmem:[#allocation2 + $0x52] sm:$0xff] }
 0x1af   :  { %3211 = vmatprep.subr.msk.bf16.mxu1 %vm1987_vm3, %v3238_v2  ;;  %v1746_v16 = vld [vmem:[#allocation2 + $0x4e] sm:$0xff]  ;;  %v910_v58 = vld [vmem:[#allocation2 + $0x5a] sm:$0xff]  ;;  %v1190_v60 = vld [vmem:[#allocation2 + $0x63] sm:$0xff] }
 0x1b0   :  { %v1188_v51 = vld [vmem:[#allocation2 + $0x53] sm:$0xff] }
 0x1b1   :  { %1087 = vrot.lane.b32.xlu0 %v901_v53, %s3250_s18  ;;  %949 = vrot.lane.b32.xlu1 %v901_v53, %s3249_s6  ;;  %v1605_v53 = vld [vmem:[#allocation2 + $0x45] sm:$0xff] }
 0x1b2   :  { %3160 = vmatpush3.bf16.msra.mxu1 %v1989_v43  ;;  %v1330_v43 = vld [vmem:[#allocation2 + $0x64] sm:$0xff] }
 0x1b5   :  { %1091 = vrot.lane.b32.xlu0 %v3888_v10, %s3250_s18  ;;  %1085 = vrot.lane.b32.xlu1 %v900_v3, %s3250_s18 }
 0x1b9   :  { %1227 = vrot.lane.b32.xlu0 %v1180_v7, %s3251_s19  ;;  %1089 = vrot.lane.b32.xlu1 %v902_v20, %s3250_s18 }
 0x1bd   :  { %1231 = vrot.lane.b32.xlu0 %v1182_v13, %s3251_s19  ;;  %1225 = vrot.lane.b32.xlu1 %v1179_v22, %s3251_s19  ;;  %v770_v13 = vld [vmem:[#allocation2 + $0x59] sm:$0xff]  ;;  %v1745_v22 = vld [vmem:[#allocation2 + $0x46] sm:$0xff] }
 0x1c1   :  { %1367 = vrot.lane.b32.xlu0 %v1320_v27, %s3252_s20  ;;  %1229 = vrot.lane.b32.xlu1 %v1181_v30, %s3251_s19 }
 0x1c5   :  { %1371 = vrot.lane.b32.xlu0 %v1322_v38, %s3252_s20  ;;  %1365 = vrot.lane.b32.xlu1 %v1319_v0, %s3252_s20  ;;  %v908_v0 = vld [vmem:[#allocation2 + $0x4a] sm:$0xff] }
 0x1c9   :  { %1507 = vrot.lane.b32.xlu0 %v1321_v34, %s3253_s21  ;;  %1369 = vrot.lane.b32.xlu1 %v1321_v34, %s3252_s20 }
 0x1cd   :  { %1511 = vrot.lane.b32.xlu0 %v3914_v36, %s3253_s21  ;;  %1505 = vrot.lane.b32.xlu1 %v1320_v27, %s3253_s21 }
 0x1d1   :  { %1647 = vrot.lane.b32.xlu0 %v1600_v46, %s3254_s24  ;;  %1509 = vrot.lane.b32.xlu1 %v1322_v38, %s3253_s21  ;;  %v769_v38 = vld [vmem:[#allocation2 + $0x51] sm:$0xff] }
 0x1d5   :  { %1651 = vrot.lane.b32.xlu0 %v1602_v52, %s3254_s24  ;;  %1645 = vrot.lane.b32.xlu1 %v1599_v55, %s3254_s24 }
 0x1d9   :  { %1787 = vrot.lane.b32.xlu0 %v1740_v61, %s3255_s29  ;;  %1649 = vrot.lane.b32.xlu1 %v1601_v21, %s3254_s24  ;;  %v1187_v61 = vld [vmem:[#allocation2 + $0x4b] sm:$0xff] }
 0x1dd   :  { %815 = vrot.lane.b32.xlu0 %v764_v14, %s3248_s5  ;;  %1785 = vrot.lane.b32.xlu1 %v1739_v28, %s3255_s29  ;;  %v1328_v14 = vld [vmem:[#allocation2 + $0x54] sm:$0xff] }
 0x1de   :  { %v1189_v28 = vld [vmem:[#allocation2 + $0x5b] sm:$0xff] }
 0x1e1   :  { %1791 = vrot.lane.b32.xlu0 %v1742_v32, %s3255_s29  ;;  %813 = vrot.lane.b32.xlu1 %v763_v12, %s3248_s5 }
 0x1e5   :  { %819 = vrot.lane.b32.xlu0 %v766_v59, %s3248_s5  ;;  %1789 = vrot.lane.b32.xlu1 %v1741_v31, %s3255_s29  ;;  %v1329_v31 = vld [vmem:[#allocation2 + $0x5c] sm:$0xff] }
 0x1e9   :  { %955 = vrot.lane.b32.xlu0 %v904_v45, %s3249_s6  ;;  %817 = vrot.lane.b32.xlu1 %v765_v56, %s3248_s5 }
 0x1ed   :  { %959 = vrot.lane.b32.xlu0 %v906_v6, %s3249_s6  ;;  %953 = vrot.lane.b32.xlu1 %v3888_v10, %s3249_s6 }
 0x1f1   :  { %1095 = vrot.lane.b32.xlu0 %v905_v35, %s3250_s18  ;;  %957 = vrot.lane.b32.xlu1 %v905_v35, %s3249_s6 }
 0x1f5   :  { %1099 = vrot.lane.b32.xlu0 %v3955_v26, %s3250_s18  ;;  %1093 = vrot.lane.b32.xlu1 %v904_v45, %s3250_s18 }
 0x1f9   :  { %1235 = vrot.lane.b32.xlu0 %v1184_v49, %s3251_s19  ;;  %1097 = vrot.lane.b32.xlu1 %v906_v6, %s3250_s18  ;;  %v4039_v6 = vld [vmem:[#allocation2 + $0x6c] sm:$0xff]  ;;  %v1608_v49 = vld [vmem:[#allocation2 + $0x5d] sm:$0xff] }
 0x1fd   :  { %1239 = vrot.lane.b32.xlu0 %v1186_v9, %s3251_s19  ;;  %1233 = vrot.lane.b32.xlu1 %v1183_v39, %s3251_s19 }
 0x201   :  { %1375 = vrot.lane.b32.xlu0 %v1324_v11, %s3252_s20  ;;  %1237 = vrot.lane.b32.xlu1 %v1185_v17, %s3251_s19  ;;  %v1607_v17 = vld [vmem:[#allocation2 + $0x55] sm:$0xff] }
 0x205   :  { %1379 = vrot.lane.b32.xlu0 %v1326_v40, %s3252_s20  ;;  %1373 = vrot.lane.b32.xlu1 %v3914_v36, %s3252_s20  ;;  %v4011_v36 = vld [vmem:[#allocation2 + $0x62] sm:$0xff] }
 0x209   :  { %1515 = vrot.lane.b32.xlu0 %v1325_v57, %s3253_s21  ;;  %1377 = vrot.lane.b32.xlu1 %v1325_v57, %s3252_s20 }
 0x20d   :  { %1519 = vrot.lane.b32.xlu0 %v3971_v63, %s3253_s21  ;;  %1513 = vrot.lane.b32.xlu1 %v1324_v11, %s3253_s21  ;;  %v1610_v11 = vld [vmem:[#allocation2 + $0x6d] sm:$0xff] }
 0x211   :  { %1655 = vrot.lane.b32.xlu0 %v1604_v54, %s3254_s24  ;;  %1517 = vrot.lane.b32.xlu1 %v1326_v40, %s3253_s21 }
 0x213   :  { %v808_v3 = vpop.permute.xlu0 %807 }
 0x214   :  { %876 = vst.msk [vmem:[#allocation3 + $0x8] sm:$0xff] %vm874_vm4, %v808_v3  ;;  %v1748_v3 = vld [vmem:[#allocation2 + $0x5e] sm:$0xff] }
 0x215   :  { %1659 = vrot.lane.b32.xlu0 %v1606_v15, %s3254_s24  ;;  %1653 = vrot.lane.b32.xlu1 %v1603_v5, %s3254_s24  ;;  %v1609_v15 = vld [vmem:[#allocation2 + $0x65] sm:$0xff] }
 0x217   :  { %v812_v62 = vpop.permute.xlu0 %811  ;;  %v806_v20 = vpop.permute.xlu1 %805 }
 0x218   :  { %878 = vst.msk [vmem:[#allocation3 + $0x18] sm:$0xff] %vm874_vm4, %v812_v62  ;;  %875 = vst.msk [vmem:[#allocation3] sm:$0xff] %vm874_vm4, %v806_v20 }
 0x219   :  { %1795 = vrot.lane.b32.xlu0 %v1744_v1, %s3255_s29  ;;  %1657 = vrot.lane.b32.xlu1 %v1605_v53, %s3254_s24  ;;  %v772_v1 = vld [vmem:[#allocation2 + $0x69] sm:$0xff]  ;;  %v1747_v53 = vld [vmem:[#allocation2 + $0x56] sm:$0xff] }
 0x21b   :  { %v948_v8 = vpop.permute.xlu0 %947  ;;  %v810_v18 = vpop.permute.xlu1 %809 }
 0x21c   :  { %1016 = vst.msk [vmem:[#allocation3 + $0x8] sm:$0xff] %vm1014_vm5, %v948_v8 }
 0x21d   :  { %877 = vst.msk [vmem:[#allocation3 + $0x10] sm:$0xff] %vm874_vm4, %v810_v18  ;;  %823 = vrot.lane.b32.xlu0 %v768_v47, %s3248_s5  ;;  %1793 = vrot.lane.b32.xlu1 %v1743_v37, %s3255_s29 }
 0x21f   :  { %v952_v10 = vpop.permute.xlu0 %951  ;;  %v946_v7 = vpop.permute.xlu1 %945 }
 0x220   :  { %1018 = vst.msk [vmem:[#allocation3 + $0x18] sm:$0xff] %vm1014_vm5, %v952_v10  ;;  %1015 = vst.msk [vmem:[#allocation3] sm:$0xff] %vm1014_vm5, %v946_v7  ;;  %v1750_v10 = vld [vmem:[#allocation2 + $0x6e] sm:$0xff]  ;;  %v771_v7 = vld [vmem:[#allocation2 + $0x61] sm:$0xff] }
 0x221   :  { %1799 = vrot.lane.b32.xlu0 %v1746_v16, %s3255_s29  ;;  %821 = vrot.lane.b32.xlu1 %v767_v19, %s3248_s5 }
 0x223   :  { %v1088_v23 = vpop.permute.xlu0 %1087  ;;  %v950_v24 = vpop.permute.xlu1 %949 }
 0x224   :  { %1156 = vst.msk [vmem:[#allocation3 + $0x8] sm:$0xff] %vm1154_vm6, %v1088_v23 }
 0x225   :  { %1017 = vst.msk [vmem:[#allocation3 + $0x10] sm:$0xff] %vm1014_vm5, %v950_v24  ;;  %827 = vrot.lane.b32.xlu0 %v770_v13, %s3248_s5  ;;  %1797 = vrot.lane.b32.xlu1 %v1745_v22, %s3255_s29  ;;  %v774_v24 = vld [vmem:[#allocation2 + $0x79] sm:$0xff]  ;;  %v1749_v13 = vld [vmem:[#allocation2 + $0x66] sm:$0xff] }
 0x227   :  { %v1092_v27 = vpop.permute.xlu0 %1091  ;;  %v1086_v30 = vpop.permute.xlu1 %1085 }
 0x228   :  { %1158 = vst.msk [vmem:[#allocation3 + $0x18] sm:$0xff] %vm1154_vm6, %v1092_v27  ;;  %1155 = vst.msk [vmem:[#allocation3] sm:$0xff] %vm1154_vm6, %v1086_v30  ;;  %v912_v30 = vld [vmem:[#allocation2 + $0x6a] sm:$0xff] }
 0x229   :  { %963 = vrot.lane.b32.xlu0 %v908_v0, %s3249_s6  ;;  %825 = vrot.lane.b32.xlu1 %v769_v38, %s3248_s5 }
 0x22b   :  { %v1228_v25 = vpop.permute.xlu0 %1227  ;;  %v1090_v33 = vpop.permute.xlu1 %1089 }
 0x22c   :  { %1296 = vst.msk [vmem:[#allocation3 + $0x8] sm:$0xff] %vm1294_vm7, %v1228_v25 }
 0x22d   :  { %1157 = vst.msk [vmem:[#allocation3 + $0x10] sm:$0xff] %vm1154_vm6, %v1090_v33  ;;  %967 = vrot.lane.b32.xlu0 %v910_v58, %s3249_s6  ;;  %961 = vrot.lane.b32.xlu1 %v3955_v26, %s3249_s6  ;;  %v914_v33 = vld [vmem:[#allocation2 + $0x7a] sm:$0xff] }
 0x22f   :  { %v1232_v41 = vpop.permute.xlu0 %1231  ;;  %v1226_v42 = vpop.permute.xlu1 %1225 }
 0x230   :  { %1298 = vst.msk [vmem:[#allocation3 + $0x18] sm:$0xff] %vm1294_vm7, %v1232_v41  ;;  %1295 = vst.msk [vmem:[#allocation3] sm:$0xff] %vm1294_vm7, %v1226_v42  ;;  %v913_v42 = vld [vmem:[#allocation2 + $0x72] sm:$0xff] }
 0x231   :  { %1103 = vrot.lane.b32.xlu0 %v909_v44, %s3250_s18  ;;  %965 = vrot.lane.b32.xlu1 %v909_v44, %s3249_s6 }
 0x233   :  { %v1368_v4 = vpop.permute.xlu0 %1367  ;;  %v1230_v34 = vpop.permute.xlu1 %1229 }
 0x234   :  { %1436 = vst.msk [vmem:[#allocation3 + $0x8] sm:$0xff] %vm1434_vm8, %v1368_v4 }
 0x235   :  { %1297 = vst.msk [vmem:[#allocation3 + $0x10] sm:$0xff] %vm1294_vm7, %v1230_v34  ;;  %1107 = vrot.lane.b32.xlu0 %v4011_v36, %s3250_s18  ;;  %1101 = vrot.lane.b32.xlu1 %v908_v0, %s3250_s18  ;;  %v773_v0 = vld [vmem:[#allocation2 + $0x71] sm:$0xff]  ;;  %v4085_v34 = vld [vmem:[#allocation2 + $0x82] sm:$0xff] }
 0x237   :  { %v1372_v46 = vpop.permute.xlu0 %1371  ;;  %v1366_v50 = vpop.permute.xlu1 %1365 }
 0x238   :  { %1438 = vst.msk [vmem:[#allocation3 + $0x18] sm:$0xff] %vm1434_vm8, %v1372_v46  ;;  %1435 = vst.msk [vmem:[#allocation3] sm:$0xff] %vm1434_vm8, %v1366_v50  ;;  %v1192_v50 = vld [vmem:[#allocation2 + $0x73] sm:$0xff] }
 0x239   :  { %1243 = vrot.lane.b32.xlu0 %v1188_v51, %s3251_s19  ;;  %1105 = vrot.lane.b32.xlu1 %v910_v58, %s3250_s18 }
 0x23b   :  { %v1508_v52 = vpop.permute.xlu0 %1507  ;;  %v1370_v55 = vpop.permute.xlu1 %1369 }
 0x23c   :  { %1576 = vst.msk [vmem:[#allocation3 + $0x8] sm:$0xff] %vm1574_vm9, %v1508_v52 }
 0x23d   :  { %1437 = vst.msk [vmem:[#allocation3 + $0x10] sm:$0xff] %vm1434_vm8, %v1370_v55  ;;  %1247 = vrot.lane.b32.xlu0 %v1190_v60, %s3251_s19  ;;  %1241 = vrot.lane.b32.xlu1 %v1187_v61, %s3251_s19  ;;  %v1194_v55 = vld [vmem:[#allocation2 + $0x83] sm:$0xff]  ;;  %v1191_v60 = vld [vmem:[#allocation2 + $0x6b] sm:$0xff] }
 0x23f   :  { %v1512_v21 = vpop.permute.xlu0 %1511  ;;  %v1506_v48 = vpop.permute.xlu1 %1505 }
 0x240   :  { %1578 = vst.msk [vmem:[#allocation3 + $0x18] sm:$0xff] %vm1574_vm9, %v1512_v21  ;;  %1575 = vst.msk [vmem:[#allocation3] sm:$0xff] %vm1574_vm9, %v1506_v48  ;;  %v1332_v48 = vld [vmem:[#allocation2 + $0x74] sm:$0xff] }
 0x241   :  { %1383 = vrot.lane.b32.xlu0 %v1328_v14, %s3252_s20  ;;  %1245 = vrot.lane.b32.xlu1 %v1189_v28, %s3251_s19 }
 0x243   :  { %v1648_v2 = vpop.permute.xlu0 %1647  ;;  %v1510_v32 = vpop.permute.xlu1 %1509 }
 0x244   :  { %1716 = vst.msk [vmem:[#allocation3 + $0x8] sm:$0xff] %vm1714_vm10, %v1648_v2 }
 0x245   :  { %1577 = vst.msk [vmem:[#allocation3 + $0x10] sm:$0xff] %vm1574_vm9, %v1510_v32  ;;  %1387 = vrot.lane.b32.xlu0 %v1330_v43, %s3252_s20  ;;  %1381 = vrot.lane.b32.xlu1 %v3971_v63, %s3252_s20  ;;  %v1334_v32 = vld [vmem:[#allocation2 + $0x84] sm:$0xff] }
 0x247   :  { %v1652_v12 = vpop.permute.xlu0 %1651  ;;  %v1646_v59 = vpop.permute.xlu1 %1645 }
 0x248   :  { %1718 = vst.msk [vmem:[#allocation3 + $0x18] sm:$0xff] %vm1714_vm10, %v1652_v12  ;;  %1715 = vst.msk [vmem:[#allocation3] sm:$0xff] %vm1714_vm10, %v1646_v59  ;;  %v1333_v59 = vld [vmem:[#allocation2 + $0x7c] sm:$0xff] }
 0x249   :  { %1523 = vrot.lane.b32.xlu0 %v1329_v31, %s3253_s21  ;;  %1385 = vrot.lane.b32.xlu1 %v1329_v31, %s3252_s20 }
 0x24b   :  { %v1788_v45 = vpop.permute.xlu0 %1787  ;;  %v1650_v56 = vpop.permute.xlu1 %1649 }
 0x24c   :  { %1856 = vst.msk [vmem:[#allocation3 + $0x8] sm:$0xff] %vm1854_vm11, %v1788_v45 }
 0x24d   :  { %1717 = vst.msk [vmem:[#allocation3 + $0x10] sm:$0xff] %vm1714_vm10, %v1650_v56  ;;  %1527 = vrot.lane.b32.xlu0 %v4039_v6, %s3253_s21  ;;  %1521 = vrot.lane.b32.xlu1 %v1328_v14, %s3253_s21  ;;  %v1193_v14 = vld [vmem:[#allocation2 + $0x7b] sm:$0xff]  ;;  %v4113_v56 = vld [vmem:[#allocation2 + $0x8c] sm:$0xff] }
 0x24f   :  { %v816_v35 = vpop.permute.xlu0 %815  ;;  %v1786_v26 = vpop.permute.xlu1 %1785 }
 0x250   :  { %880 = vst.msk [vmem:[#allocation3 + $0x28] sm:$0xff] %vm874_vm4, %v816_v35 }
 0x251   :  { %1855 = vst.msk [vmem:[#allocation3] sm:$0xff] %vm1854_vm11, %v1786_v26  ;;  %1663 = vrot.lane.b32.xlu0 %v1608_v49, %s3254_s24  ;;  %1525 = vrot.lane.b32.xlu1 %v1330_v43, %s3253_s21  ;;  %v1612_v26 = vld [vmem:[#allocation2 + $0x7d] sm:$0xff] }
 0x253   :  { %v1792_v9 = vpop.permute.xlu0 %1791  ;;  %v814_v39 = vpop.permute.xlu1 %813  ;;  %v1880_v40 = vld [vmem:[#allocation3 + $0x8] sm:$0xff] }
 0x254   :  { %1858 = vst.msk [vmem:[#allocation3 + $0x18] sm:$0xff] %vm1854_vm11, %v1792_v9 }
 0x255   :  { %879 = vst.msk [vmem:[#allocation3 + $0x20] sm:$0xff] %vm874_vm4, %v814_v39  ;;  %1667 = vrot.lane.b32.xlu0 %v1610_v11, %s3254_s24  ;;  %1661 = vrot.lane.b32.xlu1 %v1607_v17, %s3254_s24  ;;  %v1614_v39 = vld [vmem:[#allocation2 + $0x8d] sm:$0xff]  ;;  %v1611_v11 = vld [vmem:[#allocation2 + $0x75] sm:$0xff] }
 0x257   :  { %v820_v57 = vpop.permute.xlu0 %819  ;;  %v1790_v63 = vpop.permute.xlu1 %1789 }
 0x258   :  { %v1879_v54 = vld [vmem:[#allocation3] sm:$0xff]  ;;  %882 = vst.msk [vmem:[#allocation3 + $0x38] sm:$0xff] %vm874_vm4, %v820_v57 }
 0x259   :  { %1857 = vst.msk [vmem:[#allocation3 + $0x10] sm:$0xff] %vm1854_vm11, %v1790_v63  ;;  %v1902_v5 = vpack.c.bf16 %v1880_v40, %v1879_v54  ;;  %1803 = vrot.lane.b32.xlu0 %v1748_v3, %s3255_s29  ;;  %1665 = vrot.lane.b32.xlu1 %v1609_v15, %s3254_s24  ;;  %v1752_v54 = vld [vmem:[#allocation2 + $0x7e] sm:$0xff] }
 0x25a   :  { %v1613_v3 = vld [vmem:[#allocation2 + $0x85] sm:$0xff] }
 0x25b   :  { %3161 = vmatprep.mubr.msk.bf16.mxu1 %vm1950_vm12, %v1902_v5  ;;  %v956_v62 = vpop.permute.xlu0 %955  ;;  %v818_v20 = vpop.permute.xlu1 %817  ;;  %v1882_v8 = vld [vmem:[#allocation3 + $0x18] sm:$0xff] }
 0x25c   :  { %1020 = vst.msk [vmem:[#allocation3 + $0x28] sm:$0xff] %vm1014_vm5, %v956_v62 }
 0x25d   :  { %881 = vst.msk [vmem:[#allocation3 + $0x30] sm:$0xff] %vm874_vm4, %v818_v20  ;;  %831 = vrot.lane.b32.xlu0 %v772_v1, %s3248_s5  ;;  %1801 = vrot.lane.b32.xlu1 %v1747_v53, %s3255_s29  ;;  %v776_v20 = vld [vmem:[#allocation2 + $0x89] sm:$0xff]  ;;  %v1751_v1 = vld [vmem:[#allocation2 + $0x76] sm:$0xff] }
 0x25f   :  { %v960_v18 = vpop.permute.xlu0 %959  ;;  %v954_v47 = vpop.permute.xlu1 %953 }
 0x260   :  { %v1881_v37 = vld [vmem:[#allocation3 + $0x10] sm:$0xff]  ;;  %1022 = vst.msk [vmem:[#allocation3 + $0x38] sm:$0xff] %vm1014_vm5, %v960_v18  ;;  %1019 = vst.msk [vmem:[#allocation3 + $0x20] sm:$0xff] %vm1014_vm5, %v954_v47 }
 0x261   :  { %v1903_v16 = vpack.c.bf16 %v1882_v8, %v1881_v37  ;;  %1807 = vrot.lane.b32.xlu0 %v1750_v10, %s3255_s29  ;;  %829 = vrot.lane.b32.xlu1 %v771_v7, %s3248_s5  ;;  %v1754_v37 = vld [vmem:[#allocation2 + $0x8e] sm:$0xff]  ;;  %v775_v10 = vld [vmem:[#allocation2 + $0x81] sm:$0xff] }
 0x263   :  { %3162 = vmatmul.mubr.msk.bf16.vlgmr.msra.gmra.mrb[0].mxu1 %vm1950_vm12, %v1903_v16  ;;  %v1096_v19 = vpop.permute.xlu0 %1095  ;;  %v958_v23 = vpop.permute.xlu1 %957 }
 0x264   :  { %1160 = vst.msk [vmem:[#allocation3 + $0x28] sm:$0xff] %vm1154_vm6, %v1096_v19 }
 0x265   :  { %1021 = vst.msk [vmem:[#allocation3 + $0x30] sm:$0xff] %vm1014_vm5, %v958_v23  ;;  %835 = vrot.lane.b32.xlu0 %v774_v24, %s3248_s5  ;;  %1805 = vrot.lane.b32.xlu1 %v1749_v13, %s3255_s29  ;;  %v778_v23 = vld [vmem:[#allocation2 + $0x99] sm:$0xff]  ;;  %v1753_v24 = vld [vmem:[#allocation2 + $0x86] sm:$0xff] }
 0x267   :  { %v1100_v22 = vpop.permute.xlu0 %1099  ;;  %v1094_v27 = vpop.permute.xlu1 %1093 }
 0x268   :  { %1162 = vst.msk [vmem:[#allocation3 + $0x38] sm:$0xff] %vm1154_vm6, %v1100_v22  ;;  %1159 = vst.msk [vmem:[#allocation3 + $0x20] sm:$0xff] %vm1154_vm6, %v1094_v27  ;;  %v916_v27 = vld [vmem:[#allocation2 + $0x8a] sm:$0xff] }
 0x269   :  { %971 = vrot.lane.b32.xlu0 %v912_v30, %s3249_s6  ;;  %833 = vrot.lane.b32.xlu1 %v773_v0, %s3248_s5 }
 0x26b   :  { %v1236_v38 = vpop.permute.xlu0 %1235  ;;  %v1098_v25 = vpop.permute.xlu1 %1097 }
 0x26c   :  { %1300 = vst.msk [vmem:[#allocation3 + $0x28] sm:$0xff] %vm1294_vm7, %v1236_v38 }
 0x26d   :  { %1161 = vst.msk [vmem:[#allocation3 + $0x30] sm:$0xff] %vm1154_vm6, %v1098_v25  ;;  %975 = vrot.lane.b32.xlu0 %v914_v33, %s3249_s6  ;;  %969 = vrot.lane.b32.xlu1 %v4011_v36, %s3249_s6  ;;  %v918_v25 = vld [vmem:[#allocation2 + $0x9a] sm:$0xff] }
 0x26f   :  { %v1240_v58 = vpop.permute.xlu0 %1239  ;;  %v1234_v41 = vpop.permute.xlu1 %1233 }
 0x270   :  { %1302 = vst.msk [vmem:[#allocation3 + $0x38] sm:$0xff] %vm1294_vm7, %v1240_v58  ;;  %1299 = vst.msk [vmem:[#allocation3 + $0x20] sm:$0xff] %vm1294_vm7, %v1234_v41  ;;  %v917_v41 = vld [vmem:[#allocation2 + $0x92] sm:$0xff] }
 0x271   :  { %1111 = vrot.lane.b32.xlu0 %v913_v42, %s3250_s18  ;;  %973 = vrot.lane.b32.xlu1 %v913_v42, %s3249_s6 }
 0x273   :  { %v1376_v44 = vpop.permute.xlu0 %1375  ;;  %v1238_v4 = vpop.permute.xlu1 %1237 }
 0x274   :  { %1440 = vst.msk [vmem:[#allocation3 + $0x28] sm:$0xff] %vm1434_vm8, %v1376_v44 }
 0x275   :  { %1301 = vst.msk [vmem:[#allocation3 + $0x30] sm:$0xff] %vm1294_vm7, %v1238_v4  ;;  %1115 = vrot.lane.b32.xlu0 %v4085_v34, %s3250_s18  ;;  %1109 = vrot.lane.b32.xlu1 %v912_v30, %s3250_s18  ;;  %v777_v30 = vld [vmem:[#allocation2 + $0x91] sm:$0xff]  ;;  %v4159_v4 = vld [vmem:[#allocation2 + $0xa2] sm:$0xff] }
 0x277   :  { %v1380_v36 = vpop.permute.xlu0 %1379  ;;  %v1374_v46 = vpop.permute.xlu1 %1373 }
 0x278   :  { %1442 = vst.msk [vmem:[#allocation3 + $0x38] sm:$0xff] %vm1434_vm8, %v1380_v36  ;;  %1439 = vst.msk [vmem:[#allocation3 + $0x20] sm:$0xff] %vm1434_vm8, %v1374_v46  ;;  %v1196_v46 = vld [vmem:[#allocation2 + $0x93] sm:$0xff] }
 0x279   :  { %1251 = vrot.lane.b32.xlu0 %v1192_v50, %s3251_s19  ;;  %1113 = vrot.lane.b32.xlu1 %v914_v33, %s3250_s18 }
 0x27b   :  { %v1516_v51 = vpop.permute.xlu0 %1515  ;;  %v1378_v52 = vpop.permute.xlu1 %1377 }
 0x27c   :  { %1580 = vst.msk [vmem:[#allocation3 + $0x28] sm:$0xff] %vm1574_vm9, %v1516_v51 }
 0x27d   :  { %1441 = vst.msk [vmem:[#allocation3 + $0x30] sm:$0xff] %vm1434_vm8, %v1378_v52  ;;  %1255 = vrot.lane.b32.xlu0 %v1194_v55, %s3251_s19  ;;  %1249 = vrot.lane.b32.xlu1 %v1191_v60, %s3251_s19  ;;  %v1198_v52 = vld [vmem:[#allocation2 + $0xa3] sm:$0xff]  ;;  %v1195_v55 = vld [vmem:[#allocation2 + $0x8b] sm:$0xff] }
 0x27f   :  { %v1520_v61 = vpop.permute.xlu0 %1519  ;;  %v1514_v21 = vpop.permute.xlu1 %1513 }
 0x280   :  { %1582 = vst.msk [vmem:[#allocation3 + $0x38] sm:$0xff] %vm1574_vm9, %v1520_v61  ;;  %1579 = vst.msk [vmem:[#allocation3 + $0x20] sm:$0xff] %vm1574_vm9, %v1514_v21  ;;  %v1336_v21 = vld [vmem:[#allocation2 + $0x94] sm:$0xff] }
 0x281   :  { %1391 = vrot.lane.b32.xlu0 %v1332_v48, %s3252_s20  ;;  %1253 = vrot.lane.b32.xlu1 %v1193_v14, %s3251_s19 }
 0x283   :  { %v1656_v28 = vpop.permute.xlu0 %1655  ;;  %v1518_v2 = vpop.permute.xlu1 %1517 }
 0x284   :  { %1720 = vst.msk [vmem:[#allocation3 + $0x28] sm:$0xff] %vm1714_vm10, %v1656_v28 }
 0x285   :  { %1581 = vst.msk [vmem:[#allocation3 + $0x30] sm:$0xff] %vm1574_vm9, %v1518_v2  ;;  %1395 = vrot.lane.b32.xlu0 %v1334_v32, %s3252_s20  ;;  %1389 = vrot.lane.b32.xlu1 %v4039_v6, %s3252_s20  ;;  %v1338_v2 = vld [vmem:[#allocation2 + $0xa4] sm:$0xff] }
 0x287   :  { %v1660_v43 = vpop.permute.xlu0 %1659  ;;  %v1654_v12 = vpop.permute.xlu1 %1653 }
 0x288   :  { %1722 = vst.msk [vmem:[#allocation3 + $0x38] sm:$0xff] %vm1714_vm10, %v1660_v43  ;;  %1719 = vst.msk [vmem:[#allocation3 + $0x20] sm:$0xff] %vm1714_vm10, %v1654_v12  ;;  %v1337_v12 = vld [vmem:[#allocation2 + $0x9c] sm:$0xff] }
 0x289   :  { %1531 = vrot.lane.b32.xlu0 %v1333_v59, %s3253_s21  ;;  %1393 = vrot.lane.b32.xlu1 %v1333_v59, %s3252_s20 }
 0x28b   :  { %v1796_v31 = vpop.permute.xlu0 %1795  ;;  %v1658_v45 = vpop.permute.xlu1 %1657 }
 0x28c   :  { %1860 = vst.msk [vmem:[#allocation3 + $0x28] sm:$0xff] %vm1854_vm11, %v1796_v31 }
 0x28d   :  { %1721 = vst.msk [vmem:[#allocation3 + $0x30] sm:$0xff] %vm1714_vm10, %v1658_v45  ;;  %1535 = vrot.lane.b32.xlu0 %v4113_v56, %s3253_s21  ;;  %1529 = vrot.lane.b32.xlu1 %v1332_v48, %s3253_s21  ;;  %v1197_v48 = vld [vmem:[#allocation2 + $0x9b] sm:$0xff]  ;;  %v4187_v45 = vld [vmem:[#allocation2 + $0xac] sm:$0xff] }
 0x28f   :  { %v824_v6 = vpop.permute.xlu0 %823  ;;  %v1794_v35 = vpop.permute.xlu1 %1793 }
 0x290   :  { %884 = vst.msk [vmem:[#allocation3 + $0x48] sm:$0xff] %vm874_vm4, %v824_v6 }
 0x291   :  { %1859 = vst.msk [vmem:[#allocation3 + $0x20] sm:$0xff] %vm1854_vm11, %v1794_v35  ;;  %1671 = vrot.lane.b32.xlu0 %v1612_v26, %s3254_s24  ;;  %1533 = vrot.lane.b32.xlu1 %v1334_v32, %s3253_s21  ;;  %v1616_v35 = vld [vmem:[#allocation2 + $0x9d] sm:$0xff] }
 0x293   :  { %v1800_v49 = vpop.permute.xlu0 %1799  ;;  %v822_v9 = vpop.permute.xlu1 %821  ;;  %v1884_v17 = vld [vmem:[#allocation3 + $0x28] sm:$0xff] }
 0x294   :  { %1862 = vst.msk [vmem:[#allocation3 + $0x38] sm:$0xff] %vm1854_vm11, %v1800_v49 }
 0x295   :  { %883 = vst.msk [vmem:[#allocation3 + $0x40] sm:$0xff] %vm874_vm4, %v822_v9  ;;  %1675 = vrot.lane.b32.xlu0 %v1614_v39, %s3254_s24  ;;  %1669 = vrot.lane.b32.xlu1 %v1611_v11, %s3254_s24  ;;  %v1618_v9 = vld [vmem:[#allocation2 + $0xad] sm:$0xff]  ;;  %v1615_v39 = vld [vmem:[#allocation2 + $0x95] sm:$0xff] }
 0x297   :  { %v828_v40 = vpop.permute.xlu0 %827  ;;  %v1798_v57 = vpop.permute.xlu1 %1797 }
 0x298   :  { %v1883_v63 = vld [vmem:[#allocation3 + $0x20] sm:$0xff]  ;;  %886 = vst.msk [vmem:[#allocation3 + $0x58] sm:$0xff] %vm874_vm4, %v828_v40 }
 0x299   :  { %1861 = vst.msk [vmem:[#allocation3 + $0x30] sm:$0xff] %vm1854_vm11, %v1798_v57  ;;  %v1904_v15 = vpack.c.bf16 %v1884_v17, %v1883_v63  ;;  %1811 = vrot.lane.b32.xlu0 %v1752_v54, %s3255_s29  ;;  %1673 = vrot.lane.b32.xlu1 %v1613_v3, %s3254_s24  ;;  %v1756_v63 = vld [vmem:[#allocation2 + $0x9e] sm:$0xff] }
 0x29a   :  { %v1617_v54 = vld [vmem:[#allocation2 + $0xa5] sm:$0xff] }
 0x29b   :  { %3165 = vmatprep.mubr.msk.bf16.mxu1 %vm1950_vm12, %v1904_v15  ;;  %v964_v5 = vpop.permute.xlu0 %963  ;;  %v826_v62 = vpop.permute.xlu1 %825  ;;  %v1886_v53 = vld [vmem:[#allocation3 + $0x38] sm:$0xff] }
 0x29c   :  { %1024 = vst.msk [vmem:[#allocation3 + $0x48] sm:$0xff] %vm1014_vm5, %v964_v5 }
 0x29d   :  { %885 = vst.msk [vmem:[#allocation3 + $0x50] sm:$0xff] %vm874_vm4, %v826_v62  ;;  %839 = vrot.lane.b32.xlu0 %v776_v20, %s3248_s5  ;;  %1809 = vrot.lane.b32.xlu1 %v1751_v1, %s3255_s29  ;;  %v780_v62 = vld [vmem:[#allocation2 + $0xa9] sm:$0xff]  ;;  %v1755_v20 = vld [vmem:[#allocation2 + $0x96] sm:$0xff] }
 0x29f   :  { %v968_v8 = vpop.permute.xlu0 %967  ;;  %v962_v18 = vpop.permute.xlu1 %961 }
 0x2a0   :  { %v1885_v47 = vld [vmem:[#allocation3 + $0x30] sm:$0xff]  ;;  %1026 = vst.msk [vmem:[#allocation3 + $0x58] sm:$0xff] %vm1014_vm5, %v968_v8  ;;  %1023 = vst.msk [vmem:[#allocation3 + $0x40] sm:$0xff] %vm1014_vm5, %v962_v18 }
 0x2a1   :  { %v1905_v7 = vpack.c.bf16 %v1886_v53, %v1885_v47  ;;  %1815 = vrot.lane.b32.xlu0 %v1754_v37, %s3255_s29  ;;  %837 = vrot.lane.b32.xlu1 %v775_v10, %s3248_s5  ;;  %v1758_v47 = vld [vmem:[#allocation2 + $0xae] sm:$0xff]  ;;  %v779_v37 = vld [vmem:[#allocation2 + $0xa1] sm:$0xff] }
 0x2a3   :  { %3166 = vmatmul.mubr.msk.bf16.gmra.mrb[4].mxu1 %vm1950_vm12, %v1905_v7  ;;  %v1104_v16 = vpop.permute.xlu0 %1103  ;;  %v966_v19 = vpop.permute.xlu1 %965 }
 0x2a4   :  { %1164 = vst.msk [vmem:[#allocation3 + $0x48] sm:$0xff] %vm1154_vm6, %v1104_v16 }
 0x2a5   :  { %1025 = vst.msk [vmem:[#allocation3 + $0x50] sm:$0xff] %vm1014_vm5, %v966_v19  ;;  %843 = vrot.lane.b32.xlu0 %v778_v23, %s3248_s5  ;;  %1813 = vrot.lane.b32.xlu1 %v1753_v24, %s3255_s29  ;;  %v1757_v19 = vld [vmem:[#allocation2 + $0xa6] sm:$0xff] }
 0x2a7   :  { %v1108_v13 = vpop.permute.xlu0 %1107  ;;  %v1102_v22 = vpop.permute.xlu1 %1101 }
 0x2a8   :  { %1166 = vst.msk [vmem:[#allocation3 + $0x58] sm:$0xff] %vm1154_vm6, %v1108_v13  ;;  %1163 = vst.msk [vmem:[#allocation3 + $0x40] sm:$0xff] %vm1154_vm6, %v1102_v22  ;;  %v921_v13 = vld [vmem:[#allocation2 + $0xb2] sm:$0x3] }
 0x2a9   :  { %979 = vrot.lane.b32.xlu0 %v916_v27, %s3249_s6  ;;  %841 = vrot.lane.b32.xlu1 %v777_v30, %s3248_s5  ;;  %v781_v22 = vld [vmem:[#allocation2 + $0xb1] sm:$0x3] }
 0x2ab   :  { %v1244_v0 = vpop.permute.xlu0 %1243  ;;  %v1106_v38 = vpop.permute.xlu1 %1105 }
 0x2ac   :  { %1304 = vst.msk [vmem:[#allocation3 + $0x48] sm:$0xff] %vm1294_vm7, %v1244_v0  ;;  %v1060_v0 = vld [vmem:[#allocation2 + $0xb2] sm:$0xff] }
 0x2ad   :  { %1165 = vst.msk [vmem:[#allocation3 + $0x50] sm:$0xff] %vm1154_vm6, %v1106_v38  ;;  %983 = vrot.lane.b32.xlu0 %v918_v25, %s3249_s6  ;;  %977 = vrot.lane.b32.xlu1 %v4085_v34, %s3249_s6  ;;  %v920_v38 = vld [vmem:[#allocation2 + $0xaa] sm:$0xff] }
 0x2af   :  { %v1248_v33 = vpop.permute.xlu0 %1247  ;;  %v1242_v58 = vpop.permute.xlu1 %1241 }
 0x2b0   :  { %1306 = vst.msk [vmem:[#allocation3 + $0x58] sm:$0xff] %vm1294_vm7, %v1248_v33  ;;  %1303 = vst.msk [vmem:[#allocation3 + $0x40] sm:$0xff] %vm1294_vm7, %v1242_v58  ;;  %v1199_v58 = vld [vmem:[#allocation2 + $0xab] sm:$0xff] }
 0x2b1   :  { %1119 = vrot.lane.b32.xlu0 %v917_v41, %s3250_s18  ;;  %981 = vrot.lane.b32.xlu1 %v917_v41, %s3249_s6 }
 0x2b3   :  { %v1384_v42 = vpop.permute.xlu0 %1383  ;;  %v1246_v44 = vpop.permute.xlu1 %1245 }
 0x2b4   :  { %1444 = vst.msk [vmem:[#allocation3 + $0x48] sm:$0xff] %vm1434_vm8, %v1384_v42 }
 0x2b5   :  { %1305 = vst.msk [vmem:[#allocation3 + $0x50] sm:$0xff] %vm1294_vm7, %v1246_v44  ;;  %1123 = vrot.lane.b32.xlu0 %v4159_v4, %s3250_s18  ;;  %1117 = vrot.lane.b32.xlu1 %v916_v27, %s3250_s18  ;;  %v1201_v44 = vld [vmem:[#allocation2 + $0xbb] sm:$0x3] }
 0x2b7   :  { %v1388_v34 = vpop.permute.xlu0 %1387  ;;  %v1382_v36 = vpop.permute.xlu1 %1381 }
 0x2b8   :  { %1446 = vst.msk [vmem:[#allocation3 + $0x58] sm:$0xff] %vm1434_vm8, %v1388_v34  ;;  %1443 = vst.msk [vmem:[#allocation3 + $0x40] sm:$0xff] %vm1434_vm8, %v1382_v36 }
 0x2b9   :  { %1259 = vrot.lane.b32.xlu0 %v1196_v46, %s3251_s19  ;;  %1121 = vrot.lane.b32.xlu1 %v918_v25, %s3250_s18  ;;  %v1340_v46 = vld [vmem:[#allocation2 + $0xb4] sm:$0xff] }
 0x2bb   :  { %v1524_v50 = vpop.permute.xlu0 %1523  ;;  %v1386_v51 = vpop.permute.xlu1 %1385 }
 0x2bc   :  { %1584 = vst.msk [vmem:[#allocation3 + $0x48] sm:$0xff] %vm1574_vm9, %v1524_v50  ;;  %v1200_v50 = vld [vmem:[#allocation2 + $0xb3] sm:$0xff] }
 0x2bd   :  { %1445 = vst.msk [vmem:[#allocation3 + $0x50] sm:$0xff] %vm1434_vm8, %v1386_v51  ;;  %1263 = vrot.lane.b32.xlu0 %v1198_v52, %s3251_s19  ;;  %1257 = vrot.lane.b32.xlu1 %v1195_v55, %s3251_s19 }
 0x2bf   :  { %v1528_v60 = vpop.permute.xlu0 %1527  ;;  %v1522_v61 = vpop.permute.xlu1 %1521 }
 0x2c0   :  { %1586 = vst.msk [vmem:[#allocation3 + $0x58] sm:$0xff] %vm1574_vm9, %v1528_v60  ;;  %1583 = vst.msk [vmem:[#allocation3 + $0x40] sm:$0xff] %vm1574_vm9, %v1522_v61  ;;  %v1481_v61 = vld [vmem:[#allocation2 + $0xc4] sm:$0x3] }
 0x2c1   :  { %1399 = vrot.lane.b32.xlu0 %v1336_v21, %s3252_s20  ;;  %1261 = vrot.lane.b32.xlu1 %v1197_v48, %s3251_s19 }
 0x2c3   :  { %v1664_v14 = vpop.permute.xlu0 %1663  ;;  %v1526_v28 = vpop.permute.xlu1 %1525 }
 0x2c4   :  { %1724 = vst.msk [vmem:[#allocation3 + $0x48] sm:$0xff] %vm1714_vm10, %v1664_v14 }
 0x2c5   :  { %1585 = vst.msk [vmem:[#allocation3 + $0x50] sm:$0xff] %vm1574_vm9, %v1526_v28  ;;  %1403 = vrot.lane.b32.xlu0 %v1338_v2, %s3252_s20  ;;  %1397 = vrot.lane.b32.xlu1 %v4113_v56, %s3252_s20  ;;  %v1620_v28 = vld [vmem:[#allocation2 + $0xbd] sm:$0xff] }
 0x2c7   :  { %v1668_v32 = vpop.permute.xlu0 %1667  ;;  %v1662_v43 = vpop.permute.xlu1 %1661 }
 0x2c8   :  { %1726 = vst.msk [vmem:[#allocation3 + $0x58] sm:$0xff] %vm1714_vm10, %v1668_v32  ;;  %1723 = vst.msk [vmem:[#allocation3 + $0x40] sm:$0xff] %vm1714_vm10, %v1662_v43 }
 0x2c9   :  { %1539 = vrot.lane.b32.xlu0 %v1337_v12, %s3253_s21  ;;  %1401 = vrot.lane.b32.xlu1 %v1337_v12, %s3252_s20  ;;  %v1759_v12 = vld [vmem:[#allocation2 + $0xb6] sm:$0xff] }
 0x2cb   :  { %v1804_v59 = vpop.permute.xlu0 %1803  ;;  %v1666_v31 = vpop.permute.xlu1 %1665 }
 0x2cc   :  { %1864 = vst.msk [vmem:[#allocation3 + $0x48] sm:$0xff] %vm1854_vm11, %v1804_v59  ;;  %v1619_v59 = vld [vmem:[#allocation2 + $0xb5] sm:$0xff] }
 0x2cd   :  { %1725 = vst.msk [vmem:[#allocation3 + $0x50] sm:$0xff] %vm1714_vm10, %v1666_v31  ;;  %1543 = vrot.lane.b32.xlu0 %v4187_v45, %s3253_s21  ;;  %1537 = vrot.lane.b32.xlu1 %v1336_v21, %s3253_s21  ;;  %v1341_v21 = vld [vmem:[#allocation2 + $0xbc] sm:$0x3] }
 0x2cf   :  { %v832_v56 = vpop.permute.xlu0 %831  ;;  %v1802_v6 = vpop.permute.xlu1 %1801 }
 0x2d0   :  { %888 = vst.msk [vmem:[#allocation3 + $0x68] sm:$0xff] %vm874_vm4, %v832_v56  ;;  %v1761_v56 = vld [vmem:[#allocation2 + $0xc6] sm:$0x3] }
 0x2d1   :  { %1863 = vst.msk [vmem:[#allocation3 + $0x40] sm:$0xff] %vm1854_vm11, %v1802_v6  ;;  %1679 = vrot.lane.b32.xlu0 %v1616_v35, %s3254_s24  ;;  %1541 = vrot.lane.b32.xlu1 %v1338_v2, %s3253_s21  ;;  %v1480_v2 = vld [vmem:[#allocation2 + $0xbc] sm:$0xff]  ;;  %v1621_v6 = vld [vmem:[#allocation2 + $0xc5] sm:$0x3]  ;;  %v2120_v35 = vld [vmem:[%s5067_s1 + $0x13] sm:$0xff] }
 0x2d3   :  { %v1808_v26 = vpop.permute.xlu0 %1807  ;;  %v830_v49 = vpop.permute.xlu1 %829  ;;  %v1888_v11 = vld [vmem:[#allocation3 + $0x48] sm:$0xff] }
 0x2d4   :  { %1866 = vst.msk [vmem:[#allocation3 + $0x58] sm:$0xff] %vm1854_vm11, %v1808_v26 }
 0x2d5   :  { %887 = vst.msk [vmem:[#allocation3 + $0x60] sm:$0xff] %vm874_vm4, %v830_v49  ;;  %1683 = vrot.lane.b32.xlu0 %v1618_v9, %s3254_s24  ;;  %1677 = vrot.lane.b32.xlu1 %v1615_v39, %s3254_s24  ;;  %v1760_v9 = vld [vmem:[#allocation2 + $0xbe] sm:$0xff] }
 0x2d6   :  { %v2122_v39 = vld [vmem:[%s5067_s1 + $0x23] sm:$0xff] }
 0x2d7   :  { %v836_v17 = vpop.permute.xlu0 %835  ;;  %v1806_v40 = vpop.permute.xlu1 %1805 }
 0x2d8   :  { %v1887_v57 = vld [vmem:[#allocation3 + $0x40] sm:$0xff]  ;;  %890 = vst.msk [vmem:[#allocation3 + $0x78] sm:$0xff] %vm874_vm4, %v836_v17 }
 0x2d9   :  { %1865 = vst.msk [vmem:[#allocation3 + $0x50] sm:$0xff] %vm1854_vm11, %v1806_v40  ;;  %v1906_v3 = vpack.c.bf16 %v1888_v11, %v1887_v57  ;;  %1819 = vrot.lane.b32.xlu0 %v1756_v63, %s3255_s29  ;;  %1681 = vrot.lane.b32.xlu1 %v1617_v54, %s3254_s24  ;;  %v2119_v11 = vld [vmem:[%s5067_s1 + $0xb] sm:$0xff]  ;;  %v2124_v63 = vld [vmem:[%s5067_s1 + $0x33] sm:$0xff] }
 0x2da   :  { %v2121_v54 = vld [vmem:[%s5067_s1 + $0x1b] sm:$0xff] }
 0x2db   :  { %3169 = vmatprep.mubr.msk.bf16.mxu1 %vm1950_vm12, %v1906_v3  ;;  %v972_v15 = vpop.permute.xlu0 %971  ;;  %v834_v5 = vpop.permute.xlu1 %833  ;;  %v1890_v1 = vld [vmem:[#allocation3 + $0x58] sm:$0xff] }
 0x2dc   :  { %1028 = vst.msk [vmem:[#allocation3 + $0x68] sm:$0xff] %vm1014_vm5, %v972_v15 }
 0x2dd   :  { %889 = vst.msk [vmem:[#allocation3 + $0x70] sm:$0xff] %vm874_vm4, %v834_v5  ;;  %847 = vrot.lane.b32.xlu0 %v780_v62, %s3248_s5  ;;  %1817 = vrot.lane.b32.xlu1 %v1755_v20, %s3255_s29  ;;  %v2126_v20 = vld [vmem:[%s5067_s1 + $0x43] sm:$0xff] }
 0x2df   :  { %v976_v53 = vpop.permute.xlu0 %975  ;;  %v970_v8 = vpop.permute.xlu1 %969 }
 0x2e0   :  { %v1889_v18 = vld [vmem:[#allocation3 + $0x50] sm:$0xff]  ;;  %1030 = vst.msk [vmem:[#allocation3 + $0x78] sm:$0xff] %vm1014_vm5, %v976_v53  ;;  %1027 = vst.msk [vmem:[#allocation3 + $0x60] sm:$0xff] %vm1014_vm5, %v970_v8 }
 0x2e1   :  { %v1907_v10 = vpack.c.bf16 %v1890_v1, %v1889_v18  ;;  %1823 = vrot.lane.b32.xlu0 %v1758_v47, %s3255_s29  ;;  %845 = vrot.lane.b32.xlu1 %v779_v37, %s3248_s5  ;;  %v2123_v1 = vld [vmem:[%s5067_s1 + $0x2b] sm:$0xff]  ;;  %v2128_v47 = vld [vmem:[%s5067_s1 + $0x53] sm:$0xff] }
 0x2e2   :  { %v2125_v37 = vld [vmem:[%s5067_s1 + $0x3b] sm:$0xff] }
 0x2e3   :  { %3170 = vmatmul.mubr.msk.bf16.gmra.mrb[8].mxu1 %vm1950_vm12, %v1907_v10  ;;  %v1112_v7 = vpop.permute.xlu0 %1111  ;;  %v974_v16 = vpop.permute.xlu1 %973 }
 0x2e4   :  { %1168 = vst.msk [vmem:[#allocation3 + $0x68] sm:$0xff] %vm1154_vm6, %v1112_v7 }
 0x2e5   :  { %1029 = vst.msk [vmem:[#allocation3 + $0x70] sm:$0xff] %vm1014_vm5, %v974_v16  ;;  %985 = vrot.lane.b32.xlu0 %v4159_v4, %s3249_s6  ;;  %1821 = vrot.lane.b32.xlu1 %v1757_v19, %s3255_s29  ;;  %v1061_v4 = vld [vmem:[#allocation2 + $0xba] sm:$0x3] }
 0x2e7   :  { %v1116_v23 = vpop.permute.xlu0 %1115  ;;  %v1110_v24 = vpop.permute.xlu1 %1109 }
 0x2e8   :  { %1170 = vst.msk [vmem:[#allocation3 + $0x78] sm:$0xff] %vm1154_vm6, %v1116_v23  ;;  %1167 = vst.msk [vmem:[#allocation3 + $0x60] sm:$0xff] %vm1154_vm6, %v1110_v24  ;;  %v2130_v23 = vld [vmem:[%s5067_s1 + $0x63] sm:$0xff]  ;;  %v2127_v24 = vld [vmem:[%s5067_s1 + $0x4b] sm:$0xff] }
 0x2e9   :  { %989 = vrot.lane.b32.xlu0 %v921_v13, %s3249_s6  ;;  %849 = vrot.lane.b32.xlu1 %v781_v22, %s3248_s5 }
 0x2eb   :  { %v1252_v27 = vpop.permute.xlu0 %1251  ;;  %v1114_v30 = vpop.permute.xlu1 %1113 }
 0x2ec   :  { %1308 = vst.msk [vmem:[#allocation3 + $0x68] sm:$0xff] %vm1294_vm7, %v1252_v27  ;;  %v2132_v27 = vld [vmem:[%s5067_s1 + $0x73] sm:$0xff] }
 0x2ed   :  { %1169 = vst.msk [vmem:[#allocation3 + $0x70] sm:$0xff] %vm1154_vm6, %v1114_v30  ;;  %1127 = vrot.lane.b32.xlu0 %v1060_v0, %s3250_s18  ;;  %987 = vrot.lane.b32.xlu1 %v920_v38, %s3249_s6  ;;  %v2129_v30 = vld [vmem:[%s5067_s1 + $0x5b] sm:$0xff] }
 0x2ef   :  { %v1256_v25 = vpop.permute.xlu0 %1255  ;;  %v1250_v33 = vpop.permute.xlu1 %1249 }
 0x2f0   :  { %1310 = vst.msk [vmem:[#allocation3 + $0x78] sm:$0xff] %vm1294_vm7, %v1256_v25  ;;  %1307 = vst.msk [vmem:[#allocation3 + $0x60] sm:$0xff] %vm1294_vm7, %v1250_v33  ;;  %v2134_v25 = vld [vmem:[%s5067_s1 + $0x83] sm:$0xff]  ;;  %v2131_v33 = vld [vmem:[%s5067_s1 + $0x6b] sm:$0xff] }
 0x2f1   :  { %1265 = vrot.lane.b32.xlu0 %v1199_v58, %s3251_s19  ;;  %1125 = vrot.lane.b32.xlu1 %v920_v38, %s3250_s18 }
 0x2f3   :  { %v1392_v41 = vpop.permute.xlu0 %1391  ;;  %v1254_v42 = vpop.permute.xlu1 %1253 }
 0x2f4   :  { %1448 = vst.msk [vmem:[#allocation3 + $0x68] sm:$0xff] %vm1434_vm8, %v1392_v41 }
 0x2f5   :  { %1309 = vst.msk [vmem:[#allocation3 + $0x70] sm:$0xff] %vm1294_vm7, %v1254_v42  ;;  %1269 = vrot.lane.b32.xlu0 %v1201_v44, %s3251_s19  ;;  %1129 = vrot.lane.b32.xlu1 %v1061_v4, %s3250_s18  ;;  %v2136_v42 = vld [vmem:[%s5067_s1 + $0x93] sm:$0xff]  ;;  %v2133_v44 = vld [vmem:[%s5067_s1 + $0x7b] sm:$0xff] }
 0x2f7   :  { %v1396_v34 = vpop.permute.xlu0 %1395  ;;  %v1390_v36 = vpop.permute.xlu1 %1389 }
 0x2f8   :  { %1450 = vst.msk [vmem:[#allocation3 + $0x78] sm:$0xff] %vm1434_vm8, %v1396_v34  ;;  %1447 = vst.msk [vmem:[#allocation3 + $0x60] sm:$0xff] %vm1434_vm8, %v1390_v36  ;;  %v2138_v36 = vld [vmem:[%s5067_s1 + $0xa3] sm:$0xff] }
 0x2f9   :  { %1407 = vrot.lane.b32.xlu0 %v1340_v46, %s3252_s20  ;;  %1267 = vrot.lane.b32.xlu1 %v1200_v50, %s3251_s19 }
 0x2fb   :  { %v1532_v51 = vpop.permute.xlu0 %1531  ;;  %v1394_v52 = vpop.permute.xlu1 %1393 }
 0x2fc   :  { %1588 = vst.msk [vmem:[#allocation3 + $0x68] sm:$0xff] %vm1574_vm9, %v1532_v51 }
 0x2fd   :  { %1449 = vst.msk [vmem:[#allocation3 + $0x70] sm:$0xff] %vm1434_vm8, %v1394_v52  ;;  %1545 = vrot.lane.b32.xlu0 %v1340_v46, %s3253_s21  ;;  %1405 = vrot.lane.b32.xlu1 %v4187_v45, %s3252_s20  ;;  %v2135_v46 = vld [vmem:[%s5067_s1 + $0x8b] sm:$0xff] }
 0x2ff   :  { %v1536_v55 = vpop.permute.xlu0 %1535  ;;  %v1530_v60 = vpop.permute.xlu1 %1529 }
 0x300   :  { %1590 = vst.msk [vmem:[#allocation3 + $0x78] sm:$0xff] %vm1574_vm9, %v1536_v55  ;;  %1587 = vst.msk [vmem:[#allocation3 + $0x60] sm:$0xff] %vm1574_vm9, %v1530_v60  ;;  %v2140_v55 = vld [vmem:[%s5067_s1 + $0xb3] sm:$0xff] }
 0x301   :  { %1549 = vrot.lane.b32.xlu0 %v1481_v61, %s3253_s21  ;;  %1409 = vrot.lane.b32.xlu1 %v1341_v21, %s3252_s20  ;;  %v2137_v61 = vld [vmem:[%s5067_s1 + $0x9b] sm:$0xff] }
 0x303   :  { %v1672_v48 = vpop.permute.xlu0 %1671  ;;  %v1534_v14 = vpop.permute.xlu1 %1533 }
 0x304   :  { %1728 = vst.msk [vmem:[#allocation3 + $0x68] sm:$0xff] %vm1714_vm10, %v1672_v48 }
 0x305   :  { %1589 = vst.msk [vmem:[#allocation3 + $0x70] sm:$0xff] %vm1574_vm9, %v1534_v14  ;;  %1687 = vrot.lane.b32.xlu0 %v1620_v28, %s3254_s24  ;;  %1547 = vrot.lane.b32.xlu1 %v1480_v2, %s3253_s21  ;;  %v2139_v2 = vld [vmem:[%s5067_s1 + $0xab] sm:$0xff] }
 0x307   :  { %v1676_v32 = vpop.permute.xlu0 %1675  ;;  %v1670_v43 = vpop.permute.xlu1 %1669 }
 0x308   :  { %1730 = vst.msk [vmem:[#allocation3 + $0x78] sm:$0xff] %vm1714_vm10, %v1676_v32  ;;  %1727 = vst.msk [vmem:[#allocation3 + $0x60] sm:$0xff] %vm1714_vm10, %v1670_v43 }
 0x309   :  { %1825 = vrot.lane.b32.xlu0 %v1759_v12, %s3255_s29  ;;  %1685 = vrot.lane.b32.xlu1 %v1619_v59, %s3254_s24  ;;  %v2141_v12 = vld [vmem:[%s5067_s1 + $0xbb] sm:$0x3] }
 0x30b   :  { %v1812_v31 = vpop.permute.xlu0 %1811  ;;  %v1674_v45 = vpop.permute.xlu1 %1673 }
 0x30c   :  { %1868 = vst.msk [vmem:[#allocation3 + $0x68] sm:$0xff] %vm1854_vm11, %v1812_v31 }
 0x30d   :  { %1729 = vst.msk [vmem:[#allocation3 + $0x70] sm:$0xff] %vm1714_vm10, %v1674_v45  ;;  %1829 = vrot.lane.b32.xlu0 %v1761_v56, %s3255_s29  ;;  %1689 = vrot.lane.b32.xlu1 %v1621_v6, %s3254_s24 }
 0x30f   :  { %v840_v26 = vpop.permute.xlu0 %839  ;;  %v1810_v49 = vpop.permute.xlu1 %1809 }
 0x310   :  { %892 = vst.msk [vmem:[#allocation3 + $0x88] sm:$0xff] %vm874_vm4, %v840_v26 }
 0x311   :  { %1867 = vst.msk [vmem:[#allocation3 + $0x60] sm:$0xff] %vm1854_vm11, %v1810_v49  ;;  %2149 = vperm.xlu0 %3224, %v2120_v35   ;;  %1827 = vrot.lane.b32.xlu1 %v1760_v9, %s3255_s29 }
 0x313   :  { %v1816_v17 = vpop.permute.xlu0 %1815  ;;  %v838_v40 = vpop.permute.xlu1 %837  ;;  %v1892_v57 = vld [vmem:[#allocation3 + $0x68] sm:$0xff] }
 0x314   :  { %1870 = vst.msk [vmem:[#allocation3 + $0x78] sm:$0xff] %vm1854_vm11, %v1816_v17 }
 0x315   :  { %891 = vst.msk [vmem:[#allocation3 + $0x80] sm:$0xff] %vm874_vm4, %v838_v40  ;;  %2159 = vperm.xlu0 %3224, %v2122_v39   ;;  %2144 = vperm.xlu1 %3225, %v2119_v11  }
 0x317   :  { %v844_v3 = vpop.permute.xlu0 %843  ;;  %v1814_v15 = vpop.permute.xlu1 %1813 }
 0x318   :  { %v1891_v5 = vld [vmem:[#allocation3 + $0x60] sm:$0xff]  ;;  %894 = vst.msk [vmem:[#allocation3 + $0x98] sm:$0xff] %vm874_vm4, %v844_v3 }
 0x319   :  { %1869 = vst.msk [vmem:[#allocation3 + $0x70] sm:$0xff] %vm1854_vm11, %v1814_v15  ;;  %v1908_v62 = vpack.c.bf16 %v1892_v57, %v1891_v5  ;;  %2169 = vperm.xlu0 %3224, %v2124_v63   ;;  %2154 = vperm.xlu1 %3225, %v2121_v54  }
 0x31b   :  { %3173 = vmatprep.mubr.msk.bf16.mxu1 %vm1950_vm12, %v1908_v62  ;;  %v980_v53 = vpop.permute.xlu0 %979  ;;  %v842_v8 = vpop.permute.xlu1 %841  ;;  %v1894_v18 = vld [vmem:[#allocation3 + $0x78] sm:$0xff] }
 0x31c   :  { %1032 = vst.msk [vmem:[#allocation3 + $0x88] sm:$0xff] %vm1014_vm5, %v980_v53 }
 0x31d   :  { %893 = vst.msk [vmem:[#allocation3 + $0x90] sm:$0xff] %vm874_vm4, %v842_v8  ;;  %2179 = vperm.xlu0 %3224, %v2126_v20   ;;  %2164 = vperm.xlu1 %3225, %v2123_v1  }
 0x31f   :  { %v984_v10 = vpop.permute.xlu0 %983  ;;  %v978_v7 = vpop.permute.xlu1 %977 }
 0x320   :  { %v1893_v16 = vld [vmem:[#allocation3 + $0x70] sm:$0xff]  ;;  %1034 = vst.msk [vmem:[#allocation3 + $0x98] sm:$0xff] %vm1014_vm5, %v984_v10  ;;  %1031 = vst.msk [vmem:[#allocation3 + $0x80] sm:$0xff] %vm1014_vm5, %v978_v7 }
 0x321   :  { %v1909_v19 = vpack.c.bf16 %v1894_v18, %v1893_v16  ;;  %2189 = vperm.xlu0 %3224, %v2128_v47   ;;  %2174 = vperm.xlu1 %3225, %v2125_v37  }
 0x323   :  { %3174 = vmatmul.mubr.msk.bf16.gmra.mrb[12].mxu1 %vm1950_vm12, %v1909_v19  ;;  %v1120_v13 = vpop.permute.xlu0 %1119  ;;  %v982_v22 = vpop.permute.xlu1 %981 }
 0x324   :  { %1172 = vst.msk [vmem:[#allocation3 + $0x88] sm:$0xff] %vm1154_vm6, %v1120_v13 }
 0x325   :  { %1033 = vst.msk [vmem:[#allocation3 + $0x90] sm:$0xff] %vm1014_vm5, %v982_v22  ;;  %2199 = vperm.xlu0 %3224, %v2130_v23   ;;  %2184 = vperm.xlu1 %3225, %v2127_v24  }
 0x327   :  { %v1124_v0 = vpop.permute.xlu0 %1123  ;;  %v1118_v38 = vpop.permute.xlu1 %1117 }
 0x328   :  { %1174 = vst.msk [vmem:[#allocation3 + $0x98] sm:$0xff] %vm1154_vm6, %v1124_v0  ;;  %1171 = vst.msk [vmem:[#allocation3 + $0x80] sm:$0xff] %vm1154_vm6, %v1118_v38 }
 0x329   :  { %2209 = vperm.xlu0 %3224, %v2132_v27   ;;  %2194 = vperm.xlu1 %3225, %v2129_v30  }
 0x32b   :  { %v1260_v58 = vpop.permute.xlu0 %1259  ;;  %v1122_v41 = vpop.permute.xlu1 %1121 }
 0x32c   :  { %1312 = vst.msk [vmem:[#allocation3 + $0x88] sm:$0xff] %vm1294_vm7, %v1260_v58 }
 0x32d   :  { %1173 = vst.msk [vmem:[#allocation3 + $0x90] sm:$0xff] %vm1154_vm6, %v1122_v41  ;;  %2219 = vperm.xlu0 %3224, %v2134_v25   ;;  %2204 = vperm.xlu1 %3225, %v2131_v33  }
 0x32f   :  { %v1264_v4 = vpop.permute.xlu0 %1263  ;;  %v1258_v34 = vpop.permute.xlu1 %1257 }
 0x330   :  { %1314 = vst.msk [vmem:[#allocation3 + $0x98] sm:$0xff] %vm1294_vm7, %v1264_v4  ;;  %1311 = vst.msk [vmem:[#allocation3 + $0x80] sm:$0xff] %vm1294_vm7, %v1258_v34 }
 0x331   :  { %2229 = vperm.xlu0 %3224, %v2136_v42   ;;  %2214 = vperm.xlu1 %3225, %v2133_v44  }
 0x333   :  { %v1400_v50 = vpop.permute.xlu0 %1399  ;;  %v1262_v51 = vpop.permute.xlu1 %1261 }
 0x334   :  { %1452 = vst.msk [vmem:[#allocation3 + $0x88] sm:$0xff] %vm1434_vm8, %v1400_v50 }
 0x335   :  { %1313 = vst.msk [vmem:[#allocation3 + $0x90] sm:$0xff] %vm1294_vm7, %v1262_v51  ;;  %2239 = vperm.xlu0 %3224, %v2138_v36   ;;  %2224 = vperm.xlu1 %3225, %v2135_v46  }
 0x336   :  { %v4341_v52 = vpop.f32.mrb[0].mxu1 }
 0x337   :  { %v4346_v60 = vpop.f32.mrb[1].mxu1  ;;  %v1404_v21 = vpop.permute.xlu0 %1403 }
 0x338   :  { %v1398_v48 = vpop.permute.xlu1 %1397  ;;  %v4351_v14 = vpop.f32.mrb[2].mxu1  ;;  %1454 = vst.msk [vmem:[#allocation3 + $0x98] sm:$0xff] %vm1434_vm8, %v1404_v21 }
 0x339   :  { %1451 = vst.msk [vmem:[#allocation3 + $0x80] sm:$0xff] %vm1434_vm8, %v1398_v48  ;;  %v4355_v28 = vpop.f32.mrb[3].mxu1  ;;  %2249 = vperm.xlu0 %3224, %v2140_v55   ;;  %2234 = vperm.xlu1 %3225, %v2137_v61   ;;  %v2331_v48 = vmul.f32 %v4346_v60, %v4346_v60 }
 0x33a   :  { %v2332_v51 = vmul.f32 %v4355_v28, %v4355_v28 }
 0x33b   :  { %v1540_v32 = vpop.permute.xlu0 %1539 }
 0x33c   :  { %v1402_v43 = vpop.permute.xlu1 %1401  ;;  %1592 = vst.msk [vmem:[#allocation3 + $0x88] sm:$0xff] %vm1574_vm9, %v1540_v32 }
 0x33d   :  { %1453 = vst.msk [vmem:[#allocation3 + $0x90] sm:$0xff] %vm1434_vm8, %v1402_v43  ;;  %2244 = vperm.xlu1 %3225, %v2139_v2  }
 0x33f   :  { %v1544_v59 = vpop.permute.xlu0 %1543 }
 0x340   :  { %v1538_v31 = vpop.permute.xlu1 %1537  ;;  %1594 = vst.msk [vmem:[#allocation3 + $0x98] sm:$0xff] %vm1574_vm9, %v1544_v59 }
 0x341   :  { %1591 = vst.msk [vmem:[#allocation3 + $0x80] sm:$0xff] %vm1574_vm9, %v1538_v31  ;;  %2254 = vperm.xlu1 %3225, %v2141_v12  }
 0x343   :  { %v1680_v45 = vpop.permute.xlu0 %1679 }
 0x344   :  { %v1542_v56 = vpop.permute.xlu1 %1541  ;;  %1732 = vst.msk [vmem:[#allocation3 + $0x88] sm:$0xff] %vm1714_vm10, %v1680_v45  ;;  %v2333_v45 = vmul.f32 %v4341_v52, %v4341_v52 }
 0x345   :  { %1593 = vst.msk [vmem:[#allocation3 + $0x90] sm:$0xff] %vm1574_vm9, %v1542_v56  ;;  %v2334_v56 = vmul.f32 %v4351_v14, %v4351_v14 }
 0x347   :  { %v1684_v6 = vpop.permute.xlu0 %1683 }
 0x348   :  { %v1678_v35 = vpop.permute.xlu1 %1677  ;;  %1734 = vst.msk [vmem:[#allocation3 + $0x98] sm:$0xff] %vm1714_vm10, %v1684_v6 }
 0x349   :  { %1731 = vst.msk [vmem:[#allocation3 + $0x80] sm:$0xff] %vm1714_vm10, %v1678_v35 }
 0x34b   :  { %v1820_v26 = vpop.permute.xlu0 %1819 }
 0x34c   :  { %v1682_v49 = vpop.permute.xlu1 %1681  ;;  %1872 = vst.msk [vmem:[#allocation3 + $0x88] sm:$0xff] %vm1854_vm11, %v1820_v26 }
 0x34d   :  { %1733 = vst.msk [vmem:[#allocation3 + $0x90] sm:$0xff] %vm1714_vm10, %v1682_v49 }
 0x34f   :  { %v848_v9 = vpop.permute.xlu0 %847 }
 0x350   :  { %v1818_v39 = vpop.permute.xlu1 %1817  ;;  %896 = vst.msk [vmem:[#allocation3 + $0xa8] sm:$0xff] %vm874_vm4, %v848_v9 }
 0x351   :  { %1871 = vst.msk [vmem:[#allocation3 + $0x80] sm:$0xff] %vm1854_vm11, %v1818_v39 }
 0x353   :  { %v1824_v11 = vpop.permute.xlu0 %1823  ;;  %v1896_v40 = vld [vmem:[#allocation3 + $0x88] sm:$0xff] }
 0x354   :  { %v846_v17 = vpop.permute.xlu1 %845  ;;  %1874 = vst.msk [vmem:[#allocation3 + $0x98] sm:$0xff] %vm1854_vm11, %v1824_v11 }
 0x355   :  { %895 = vst.msk [vmem:[#allocation3 + $0xa0] sm:$0xff] %vm874_vm4, %v846_v17  ;;  %vm1457_vm4 = vcmask 386368  }
 0x357   :  { %v986_v57 = vpop.permute.xlu0 %985 }
 0x358   :  { %v1822_v63 = vpop.permute.xlu1 %1821  ;;  %v1895_v54 = vld [vmem:[#allocation3 + $0x80] sm:$0xff]  ;;  %1035 = vst.msk [vmem:[#allocation3 + $0xa0] sm:$0xff] %vm1014_vm5, %v986_v57 }
 0x359   :  { %1873 = vst.msk [vmem:[#allocation3 + $0x90] sm:$0xff] %vm1854_vm11, %v1822_v63  ;;  %v1910_v3 = vpack.c.bf16 %v1896_v40, %v1895_v54 }
 0x35b   :  { %3177 = vmatprep.mubr.msk.bf16.mxu1 %vm1950_vm12, %v1910_v3  ;;  %v990_v15 = vpop.permute.xlu0 %989  ;;  %v1898_v62 = vld [vmem:[#allocation3 + $0x98] sm:$0xff] }
 0x35c   :  { %v850_v5 = vpop.permute.xlu1 %849 }
 0x35d   :  { %898 = vst.msk [vmem:[#allocation3 + $0xb0] sm:$0x3] %vm897_vm13, %v850_v5 }
 0x35e   :  { %1038 = vst.msk [vmem:[#allocation3 + $0xb0] sm:$0x3] %vm1037_vm14, %v990_v15 }
 0x35f   :  { %v1128_v20 = vpop.permute.xlu0 %1127 }
 0x360   :  { %v988_v1 = vpop.permute.xlu1 %987  ;;  %v1897_v53 = vld [vmem:[#allocation3 + $0x90] sm:$0xff] }
 0x361   :  { %1036 = vst.msk [vmem:[#allocation3 + $0xa8] sm:$0xff] %vm1014_vm5, %v988_v1  ;;  %v1911_v8 = vpack.c.bf16 %v1898_v62, %v1897_v53  ;;  %vm1597_vm5 = vcmask 451968  }
 0x362   :  { %1176 = vst.msk [vmem:[#allocation3 + $0xa8] sm:$0xff] %vm1154_vm6, %v1128_v20 }
 0x363   :  { %3178 = vmatmul.mubr.msk.bf16.gmra.mrb[16].mxu1 %vm1950_vm12, %v1911_v8  ;;  %v1266_v18 = vpop.permute.xlu0 %1265 }
 0x364   :  { %v1126_v47 = vpop.permute.xlu1 %1125 }
 0x365   :  { %1175 = vst.msk [vmem:[#allocation3 + $0xa0] sm:$0xff] %vm1154_vm6, %v1126_v47  ;;  %vm1737_vm6 = vcmask 517568  }
 0x366   :  { %1315 = vst.msk [vmem:[#allocation3 + $0xa0] sm:$0xff] %vm1294_vm7, %v1266_v18 }
 0x367   :  { %v1270_v37 = vpop.permute.xlu0 %1269 }
 0x368   :  { %v1130_v10 = vpop.permute.xlu1 %1129 }
 0x369   :  { %1178 = vst.msk [vmem:[#allocation3 + $0xb0] sm:$0x3] %vm1177_vm15, %v1130_v10 }
 0x36a   :  { %1318 = vst.msk [vmem:[#allocation3 + $0xb0] sm:$0x3] %vm1317_vm0, %v1270_v37 }
 0x36b   :  { %v1408_v7 = vpop.permute.xlu0 %1407 }
 0x36c   :  { %v1268_v16 = vpop.permute.xlu1 %1267 }
 0x36d   :  { %1316 = vst.msk [vmem:[#allocation3 + $0xa8] sm:$0xff] %vm1294_vm7, %v1268_v16  ;;  %vm1877_vm7 = vcmask 583168  }
 0x36e   :  { %1456 = vst.msk [vmem:[#allocation3 + $0xa8] sm:$0xff] %vm1434_vm8, %v1408_v7 }
 0x36f   :  { %v1546_v19 = vpop.permute.xlu0 %1545 }
 0x370   :  { %v1406_v23 = vpop.permute.xlu1 %1405 }
 0x371   :  { %1455 = vst.msk [vmem:[#allocation3 + $0xa0] sm:$0xff] %vm1434_vm8, %v1406_v23 }
 0x372   :  { %1595 = vst.msk [vmem:[#allocation3 + $0xa0] sm:$0xff] %vm1574_vm9, %v1546_v19 }
 0x373   :  { %v1550_v24 = vpop.permute.xlu0 %1549 }
 0x374   :  { %v1410_v13 = vpop.permute.xlu1 %1409 }
 0x375   :  { %1458 = vst.msk [vmem:[#allocation3 + $0xb0] sm:$0x3] %vm1457_vm4, %v1410_v13 }
 0x376   :  { %v4389_v22 = vpop.f32.mrb[4].mxu1  ;;  %1598 = vst.msk [vmem:[#allocation3 + $0xb0] sm:$0x3] %vm1597_vm5, %v1550_v24 }
 0x377   :  { %v4391_v27 = vpop.f32.mrb[5].mxu1  ;;  %v1688_v30 = vpop.permute.xlu0 %1687  ;;  %v2337_v19 = vmul.f32 %v4389_v22, %v4389_v22 }
 0x378   :  { %v1548_v0 = vpop.permute.xlu1 %1547  ;;  %v4393_v38 = vpop.f32.mrb[6].mxu1  ;;  %v2335_v54 = vmul.f32 %v4391_v27, %v4391_v27 }
 0x379   :  { %1596 = vst.msk [vmem:[#allocation3 + $0xa8] sm:$0xff] %vm1574_vm9, %v1548_v0  ;;  %v4396_v25 = vpop.f32.mrb[7].mxu1  ;;  %v2338_v23 = vmul.f32 %v4393_v38, %v4393_v38 }
 0x37a   :  { %1736 = vst.msk [vmem:[#allocation3 + $0xa8] sm:$0xff] %vm1714_vm10, %v1688_v30  ;;  %v2336_v63 = vmul.f32 %v4396_v25, %v4396_v25 }
 0x37b   :  { %v1826_v33 = vpop.permute.xlu0 %1825 }
 0x37c   :  { %v1686_v58 = vpop.permute.xlu1 %1685 }
 0x37d   :  { %1735 = vst.msk [vmem:[#allocation3 + $0xa0] sm:$0xff] %vm1714_vm10, %v1686_v58 }
 0x37e   :  { %1875 = vst.msk [vmem:[#allocation3 + $0xa0] sm:$0xff] %vm1854_vm11, %v1826_v33 }
 0x37f   :  { %v1830_v41 = vpop.permute.xlu0 %1829 }
 0x380   :  { %v1690_v42 = vpop.permute.xlu1 %1689 }
 0x381   :  { %1738 = vst.msk [vmem:[#allocation3 + $0xb0] sm:$0x3] %vm1737_vm6, %v1690_v42 }
 0x382   :  { %1878 = vst.msk [vmem:[#allocation3 + $0xb0] sm:$0x3] %vm1877_vm7, %v1830_v41 }
 0x384   :  { %v1828_v44 = vpop.permute.xlu1 %1827 }
 0x385   :  { %1876 = vst.msk [vmem:[#allocation3 + $0xa8] sm:$0xff] %vm1854_vm11, %v1828_v44  ;;  %v1899_v34 = vld [vmem:[#allocation3 + $0xa0] sm:$0xff] }
 0x389   :  { %v1901_v4 = vld [vmem:[#allocation3 + $0xb0] sm:$0x3] }
 0x38a   :  { %v1913_v46 = vpack.c.bf16 %v1901_v4, %v1901_v4 }
 0x38c   :  { %v1900_v36 = vld [vmem:[#allocation3 + $0xa8] sm:$0xff] }
 0x38d   :  { %v1912_v50 = vpack.c.bf16 %v1900_v36, %v1899_v34 }
 0x38f   :  { %3181 = vmatprep.mubr.msk.bf16.mxu1 %vm1950_vm12, %v1912_v50 }
 0x390   :  { %3182 = vmatmul.mubr.msk.bf16.gmra.mrb[20].mxu1 %vm1950_vm12, %v1913_v46  ;;  %v4406_v55 = vpop.permute.xlu0 %2149 }
 0x391   :  { %v2258_v61 = vmul.f32 %v4406_v55, %v4355_v28  ;;  %v2355_v21 = vmul.f32 %v2332_v51, %v4406_v55 }
 0x393   :  { %v2281_v43 = vsel %vm302_vm1, %v2258_v61, 0.0  ;;  %v2378_v12 = vsel %vm302_vm1, %v2355_v21, 0.0 }
 0x394   :  { %v4413_v2 = vpop.permute.xlu0 %2159  ;;  %v4415_v32 = vpop.permute.xlu1 %2144 }
 0x395   :  { %v2257_v59 = vmul.f32 %v4415_v32, %v4346_v60  ;;  %v2354_v31 = vmul.f32 %v2331_v48, %v4415_v32  ;;  %v2260_v11 = vmul.f32 %v4351_v14, %v4413_v2  ;;  %v2357_v17 = vmul.f32 %v2334_v56, %v4413_v2 }
 0x397   :  { %v2280_v6 = vsel %vm302_vm1, %v2257_v59, 0.0  ;;  %v2377_v35 = vsel %vm302_vm1, %v2354_v31, 0.0  ;;  %v2285_v8 = vsel %vm302_vm1, %v2260_v11, 0.0  ;;  %v2382_v18 = vsel %vm302_vm1, %v2357_v17, 0.0 }
 0x398   :  { %v2282_v26 = vadd.f32 %v2281_v43, %v2280_v6  ;;  %v2379_v49 = vadd.f32 %v2378_v12, %v2377_v35  ;;  %v4428_v9 = vpop.permute.xlu1 %2154  ;;  %v4430_v39 = vpop.permute.xlu0 %2169 }
 0x399   :  { %v2259_v40 = vmul.f32 %v4341_v52, %v4428_v9  ;;  %v2356_v57 = vmul.f32 %v2333_v45, %v4428_v9  ;;  %v2262_v20 = vmul.f32 %v4430_v39, %v4396_v25  ;;  %v2359_v1 = vmul.f32 %v2336_v63, %v4430_v39 }
 0x39b   :  { %v2283_v3 = vsel %vm302_vm1, %v2259_v40, 0.0  ;;  %v2380_v15 = vsel %vm302_vm1, %v2356_v57, 0.0  ;;  %v2289_v30 = vsel %vm302_vm1, %v2262_v20, 0.0  ;;  %v2386_v0 = vsel %vm302_vm1, %v2359_v1, 0.0 }
 0x39c   :  { %v2284_v5 = vadd.f32 %v2283_v3, %v2282_v26  ;;  %v2381_v62 = vadd.f32 %v2380_v15, %v2379_v49  ;;  %v4447_v53 = vpop.permute.xlu1 %2164  ;;  %v4454_v16 = vpop.permute.xlu0 %2179 }
 0x39d   :  { %v2261_v47 = vmul.f32 %v4447_v53, %v4391_v27  ;;  %v2358_v37 = vmul.f32 %v2335_v54, %v4447_v53  ;;  %v2264_v42 = vmul.f32 %v4393_v38, %v4454_v16  ;;  %v2361_v44 = vmul.f32 %v2338_v23, %v4454_v16 }
 0x39e   :  { %v2286_v10 = vadd.f32 %v2285_v8, %v2284_v5  ;;  %v2383_v7 = vadd.f32 %v2382_v18, %v2381_v62 }
 0x39f   :  { %v2287_v24 = vsel %vm302_vm1, %v2261_v47, 0.0  ;;  %v2384_v13 = vsel %vm302_vm1, %v2358_v37, 0.0  ;;  %v2293_v48 = vsel %vm302_vm1, %v2264_v42, 0.0  ;;  %v2390_v43 = vsel %vm302_vm1, %v2361_v44, 0.0 }
 0x3a0   :  { %v2288_v33 = vadd.f32 %v2287_v24, %v2286_v10  ;;  %v2385_v58 = vadd.f32 %v2384_v13, %v2383_v7  ;;  %v4464_v41 = vpop.permute.xlu1 %2174  ;;  %v4478_v45 = vpop.permute.xlu0 %2189 }
 0x3a1   :  { %v2263_v4 = vmul.f32 %v4389_v22, %v4464_v41  ;;  %v2360_v34 = vmul.f32 %v2337_v19, %v4464_v41 }
 0x3a2   :  { %v2290_v36 = vadd.f32 %v2289_v30, %v2288_v33  ;;  %v2387_v46 = vadd.f32 %v2386_v0, %v2385_v58 }
 0x3a3   :  { %v2291_v50 = vsel %vm302_vm1, %v2263_v4, 0.0  ;;  %v2388_v51 = vsel %vm302_vm1, %v2360_v34, 0.0 }
 0x3a4   :  { %v2292_v61 = vadd.f32 %v2291_v50, %v2290_v36  ;;  %v2389_v21 = vadd.f32 %v2388_v51, %v2387_v46  ;;  %v4476_v31 = vpop.permute.xlu1 %2184  ;;  %v4506_v62 = vpop.permute.xlu0 %2199 }
 0x3a6   :  { %v2294_v12 = vadd.f32 %v2293_v48, %v2292_v61  ;;  %v2391_v59 = vadd.f32 %v2390_v43, %v2389_v21 }
 0x3a8   :  { %v4486_v26 = vpop.permute.xlu1 %2194  ;;  %v4522_v36 = vpop.permute.xlu0 %2209 }
 0x3ac   :  { %v4520_v34 = vpop.permute.xlu1 %2204 }
 0x3b0   :  { %v4530_v61 = vpop.permute.xlu1 %2214 }
 0x3b6   :  { %v4480_v56 = vpop.f32.mrb[8].mxu1 }
 0x3b7   :  { %v2341_v6 = vmul.f32 %v4480_v56, %v4480_v56  ;;  %v4484_v35 = vpop.f32.mrb[9].mxu1  ;;  %v2267_v40 = vmul.f32 %v4480_v56, %v4486_v26 }
 0x3b8   :  { %v2265_v49 = vmul.f32 %v4476_v31, %v4484_v35  ;;  %v2339_v11 = vmul.f32 %v4484_v35, %v4484_v35  ;;  %v4492_v17 = vpop.f32.mrb[10].mxu1 }
 0x3b9   :  { %v2342_v57 = vmul.f32 %v4492_v17, %v4492_v17  ;;  %v4498_v63 = vpop.f32.mrb[11].mxu1  ;;  %v2364_v20 = vmul.f32 %v2341_v6, %v4486_v26  ;;  %v2268_v18 = vmul.f32 %v4492_v17, %v4506_v62  ;;  %v2299_v19 = vsel %vm302_vm1, %v2267_v40, 0.0 }
 0x3ba   :  { %v2295_v54 = vsel %vm302_vm1, %v2265_v49, 0.0  ;;  %v2362_v3 = vmul.f32 %v2339_v11, %v4476_v31  ;;  %v2266_v15 = vmul.f32 %v4478_v45, %v4498_v63  ;;  %v2340_v5 = vmul.f32 %v4498_v63, %v4498_v63 }
 0x3bb   :  { %v2296_v1 = vadd.f32 %v2295_v54, %v2294_v12  ;;  %v2365_v23 = vmul.f32 %v2342_v57, %v4506_v62  ;;  %v2396_v0 = vsel %vm302_vm1, %v2364_v20, 0.0  ;;  %v2301_v33 = vsel %vm302_vm1, %v2268_v18, 0.0  ;;  %v4550_v54 = vpop.permute.xlu0 %2219 }
 0x3bc   :  { %v2392_v8 = vsel %vm302_vm1, %v2362_v3, 0.0  ;;  %v2297_v47 = vsel %vm302_vm1, %v2266_v15, 0.0  ;;  %v2363_v37 = vmul.f32 %v2340_v5, %v4478_v45  ;;  %5092 = vst [vmem:[#allocation4_spill] sm:$0xff] %v4550_v54 }
 0x3bd   :  { %v2393_v10 = vadd.f32 %v2392_v8, %v2391_v59  ;;  %v2298_v7 = vadd.f32 %v2297_v47, %v2296_v1  ;;  %v2398_v44 = vsel %vm302_vm1, %v2365_v23, 0.0 }
 0x3be   :  { %v2394_v24 = vsel %vm302_vm1, %v2363_v37, 0.0 }
 0x3bf   :  { %v2300_v13 = vadd.f32 %v2299_v19, %v2298_v7  ;;  %v2395_v30 = vadd.f32 %v2394_v24, %v2393_v10 }
 0x3c1   :  { %v2397_v58 = vadd.f32 %v2396_v0, %v2395_v30  ;;  %v2302_v42 = vadd.f32 %v2301_v33, %v2300_v13 }
 0x3c3   :  { %v2399_v4 = vadd.f32 %v2398_v44, %v2397_v58 }
 0x3f6   :  { %v4524_v46 = vpop.f32.mrb[12].mxu1 }
 0x3f7   :  { %v2345_v50 = vmul.f32 %v4524_v46, %v4524_v46  ;;  %v4528_v51 = vpop.f32.mrb[13].mxu1  ;;  %v2271_v12 = vmul.f32 %v4524_v46, %v4530_v61 }
 0x3f8   :  { %v2269_v21 = vmul.f32 %v4520_v34, %v4528_v51  ;;  %v2343_v48 = vmul.f32 %v4528_v51, %v4528_v51  ;;  %v4536_v43 = vpop.f32.mrb[14].mxu1 }
 0x3f9   :  { %v2346_v59 = vmul.f32 %v4536_v43, %v4536_v43  ;;  %v4542_v6 = vpop.f32.mrb[15].mxu1  ;;  %v2368_v3 = vmul.f32 %v2345_v50, %v4530_v61  ;;  %v2272_v20 = vmul.f32 %v4536_v43, %v4550_v54  ;;  %v2307_v37 = vsel %vm302_vm1, %v2271_v12, 0.0  ;;  %v4571_v50 = vpop.permute.xlu0 %2229 }
 0x3fa   :  { %v2303_v49 = vsel %vm302_vm1, %v2269_v21, 0.0  ;;  %v2366_v11 = vmul.f32 %v2343_v48, %v4520_v34  ;;  %v2270_v40 = vmul.f32 %v4522_v36, %v4542_v6  ;;  %v2344_v57 = vmul.f32 %v4542_v6, %v4542_v6  ;;  %5094 = vst [vmem:[#allocation6_spill] sm:$0xff] %v4571_v50 }
 0x3fb   :  { %v2304_v15 = vadd.f32 %v2303_v49, %v2302_v42  ;;  %v2369_v10 = vmul.f32 %v2346_v59, %v4550_v54  ;;  %v2404_v24 = vsel %vm302_vm1, %v2368_v3, 0.0  ;;  %v2309_v13 = vsel %vm302_vm1, %v2272_v20, 0.0  ;;  %v2533_v42 = vld [vmem:[%s5072_s4] sm:$0xf] }
 0x3fc   :  { %v2400_v5 = vsel %vm302_vm1, %v2366_v11, 0.0  ;;  %v2305_v1 = vsel %vm302_vm1, %v2270_v40, 0.0  ;;  %v2367_v8 = vmul.f32 %v2344_v57, %v4522_v36  ;;  %3212 = vmatprep.subr.msk.bf16.mxu1 %vm1987_vm3, %v2533_v42  ;;  %v2571_v44 = vsel %vm1987_vm3, %v2533_v42, 0 }
 0x3fd   :  { %v2401_v18 = vadd.f32 %v2400_v5, %v2399_v4  ;;  %v2306_v47 = vadd.f32 %v2305_v1, %v2304_v15  ;;  %v2406_v33 = vsel %vm302_vm1, %v2369_v10, 0.0  ;;  %3186 = vmatpush3.bf16.msra.mxu1 %v2571_v44  ;;  %v4569_v4 = vpop.permute.xlu1 %2224 }
 0x3fe   :  { %v2402_v7 = vsel %vm302_vm1, %v2367_v8, 0.0  ;;  %5093 = vst [vmem:[#allocation5_spill] sm:$0xff] %v4569_v4 }
 0x3ff   :  { %v2308_v19 = vadd.f32 %v2307_v37, %v2306_v47  ;;  %v2403_v23 = vadd.f32 %v2402_v7, %v2401_v18  ;;  %v4599_v18 = vpop.permute.xlu0 %2239 }
 0x400   :  { %5096 = vst [vmem:[#allocation8_spill] sm:$0xff] %v4599_v18 }
 0x401   :  { %v2405_v30 = vadd.f32 %v2404_v24, %v2403_v23  ;;  %v2310_v0 = vadd.f32 %v2309_v13, %v2308_v19  ;;  %v4579_v59 = vpop.permute.xlu1 %2234 }
 0x402   :  { %5095 = vst [vmem:[#allocation7_spill] sm:$0xff] %v4579_v59 }
 0x403   :  { %v2407_v58 = vadd.f32 %v2406_v33, %v2405_v30 }
 0x436   :  { %v4573_v21 = vpop.f32.mrb[16].mxu1 }
 0x437   :  { %v2349_v48 = vmul.f32 %v4573_v21, %v4573_v21  ;;  %v4577_v12 = vpop.f32.mrb[17].mxu1  ;;  %v2275_v57 = vmul.f32 %v4573_v21, %v4579_v59 }
 0x438   :  { %v2273_v49 = vmul.f32 %v4569_v4, %v4577_v12  ;;  %v2347_v11 = vmul.f32 %v4577_v12, %v4577_v12  ;;  %v4585_v40 = vpop.f32.mrb[18].mxu1 }
 0x439   :  { %v2350_v3 = vmul.f32 %v4585_v40, %v4585_v40  ;;  %v4591_v15 = vpop.f32.mrb[19].mxu1  ;;  %v2372_v47 = vmul.f32 %v2349_v48, %v4579_v59  ;;  %v2276_v7 = vmul.f32 %v4585_v40, %v4599_v18  ;;  %v2315_v30 = vsel %vm302_vm1, %v2275_v57, 0.0 }
 0x43a   :  { %v2311_v5 = vsel %vm302_vm1, %v2273_v49, 0.0  ;;  %v2370_v20 = vmul.f32 %v2347_v11, %v4569_v4  ;;  %v2274_v1 = vmul.f32 %v4571_v50, %v4591_v15  ;;  %v2348_v8 = vmul.f32 %v4591_v15, %v4591_v15 }
 0x43b   :  { %v2312_v37 = vadd.f32 %v2311_v5, %v2310_v0  ;;  %v2373_v33 = vmul.f32 %v2350_v3, %v4599_v18  ;;  %v2412_v0 = vsel %vm302_vm1, %v2372_v47, 0.0  ;;  %v2317_v49 = vsel %vm302_vm1, %v2276_v7, 0.0 }
 0x43c   :  { %v2408_v10 = vsel %vm302_vm1, %v2370_v20, 0.0  ;;  %v2313_v19 = vsel %vm302_vm1, %v2274_v1, 0.0  ;;  %v2371_v23 = vmul.f32 %v2348_v8, %v4571_v50  ;;  %v4613_v8 = vpop.permute.xlu1 %2244 }
 0x43d   :  { %v2409_v24 = vadd.f32 %v2408_v10, %v2407_v58  ;;  %v2314_v13 = vadd.f32 %v2313_v19, %v2312_v37  ;;  %v2414_v20 = vsel %vm302_vm1, %v2373_v33, 0.0  ;;  %5097 = vst [vmem:[#allocation9_spill] sm:$0xff] %v4613_v8  ;;  %v4627_v19 = vpop.permute.xlu0 %2249 }
 0x43e   :  { %v2410_v42 = vsel %vm302_vm1, %v2371_v23, 0.0 }
 0x43f   :  { %v2316_v44 = vadd.f32 %v2315_v30, %v2314_v13  ;;  %v2411_v48 = vadd.f32 %v2410_v42, %v2409_v24 }
 0x440   :  { %v4619_v3 = vpop.permute.xlu1 %2254 }
 0x441   :  { %v2413_v11 = vadd.f32 %v2412_v0, %v2411_v48  ;;  %v2318_v5 = vadd.f32 %v2317_v49, %v2316_v44  ;;  %5098 = vst [vmem:[#allocation10_spill] sm:$0xff] %v4619_v3 }
 0x443   :  { %v2415_v1 = vadd.f32 %v2414_v20, %v2413_v11 }
 0x463   :  { %v4615_v58 = vpop.f32.mrb[20].mxu1 }
 0x464   :  { %v4617_v57 = vpop.f32.mrb[21].mxu1  ;;  %v2353_v37 = vmul.f32 %v4615_v58, %v4615_v58  ;;  %v2279_v23 = vmul.f32 %v4615_v58, %v4619_v3 }
 0x465   :  { %v2277_v47 = vmul.f32 %v4613_v8, %v4617_v57  ;;  %v2351_v10 = vmul.f32 %v4617_v57, %v4617_v57  ;;  %v3184_v7 = vpop.f32.mrb[22].mxu1 }
 0x466   :  { %v2108_v24 = vpop.f32.mrb[23].mxu1  ;;  %v2376_v48 = vmul.f32 %v2353_v37, %v4619_v3  ;;  %v2323_v18 = vsel %vm757_vm2, %v2279_v23, 0.0 }
 0x467   :  { %v2319_v13 = vsel %vm302_vm1, %v2277_v47, 0.0  ;;  %v2374_v30 = vmul.f32 %v2351_v10, %v4613_v8  ;;  %v2278_v33 = vmul.f32 %v4627_v19, %v2108_v24  ;;  %v2352_v42 = vmul.f32 %v2108_v24, %v2108_v24 }
 0x468   :  { %v2320_v44 = vadd.f32 %v2319_v13, %v2318_v5  ;;  %v2420_v8 = vsel %vm757_vm2, %v2376_v48, 0.0 }
 0x469   :  { %v2416_v0 = vsel %vm302_vm1, %v2374_v30, 0.0  ;;  %v2321_v49 = vsel %vm302_vm1, %v2278_v33, 0.0  ;;  %v2375_v11 = vmul.f32 %v2352_v42, %v4627_v19 }
 0x46a   :  { %v2417_v20 = vadd.f32 %v2416_v0, %v2415_v1  ;;  %v2322_v7 = vadd.f32 %v2321_v49, %v2320_v44 }
 0x46b   :  { %v2418_v47 = vsel %vm302_vm1, %v2375_v11, 0.0 }
 0x46c   :  { %v2324_v59 = vadd.f32 %v2323_v18, %v2322_v7  ;;  %v2419_v10 = vadd.f32 %v2418_v47, %v2417_v20 }
 0x46e   :  { %v2325_v50 = vrot.slane %v2324_v59, 4  ;;  %v2421_v5 = vadd.f32 %v2420_v8, %v2419_v10 }
 0x470   :  { %v2326_v13 = vadd.f32 %v2325_v50, %v2324_v59  ;;  %v2422_v37 = vrot.slane %v2421_v5, 4  ;;  %v2433_v50 = vld [vmem:[%s5073_s7] sm:$0x1] }
 0x472   :  { %v2327_v3 = vrot.slane %v2326_v13, 2  ;;  %v2423_v30 = vadd.f32 %v2422_v37, %v2421_v5 }
 0x474   :  { %v2328_v4 = vadd.f32 %v2327_v3, %v2326_v13  ;;  %v2424_v33 = vrot.slane %v2423_v30, 2  ;;  %v2437_v3 = vld [vmem:[%s5074_s8] sm:$0x1] }
 0x476   :  { %v2329_v54 = vrot.slane %v2328_v4, 1  ;;  %v2425_v42 = vadd.f32 %v2424_v33, %v2423_v30 }
 0x478   :  { %v2330_v1 = vadd.f32 %v2329_v54, %v2328_v4  ;;  %v2426_v44 = vrot.slane %v2425_v42, 1 }
 0x47a   :  { %v2427_v0 = vadd.f32 %v2426_v44, %v2425_v42  ;;  %v2428_v23 = vmul.f32 0.0078125, %v2330_v1 }
 0x47c   :  { %v2429_v49 = vmul.f32 0.0078125, %v2427_v0  ;;  %v2430_v11 = vmul.f32 %v2428_v23, %v2428_v23 }
 0x47e   :  { %v2431_v18 = vsub.f32 %v2429_v49, %v2430_v11 }
 0x480   :  { %v2432_v20 = vmax.f32 %v2431_v18, 0.0 }
 0x482   :  { %v2434_v7 = vadd.f32 1e-05, %v2432_v20 }
 0x484   :  { %3241 = vrsqrt.f32 %v2434_v7 }
 0x48e   :  { %v3242_v59 = vpop.eup %3241 }
 0x48f   :  { %v2436_v8 = vmul.f32 %v3242_v59, %v2433_v50 }
 0x491   :  { %v2438_v54 = vmul.f32 %v2436_v8, %v2428_v23  ;;  %v4648_v4 = vrot.slane %v2436_v8, %v3727_v29 }
 0x493   :  { %v2439_v48 = vsub.f32 %v2437_v3, %v2438_v54  ;;  %v2467_v47 = vmul.f32 %v4648_v4, %v2108_v24  ;;  %v2446_v10 = vmul.f32 %v4648_v4, %v4346_v60  ;;  %v2447_v5 = vmul.f32 %v4648_v4, %v4355_v28 }
 0x494   :  { %v2448_v13 = vmul.f32 %v4341_v52, %v4648_v4  ;;  %v2449_v37 = vmul.f32 %v4351_v14, %v4648_v4  ;;  %v2450_v30 = vmul.f32 %v4648_v4, %v4391_v27  ;;  %v2451_v33 = vmul.f32 %v4648_v4, %v4396_v25 }
 0x495   :  { %v4664_v24 = vrot.slane %v2439_v48, %v3727_v29  ;;  %v2452_v60 = vmul.f32 %v4389_v22, %v4648_v4  ;;  %v2453_v28 = vmul.f32 %v4393_v38, %v4648_v4  ;;  %v2454_v52 = vmul.f32 %v4648_v4, %v4484_v35 }
 0x496   :  { %v2455_v14 = vmul.f32 %v4648_v4, %v4498_v63  ;;  %v2456_v27 = vmul.f32 %v4480_v56, %v4648_v4  ;;  %v2457_v25 = vmul.f32 %v4492_v17, %v4648_v4  ;;  %v2458_v42 = vmul.f32 %v4648_v4, %v4528_v51 }
 0x497   :  { %v4681_v22 = vadd.f32 %v4664_v24, %v2467_v47  ;;  %v2475_v38 = vadd.f32 %v4664_v24, %v2446_v10  ;;  %v2476_v1 = vadd.f32 %v4664_v24, %v2447_v5  ;;  %v2477_v35 = vadd.f32 %v4664_v24, %v2448_v13 }
 0x498   :  { %v2478_v63 = vadd.f32 %v4664_v24, %v2449_v37  ;;  %v2479_v44 = vadd.f32 %v4664_v24, %v2450_v30  ;;  %v2480_v56 = vadd.f32 %v4664_v24, %v2451_v33  ;;  %v2481_v17 = vadd.f32 %v4664_v24, %v2452_v60 }
 0x499   :  { %v2498_v0 = vmax.f32 %v2475_v38, 0.0  ;;  %v2499_v23 = vmax.f32 %v2476_v1, 0.0  ;;  %v2500_v51 = vmax.f32 %v2477_v35, 0.0  ;;  %v2482_v20 = vadd.f32 %v4664_v24, %v2453_v28 }
 0x49a   :  { %v2501_v49 = vmax.f32 %v2478_v63, 0.0  ;;  %v2502_v11 = vmax.f32 %v2479_v44, 0.0  ;;  %v2503_v18 = vmax.f32 %v2480_v56, 0.0  ;;  %v2504_v50 = vmax.f32 %v2481_v17, 0.0 }
 0x49b   :  { %v2521_v7 = vpack.c.bf16 %v2499_v23, %v2498_v0  ;;  %v2483_v59 = vadd.f32 %v4664_v24, %v2454_v52  ;;  %v2484_v8 = vadd.f32 %v4664_v24, %v2455_v14  ;;  %v2505_v48 = vmax.f32 %v2482_v20, 0.0 }
 0x49c   :  { %v2522_v3 = vpack.c.bf16 %v2501_v49, %v2500_v51  ;;  %v2523_v54 = vpack.c.bf16 %v2503_v18, %v2502_v11  ;;  %v2485_v47 = vadd.f32 %v4664_v24, %v2456_v27  ;;  %v2486_v13 = vadd.f32 %v4664_v24, %v2457_v25 }
 0x49d   :  { %3187 = vmatprep.mubr.msk.bf16.mxu1 %vm302_vm1, %v2521_v7  ;;  %v2506_v10 = vmax.f32 %v2483_v59, 0.0  ;;  %v2507_v5 = vmax.f32 %v2484_v8, 0.0  ;;  %v2459_v37 = vmul.f32 %v4648_v4, %v4542_v6  ;;  %v2524_v30 = vpack.c.bf16 %v2505_v48, %v2504_v50 }
 0x49e   :  { %3188 = vmatmul.mubr.msk.bf16.vlgmr.msra.gmra.mrb[24].mxu1 %vm302_vm1, %v2522_v3  ;;  %v2508_v33 = vmax.f32 %v2485_v47, 0.0  ;;  %v2487_v60 = vadd.f32 %v4664_v24, %v2458_v42  ;;  %v2460_v28 = vmul.f32 %v4524_v46, %v4648_v4  ;;  %v2509_v14 = vmax.f32 %v2486_v13, 0.0 }
 0x49f   :  { %3191 = vmatprep.mubr.msk.bf16.mxu1 %vm302_vm1, %v2523_v54  ;;  %v2525_v52 = vpack.c.bf16 %v2507_v5, %v2506_v10  ;;  %v2488_v27 = vadd.f32 %v4664_v24, %v2459_v37  ;;  %v2461_v25 = vmul.f32 %v4536_v43, %v4648_v4  ;;  %v2462_v1 = vmul.f32 %v4648_v4, %v4577_v12 }
 0x4a0   :  { %v2510_v38 = vmax.f32 %v2487_v60, 0.0  ;;  %v2489_v6 = vadd.f32 %v4664_v24, %v2460_v28  ;;  %v2463_v42 = vmul.f32 %v4648_v4, %v4591_v15  ;;  %v2526_v35 = vpack.c.bf16 %v2509_v14, %v2508_v33 }
 0x4a1   :  { %v2511_v46 = vmax.f32 %v2488_v27, 0.0  ;;  %v2490_v63 = vadd.f32 %v4664_v24, %v2461_v25  ;;  %v2464_v44 = vmul.f32 %v4573_v21, %v4648_v4  ;;  %v2491_v17 = vadd.f32 %v4664_v24, %v2462_v1 }
 0x4a2   :  { %v2512_v56 = vmax.f32 %v2489_v6, 0.0  ;;  %v2492_v43 = vadd.f32 %v4664_v24, %v2463_v42  ;;  %v2465_v0 = vmul.f32 %v4585_v40, %v4648_v4  ;;  %v2466_v15 = vmul.f32 %v4648_v4, %v4617_v57 }
 0x4a3   :  { %v2527_v23 = vpack.c.bf16 %v2511_v46, %v2510_v38  ;;  %v2513_v12 = vmax.f32 %v2490_v63, 0.0  ;;  %v2493_v51 = vadd.f32 %v4664_v24, %v2464_v44  ;;  %v2514_v49 = vmax.f32 %v2491_v17, 0.0 }
 0x4a4   :  { %v2515_v11 = vmax.f32 %v2492_v43, 0.0  ;;  %v2494_v18 = vadd.f32 %v4664_v24, %v2465_v0  ;;  %v2468_v21 = vmul.f32 %v4615_v58, %v4648_v4  ;;  %v2519_v20 = vmax.f32 %v4681_v22, 0.0 }
 0x4a5   :  { %v2528_v7 = vpack.c.bf16 %v2513_v12, %v2512_v56  ;;  %v2516_v50 = vmax.f32 %v2493_v51, 0.0  ;;  %v2495_v40 = vadd.f32 %v4664_v24, %v2466_v15 }
 0x4a6   :  { %3192 = vmatmul.mubr.msk.bf16.gmra.mrb[28].mxu1 %vm302_vm1, %v2524_v30  ;;  %v2529_v59 = vpack.c.bf16 %v2515_v11, %v2514_v49  ;;  %v2517_v8 = vmax.f32 %v2494_v18, 0.0  ;;  %v2497_v3 = vadd.f32 %v4664_v24, %v2468_v21 }
 0x4a7   :  { %3195 = vmatprep.mubr.msk.bf16.mxu1 %vm302_vm1, %v2525_v52  ;;  %v2518_v57 = vmax.f32 %v2495_v40, 0.0 }
 0x4a8   :  { %v2530_v54 = vpack.c.bf16 %v2517_v8, %v2516_v50  ;;  %v2520_v58 = vmax.f32 %v2497_v3, 0.0 }
 0x4a9   :  { %v2531_v48 = vpack.c.bf16 %v2519_v20, %v2518_v57 }
 0x4aa   :  { %v2532_v4 = vpack.c.bf16 %v2520_v58, %v2520_v58 }
 0x4ae   :  { %3196 = vmatmul.mubr.msk.bf16.gmra.mrb[32].mxu1 %vm302_vm1, %v2526_v35 }
 0x4af   :  { %3199 = vmatprep.mubr.msk.bf16.mxu1 %vm302_vm1, %v2527_v23 }
 0x4b6   :  { %3200 = vmatmul.mubr.msk.bf16.gmra.mrb[36].mxu1 %vm302_vm1, %v2528_v7 }
 0x4b7   :  { %3203 = vmatprep.mubr.msk.bf16.mxu1 %vm302_vm1, %v2529_v59 }
 0x4be   :  { %3204 = vmatmul.mubr.msk.bf16.gmra.mrb[40].mxu1 %vm302_vm1, %v2530_v54 }
 0x4bf   :  { %3207 = vmatprep.mubr.msk.bf16.mxu1 %vm302_vm1, %v2531_v48 }
 0x4c6   :  { %3208 = vmatmul.mubr.msk.bf16.gmra.mrb[44].mxu1 %vm302_vm1, %v2532_v4  ;;  %vm2745_vm1 = vcmask 1041408  }
 0x571   :  { %v4736_v24 = vpop.f32.mrb[24].mxu1 }
 0x572   :  { %v4738_v22 = vpop.f32.mrb[25].mxu1  ;;  %v2756_v13 = vmul.f32 %v4736_v24, %v4736_v24  ;;  %v2703_v28 = vmul.f32 %v4736_v24, %v4428_v9 }
 0x573   :  { %v2754_v47 = vmul.f32 %v4738_v22, %v4738_v22  ;;  %v4742_v10 = vpop.f32.mrb[26].mxu1  ;;  %v2701_v37 = vmul.f32 %v4738_v22, %v4415_v32 }
 0x574   :  { %v4744_v5 = vpop.f32.mrb[27].mxu1  ;;  %v2757_v60 = vmul.f32 %v4742_v10, %v4742_v10  ;;  %v2779_v25 = vmul.f32 %v2756_v13, %v4428_v9  ;;  %v2704_v38 = vmul.f32 %v4742_v10, %v4413_v2 }
 0x575   :  { %v2702_v30 = vmul.f32 %v4744_v5, %v4406_v55  ;;  %v2755_v33 = vmul.f32 %v4744_v5, %v4744_v5  ;;  %v2777_v52 = vmul.f32 %v2754_v47, %v4415_v32 }
 0x576   :  { %v2780_v35 = vmul.f32 %v2757_v60, %v4413_v2 }
 0x577   :  { %v2724_v14 = vadd.f32 %v2702_v30, %v2701_v37  ;;  %v2778_v27 = vmul.f32 %v2755_v33, %v4406_v55 }
 0x579   :  { %v2725_v6 = vadd.f32 %v2724_v14, %v2703_v28  ;;  %v2800_v1 = vadd.f32 %v2778_v27, %v2777_v52  ;;  %v4763_v42 = vpop.f32.mrb[28].mxu1 }
 0x57a   :  { %v4766_v46 = vpop.f32.mrb[29].mxu1  ;;  %v2760_v23 = vmul.f32 %v4763_v42, %v4763_v42  ;;  %v2707_v51 = vmul.f32 %v4763_v42, %v4464_v41 }
 0x57b   :  { %v2801_v63 = vadd.f32 %v2800_v1, %v2779_v25  ;;  %v2705_v32 = vmul.f32 %v4766_v46, %v4447_v53  ;;  %v2726_v44 = vadd.f32 %v2725_v6, %v2704_v38  ;;  %v2758_v55 = vmul.f32 %v4766_v46, %v4766_v46  ;;  %v4772_v9 = vpop.f32.mrb[30].mxu1 }
 0x57c   :  { %v4774_v56 = vpop.f32.mrb[31].mxu1  ;;  %v2761_v11 = vmul.f32 %v4772_v9, %v4772_v9  ;;  %v2708_v18 = vmul.f32 %v4772_v9, %v4454_v16  ;;  %v2783_v7 = vmul.f32 %v2760_v23, %v4464_v41 }
 0x57d   :  { %v2727_v17 = vadd.f32 %v2726_v44, %v2705_v32  ;;  %v2781_v43 = vmul.f32 %v2758_v55, %v4447_v53  ;;  %v2802_v0 = vadd.f32 %v2801_v63, %v2780_v35  ;;  %v2706_v2 = vmul.f32 %v4774_v56, %v4430_v39 }
 0x57e   :  { %v2759_v12 = vmul.f32 %v4774_v56, %v4774_v56 }
 0x57f   :  { %v2803_v15 = vadd.f32 %v2802_v0, %v2781_v43  ;;  %v2728_v49 = vadd.f32 %v2727_v17, %v2706_v2 }
 0x580   :  { %v2782_v53 = vmul.f32 %v2759_v12, %v4430_v39  ;;  %v2784_v39 = vmul.f32 %v2761_v11, %v4454_v16 }
 0x581   :  { %v2729_v21 = vadd.f32 %v2728_v49, %v2707_v51  ;;  %v4790_v20 = vpop.f32.mrb[32].mxu1 }
 0x582   :  { %v2804_v50 = vadd.f32 %v2803_v15, %v2782_v53  ;;  %v4793_v40 = vpop.f32.mrb[33].mxu1  ;;  %v2764_v13 = vmul.f32 %v4790_v20, %v4790_v20  ;;  %v2711_v30 = vmul.f32 %v4790_v20, %v4486_v26  ;;  %v5099_v15 = vld [vmem:[#allocation4_spill] sm:$0xff] }
 0x583   :  { %v2709_v59 = vmul.f32 %v4793_v40, %v4476_v31  ;;  %v2730_v8 = vadd.f32 %v2729_v21, %v2708_v18  ;;  %v2762_v3 = vmul.f32 %v4793_v40, %v4793_v40  ;;  %v4799_v57 = vpop.f32.mrb[34].mxu1 }
 0x584   :  { %v2805_v54 = vadd.f32 %v2804_v50, %v2783_v7  ;;  %v4802_v48 = vpop.f32.mrb[35].mxu1  ;;  %v2712_v28 = vmul.f32 %v4799_v57, %v4506_v62  ;;  %v2787_v27 = vmul.f32 %v2764_v13, %v4486_v26  ;;  %v5100_v50 = vld [vmem:[#allocation5_spill] sm:$0xff] }
 0x585   :  { %v2731_v58 = vadd.f32 %v2730_v8, %v2709_v59  ;;  %v2785_v41 = vmul.f32 %v2762_v3, %v4476_v31  ;;  %v2710_v4 = vmul.f32 %v4802_v48, %v4478_v45  ;;  %v2763_v47 = vmul.f32 %v4802_v48, %v4802_v48 }
 0x586   :  { %v2806_v37 = vadd.f32 %v2805_v54, %v2784_v39  ;;  %v2765_v31 = vmul.f32 %v4799_v57, %v4799_v57 }
 0x587   :  { %v2732_v16 = vadd.f32 %v2731_v58, %v2710_v4  ;;  %v2786_v33 = vmul.f32 %v2763_v47, %v4478_v45  ;;  %v5101_v4 = vld [vmem:[#allocation6_spill] sm:$0xff] }
 0x588   :  { %v2807_v60 = vadd.f32 %v2806_v37, %v2785_v41  ;;  %v2788_v63 = vmul.f32 %v2765_v31, %v4506_v62 }
 0x589   :  { %v2733_v52 = vadd.f32 %v2732_v16, %v2711_v30  ;;  %v4818_v14 = vpop.f32.mrb[36].mxu1  ;;  %v5102_v16 = vld [vmem:[#allocation7_spill] sm:$0xff] }
 0x58a   :  { %v2808_v25 = vadd.f32 %v2807_v60, %v2786_v33  ;;  %v4821_v38 = vpop.f32.mrb[37].mxu1  ;;  %v2768_v0 = vmul.f32 %v4818_v14, %v4818_v14  ;;  %v2715_v23 = vmul.f32 %v4818_v14, %v4530_v61 }
 0x58b   :  { %v2713_v6 = vmul.f32 %v4821_v38, %v4520_v34  ;;  %v2734_v1 = vadd.f32 %v2733_v52, %v2712_v28  ;;  %v2766_v45 = vmul.f32 %v4821_v38, %v4821_v38  ;;  %v4827_v35 = vpop.f32.mrb[38].mxu1 }
 0x58c   :  { %v2809_v32 = vadd.f32 %v2808_v25, %v2787_v27  ;;  %v4830_v44 = vpop.f32.mrb[39].mxu1  ;;  %v2716_v49 = vmul.f32 %v4827_v35, %v5099_v15  ;;  %v2791_v18 = vmul.f32 %v2768_v0, %v4530_v61  ;;  %v5103_v27 = vld [vmem:[#allocation8_spill] sm:$0xff] }
 0x58d   :  { %v2735_v55 = vadd.f32 %v2734_v1, %v2713_v6  ;;  %v2789_v26 = vmul.f32 %v2766_v45, %v4520_v34  ;;  %v2714_v17 = vmul.f32 %v4830_v44, %v4522_v36  ;;  %v2767_v43 = vmul.f32 %v4830_v44, %v4830_v44 }
 0x58e   :  { %v2810_v2 = vadd.f32 %v2809_v32, %v2788_v63  ;;  %v2769_v34 = vmul.f32 %v4827_v35, %v4827_v35 }
 0x58f   :  { %v2736_v62 = vadd.f32 %v2735_v55, %v2714_v17  ;;  %v2790_v12 = vmul.f32 %v2767_v43, %v4522_v36 }
 0x590   :  { %v2811_v51 = vadd.f32 %v2810_v2, %v2789_v26  ;;  %v2792_v39 = vmul.f32 %v2769_v34, %v5099_v15  ;;  %v5104_v26 = vld [vmem:[#allocation9_spill] sm:$0xff] }
 0x591   :  { %v2737_v11 = vadd.f32 %v2736_v62, %v2715_v23  ;;  %v4846_v53 = vpop.f32.mrb[40].mxu1 }
 0x592   :  { %v2812_v21 = vadd.f32 %v2811_v51, %v2790_v12  ;;  %v4849_v7 = vpop.f32.mrb[41].mxu1  ;;  %v2772_v37 = vmul.f32 %v4846_v53, %v4846_v53  ;;  %v2719_v33 = vmul.f32 %v4846_v53, %v5102_v16  ;;  %v5105_v12 = vld [vmem:[#allocation10_spill] sm:$0xff] }
 0x593   :  { %v2717_v59 = vmul.f32 %v4849_v7, %v5100_v50  ;;  %v2738_v8 = vadd.f32 %v2737_v11, %v2716_v49  ;;  %v2770_v36 = vmul.f32 %v4849_v7, %v4849_v7  ;;  %v4855_v3 = vpop.f32.mrb[42].mxu1 }
 0x594   :  { %v2813_v54 = vadd.f32 %v2812_v21, %v2791_v18  ;;  %v4858_v58 = vpop.f32.mrb[43].mxu1  ;;  %v2773_v52 = vmul.f32 %v4855_v3, %v4855_v3  ;;  %v2720_v25 = vmul.f32 %v4855_v3, %v5103_v27  ;;  %v2795_v45 = vmul.f32 %v2772_v37, %v5102_v16 }
 0x595   :  { %v2739_v41 = vadd.f32 %v2738_v8, %v2717_v59  ;;  %v2793_v61 = vmul.f32 %v2770_v36, %v5100_v50  ;;  %v2718_v47 = vmul.f32 %v4858_v58, %v5101_v4  ;;  %v2771_v13 = vmul.f32 %v4858_v58, %v4858_v58 }
 0x596   :  { %v2814_v30 = vadd.f32 %v2813_v54, %v2792_v39  ;;  %v2796_v23 = vmul.f32 %v2773_v52, %v5103_v27 }
 0x597   :  { %v2740_v60 = vadd.f32 %v2739_v41, %v2718_v47  ;;  %v2794_v31 = vmul.f32 %v2771_v13, %v5101_v4 }
 0x598   :  { %v2815_v28 = vadd.f32 %v2814_v30, %v2793_v61 }
 0x599   :  { %v2741_v6 = vadd.f32 %v2740_v60, %v2719_v33  ;;  %v4874_v1 = vpop.f32.mrb[44].mxu1 }
 0x59a   :  { %v2816_v63 = vadd.f32 %v2815_v28, %v2794_v31  ;;  %v4877_v32 = vpop.f32.mrb[45].mxu1  ;;  %v2776_v55 = vmul.f32 %v4874_v1, %v4874_v1  ;;  %v2723_v51 = vmul.f32 %v4874_v1, %v5105_v12 }
 0x59b   :  { %v2721_v17 = vmul.f32 %v4877_v32, %v5104_v26  ;;  %v2742_v43 = vadd.f32 %v2741_v6, %v2720_v25  ;;  %v2774_v0 = vmul.f32 %v4877_v32, %v4877_v32  ;;  %v3210_v2 = vpop.f32.mrb[46].mxu1 }
 0x59c   :  { %v2817_v62 = vadd.f32 %v2816_v63, %v2795_v45  ;;  %v4888_v34 = vpop.f32.mrb[47].mxu1  ;;  %v2799_v50 = vmul.f32 %v2776_v55, %v5105_v12  ;;  %v2746_v36 = vsel %vm2745_vm1, %v2723_v51, 0.0  ;;  %v2838_v2 = vld [vmem:[%s5076_s10] sm:$0x1] }
 0x59d   :  { %v2743_v15 = vadd.f32 %v2742_v43, %v2721_v17  ;;  %v2797_v49 = vmul.f32 %v2774_v0, %v5104_v26  ;;  %v2722_v11 = vmul.f32 %v4888_v34, %v4627_v19  ;;  %v2775_v18 = vmul.f32 %v4888_v34, %v4888_v34  ;;  %v2834_v17 = vld [vmem:[%s5075_s9] sm:$0x1] }
 0x59e   :  { %v2818_v21 = vadd.f32 %v2817_v62, %v2796_v23  ;;  %v2821_v61 = vsel %vm2745_vm1, %v2799_v50, 0.0 }
 0x59f   :  { %v2744_v59 = vadd.f32 %v2743_v15, %v2722_v11  ;;  %v2798_v8 = vmul.f32 %v2775_v18, %v4627_v19 }
 0x5a0   :  { %v2819_v39 = vadd.f32 %v2818_v21, %v2797_v49 }
 0x5a1   :  { %v2747_v54 = vadd.f32 %v2746_v36, %v2744_v59 }
 0x5a2   :  { %v2820_v41 = vadd.f32 %v2819_v39, %v2798_v8 }
 0x5a3   :  { %v2748_v4 = vrot.slane %v2747_v54, 4 }
 0x5a4   :  { %v2822_v47 = vadd.f32 %v2821_v61, %v2820_v41  ;;  %v2845_v41 = vld [vmem:[%s5068_s0 + $0x2b] sm:$0xff]  ;;  %v2846_v61 = vld [vmem:[%s5068_s0 + $0x33] sm:$0xff] }
 0x5a5   :  { %v2749_v13 = vadd.f32 %v2748_v4, %v2747_v54 }
 0x5a6   :  { %v2823_v37 = vrot.slane %v2822_v47, 4 }
 0x5a7   :  { %v2750_v30 = vrot.slane %v2749_v13, 2 }
 0x5a8   :  { %v2824_v16 = vadd.f32 %v2823_v37, %v2822_v47 }
 0x5a9   :  { %v2751_v33 = vadd.f32 %v2750_v30, %v2749_v13  ;;  %v2847_v30 = vld [vmem:[%s5068_s0 + $0x3b] sm:$0xff] }
 0x5aa   :  { %v2825_v60 = vrot.slane %v2824_v16, 2 }
 0x5ab   :  { %v2752_v31 = vrot.slane %v2751_v33, 1 }
 0x5ac   :  { %v2826_v28 = vadd.f32 %v2825_v60, %v2824_v16  ;;  %v2848_v16 = vld [vmem:[%s5068_s0 + $0x43] sm:$0xff] }
 0x5ad   :  { %v2753_v52 = vadd.f32 %v2752_v31, %v2751_v33  ;;  %v2849_v33 = vld [vmem:[%s5068_s0 + $0x4b] sm:$0xff] }
 0x5ae   :  { %v2827_v27 = vrot.slane %v2826_v28, 1 }
 0x5af   :  { %v2829_v25 = vmul.f32 0.0078125, %v2753_v52 }
 0x5b0   :  { %v2828_v6 = vadd.f32 %v2827_v27, %v2826_v28  ;;  %v2850_v27 = vld [vmem:[%s5068_s0 + $0x53] sm:$0xff] }
 0x5b1   :  { %v2831_v19 = vmul.f32 %v2829_v25, %v2829_v25 }
 0x5b2   :  { %v2830_v45 = vmul.f32 0.0078125, %v2828_v6  ;;  %v2852_v6 = vld [vmem:[%s5068_s0 + $0x63] sm:$0xff] }
 0x5b4   :  { %v2832_v63 = vsub.f32 %v2830_v45, %v2831_v19 }
 0x5b6   :  { %v2833_v55 = vmax.f32 %v2832_v63, 0.0 }
 0x5b8   :  { %v2835_v26 = vadd.f32 1e-05, %v2833_v55 }
 0x5ba   :  { %3243 = vrsqrt.f32 %v2835_v26  ;;  %v2853_v26 = vld [vmem:[%s5068_s0 + $0x6b] sm:$0xff] }
 0x5c4   :  { %v3244_v43 = vpop.eup %3243 }
 0x5c5   :  { %v2837_v0 = vmul.f32 %v3244_v43, %v2834_v17  ;;  %v2854_v17 = vld [vmem:[%s5068_s0 + $0x73] sm:$0xff]  ;;  %v2855_v43 = vld [vmem:[%s5068_s0 + $0x7b] sm:$0xff] }
 0x5c7   :  { %v2839_v23 = vmul.f32 %v2837_v0, %v2829_v25  ;;  %v2868_v62 = vrot.slane %v2837_v0, %v3727_v29  ;;  %v2851_v25 = vld [vmem:[%s5068_s0 + $0x5b] sm:$0xff] }
 0x5c9   :  { %v2840_v12 = vsub.f32 %v2838_v2, %v2839_v23  ;;  %v2870_v51 = vmul.f32 %v2868_v62, %v4738_v22  ;;  %v2871_v15 = vmul.f32 %v2868_v62, %v4744_v5  ;;  %v2872_v49 = vmul.f32 %v4736_v24, %v2868_v62 }
 0x5ca   :  { %v2873_v11 = vmul.f32 %v4742_v10, %v2868_v62  ;;  %v2874_v18 = vmul.f32 %v2868_v62, %v4766_v46  ;;  %v2875_v21 = vmul.f32 %v2868_v62, %v4774_v56  ;;  %v2876_v50 = vmul.f32 %v4763_v42, %v2868_v62 }
 0x5cb   :  { %v2877_v59 = vmul.f32 %v4772_v9, %v2868_v62  ;;  %v2878_v8 = vmul.f32 %v2868_v62, %v4793_v40  ;;  %v2879_v36 = vmul.f32 %v2868_v62, %v4802_v48  ;;  %v2880_v22 = vmul.f32 %v4790_v20, %v2868_v62 }
 0x5cc   :  { %v2881_v5 = vmul.f32 %v4799_v57, %v2868_v62  ;;  %v2882_v24 = vmul.f32 %v2868_v62, %v4821_v38  ;;  %v2883_v10 = vmul.f32 %v2868_v62, %v4830_v44  ;;  %v2884_v46 = vmul.f32 %v4818_v14, %v2868_v62 }
 0x5cd   :  { %v2885_v56 = vmul.f32 %v4827_v35, %v2868_v62  ;;  %v2886_v42 = vmul.f32 %v2868_v62, %v4849_v7  ;;  %v2887_v9 = vmul.f32 %v2868_v62, %v4858_v58  ;;  %v2888_v40 = vmul.f32 %v4846_v53, %v2868_v62  ;;  %v2841_v7 = vld [vmem:[%s5068_s0 + $0xb] sm:$0xff]  ;;  %v2842_v53 = vld [vmem:[%s5068_s0 + $0x13] sm:$0xff] }
 0x5ce   :  { %v2889_v48 = vmul.f32 %v4855_v3, %v2868_v62  ;;  %v2890_v20 = vmul.f32 %v2868_v62, %v4877_v32  ;;  %v2891_v57 = vmul.f32 %v2868_v62, %v4888_v34  ;;  %v2892_v38 = vmul.f32 %v4874_v1, %v2868_v62  ;;  %v2843_v3 = vld [vmem:[%s5068_s0 + $0x1b] sm:$0xff]  ;;  %v2844_v34 = vld [vmem:[%s5068_s0 + $0x23] sm:$0xff] }
 0x5cf   :  { %v2897_v44 = vrot.slane %v2840_v12, %v3727_v29  ;;  %v2856_v12 = vld [vmem:[%s5068_s0 + $0x83] sm:$0xff] }
 0x5d1   :  { %v2899_v39 = vadd.f32 %v2897_v44, %v2870_v51  ;;  %v2900_v14 = vadd.f32 %v2897_v44, %v2871_v15  ;;  %v2901_v54 = vadd.f32 %v2897_v44, %v2872_v49  ;;  %v2902_v35 = vadd.f32 %v2897_v44, %v2873_v11  ;;  %v2857_v51 = vld [vmem:[%s5068_s0 + $0x8b] sm:$0xff]  ;;  %v2858_v15 = vld [vmem:[%s5068_s0 + $0x93] sm:$0xff] }
 0x5d2   :  { %v2903_v58 = vadd.f32 %v2897_v44, %v2874_v18  ;;  %v2904_v1 = vadd.f32 %v2897_v44, %v2875_v21  ;;  %v2905_v32 = vadd.f32 %v2897_v44, %v2876_v50  ;;  %v2906_v29 = vadd.f32 %v2897_v44, %v2877_v59  ;;  %v2859_v50 = vld [vmem:[%s5068_s0 + $0x9b] sm:$0xff]  ;;  %v2860_v59 = vld [vmem:[%s5068_s0 + $0xa3] sm:$0xff] }
 0x5d3   :  { %v2907_v4 = vadd.f32 %v2897_v44, %v2878_v8  ;;  %v2908_v47 = vadd.f32 %v2897_v44, %v2879_v36  ;;  %v2909_v13 = vadd.f32 %v2897_v44, %v2880_v22  ;;  %v2910_v37 = vadd.f32 %v2897_v44, %v2881_v5  ;;  %v2861_v8 = vld [vmem:[%s5068_s0 + $0xab] sm:$0xff] }
 0x5d4   :  { %v2911_v60 = vadd.f32 %v2897_v44, %v2882_v24  ;;  %v2912_v31 = vadd.f32 %v2897_v44, %v2883_v10  ;;  %v2913_v28 = vadd.f32 %v2897_v44, %v2884_v46  ;;  %v2914_v52 = vadd.f32 %v2897_v44, %v2885_v56  ;;  %v2862_v10 = vld [vmem:[%s5068_s0 + $0xb3] sm:$0xff]  ;;  %v2863_v46 = vld [vmem:[%s5068_s0 + $0xbb] sm:$0x3] }
 0x5d5   :  { %v2915_v19 = vadd.f32 %v2897_v44, %v2886_v42  ;;  %v2916_v45 = vadd.f32 %v2897_v44, %v2887_v9  ;;  %v2917_v63 = vadd.f32 %v2897_v44, %v2888_v40  ;;  %v2918_v55 = vadd.f32 %v2897_v44, %v2889_v48 }
 0x5d6   :  { %v2919_v0 = vadd.f32 %v2897_v44, %v2890_v20  ;;  %v2920_v2 = vadd.f32 %v2897_v44, %v2891_v57  ;;  %v2921_v23 = vadd.f32 %v2897_v44, %v2892_v38  ;;  %v2922_v62 = vadd.f32 %v2899_v39, %v2841_v7 }
 0x5d7   :  { %v2923_v49 = vadd.f32 %v2900_v14, %v2842_v53  ;;  %v2924_v11 = vadd.f32 %v2901_v54, %v2843_v3  ;;  %v2925_v18 = vadd.f32 %v2902_v35, %v2844_v34  ;;  %v2926_v21 = vadd.f32 %v2903_v58, %v2845_v41 }
 0x5d8   :  { %v2927_v36 = vadd.f32 %v2904_v1, %v2846_v61  ;;  %v2928_v22 = vadd.f32 %v2905_v32, %v2847_v30  ;;  %v2929_v5 = vadd.f32 %v2906_v29, %v2848_v16  ;;  %v2930_v24 = vadd.f32 %v2907_v4, %v2849_v33 }
 0x5d9   :  { %v2931_v56 = vadd.f32 %v2908_v47, %v2850_v27  ;;  %v2932_v42 = vadd.f32 %v2909_v13, %v2851_v25  ;;  %v2933_v9 = vadd.f32 %v2910_v37, %v2852_v6  ;;  %v2934_v40 = vadd.f32 %v2911_v60, %v2853_v26 }
 0x5da   :  { %v2935_v48 = vadd.f32 %v2912_v31, %v2854_v17  ;;  %v2936_v20 = vadd.f32 %v2913_v28, %v2855_v43  ;;  %v2937_v57 = vadd.f32 %v2914_v52, %v2856_v12  ;;  %v2938_v38 = vadd.f32 %v2915_v19, %v2857_v51 }
 0x5db   :  { %v2939_v44 = vadd.f32 %v2916_v45, %v2858_v15  ;;  %v2940_v39 = vadd.f32 %v2917_v63, %v2859_v50  ;;  %v2941_v14 = vadd.f32 %v2918_v55, %v2860_v59  ;;  %v2942_v54 = vadd.f32 %v2919_v0, %v2861_v8 }
 0x5dc   :  { %v2943_v35 = vadd.f32 %v2920_v2, %v2862_v10  ;;  %v2944_v7 = vadd.f32 %v2921_v23, %v2863_v46  ;;  %v2945_v53 = vmax.f32 %v2922_v62, 0.0  ;;  %v2946_v3 = vmax.f32 %v2923_v49, 0.0 }
 0x5dd   :  { %v2947_v58 = vmax.f32 %v2924_v11, 0.0  ;;  %v2948_v1 = vmax.f32 %v2925_v18, 0.0  ;;  %v2949_v32 = vmax.f32 %v2926_v21, 0.0  ;;  %v2950_v29 = vmax.f32 %v2927_v36, 0.0 }
 0x5de   :  { %v2951_v34 = vmax.f32 %v2928_v22, 0.0  ;;  %v2952_v41 = vmax.f32 %v2929_v5, 0.0  ;;  %v2953_v61 = vmax.f32 %v2930_v24, 0.0  ;;  %v2954_v4 = vmax.f32 %v2931_v56, 0.0  ;;  %2968 = vst [vmem:[%s5077_s11] sm:$0xff] %v2945_v53  ;;  %2969 = vst [vmem:[%s5077_s11 + $0x8] sm:$0xff] %v2946_v3 }
 0x5df   :  { %v2955_v47 = vmax.f32 %v2932_v42, 0.0  ;;  %v2956_v13 = vmax.f32 %v2933_v9, 0.0  ;;  %v2957_v37 = vmax.f32 %v2934_v40, 0.0  ;;  %v2958_v30 = vmax.f32 %v2935_v48, 0.0  ;;  %2970 = vst [vmem:[%s5077_s11 + $0x10] sm:$0xff] %v2947_v58  ;;  %2971 = vst [vmem:[%s5077_s11 + $0x18] sm:$0xff] %v2948_v1 }
 0x5e0   :  { %2972 = vst [vmem:[%s5077_s11 + $0x20] sm:$0xff] %v2949_v32  ;;  %2973 = vst [vmem:[%s5077_s11 + $0x28] sm:$0xff] %v2950_v29  ;;  %v2959_v16 = vmax.f32 %v2936_v20, 0.0  ;;  %v2960_v33 = vmax.f32 %v2937_v57, 0.0  ;;  %v2961_v60 = vmax.f32 %v2938_v38, 0.0  ;;  %v2962_v31 = vmax.f32 %v2939_v44, 0.0 }
 0x5e1   :  { %2974 = vst [vmem:[%s5077_s11 + $0x30] sm:$0xff] %v2951_v34  ;;  %2975 = vst [vmem:[%s5077_s11 + $0x38] sm:$0xff] %v2952_v41  ;;  %v2963_v28 = vmax.f32 %v2940_v39, 0.0  ;;  %v2964_v52 = vmax.f32 %v2941_v14, 0.0  ;;  %v2965_v27 = vmax.f32 %v2942_v54, 0.0  ;;  %v2966_v25 = vmax.f32 %v2943_v35, 0.0 }
 0x5e2   :  { %2976 = vst [vmem:[%s5077_s11 + $0x40] sm:$0xff] %v2953_v61  ;;  %2977 = vst [vmem:[%s5077_s11 + $0x48] sm:$0xff] %v2954_v4  ;;  %v2967_v6 = vmax.f32 %v2944_v7, 0.0 }
 0x5e3   :  { %2978 = vst [vmem:[%s5077_s11 + $0x50] sm:$0xff] %v2955_v47  ;;  %2979 = vst [vmem:[%s5077_s11 + $0x58] sm:$0xff] %v2956_v13 }
 0x5e4   :  { %2980 = vst [vmem:[%s5077_s11 + $0x60] sm:$0xff] %v2957_v37  ;;  %2981 = vst [vmem:[%s5077_s11 + $0x68] sm:$0xff] %v2958_v30 }
 0x5e5   :  { %2982 = vst [vmem:[%s5077_s11 + $0x70] sm:$0xff] %v2959_v16  ;;  %2983 = vst [vmem:[%s5077_s11 + $0x78] sm:$0xff] %v2960_v33 }
 0x5e6   :  { %2984 = vst [vmem:[%s5077_s11 + $0x80] sm:$0xff] %v2961_v60  ;;  %2985 = vst [vmem:[%s5077_s11 + $0x88] sm:$0xff] %v2962_v31 }
 0x5e7   :  { %2986 = vst [vmem:[%s5077_s11 + $0x90] sm:$0xff] %v2963_v28  ;;  %2987 = vst [vmem:[%s5077_s11 + $0x98] sm:$0xff] %v2964_v52 }
 0x5e8   :  { %2988 = vst [vmem:[%s5077_s11 + $0xa0] sm:$0xff] %v2965_v27  ;;  %2989 = vst [vmem:[%s5077_s11 + $0xa8] sm:$0xff] %v2966_v25 }
 0x5e9   :  { %2990 = vst [vmem:[%s5077_s11 + $0xb0] sm:$0x3] %v2967_v6 }

</bundles_post_ra>
